<compile_context>
chip_gen: v6e
topology: v6e:2x2x1
jax: 0.10.0
libtpu: 0.0.40
codegen_flags: <defaults>
</compile_context>

<pallas_src>
import functools

import numpy as np
import jax
import jax.numpy as jnp
from jax.experimental import pallas as pl
from jax.experimental.pallas import tpu as pltpu


def _round_down_to(x, m):
    return max(m, (x // m) * m)


def _itemsize(dtype):
    return np.dtype(dtype).itemsize


def _vmem_limit_bytes(*buffers):
    """buffers: (n_elems, itemsize) pairs. Assume double-buffering + 50% slack.

    Capped at 64 MiB so it also fits a v7x TensorCore (64 MiB VMEM)."""
    need = sum(2 * n * b for n, b in buffers)
    need = int(need * 1.5) + (1 << 20)
    return max(32 * 1024 * 1024, min(need, 64 * 1024 * 1024))


# ----------------------------------------------------------------------------
# Pallas kernel 1: y = act(x @ W + b)   (bf16 MXU inputs, f32 accumulate)
# ----------------------------------------------------------------------------
def _matmul_bias_act_kernel(x_ref, w_ref, b_ref, o_ref, *, activation):
    y = jnp.dot(x_ref[...], w_ref[...], preferred_element_type=jnp.float32)
    y = y + b_ref[...]                      # bias kept in f32
    if activation == "leaky_relu":
        y = jnp.maximum(y, 0.2 * y)         # one VPU op (no cmp+select)
    o_ref[...] = y.astype(o_ref.dtype)


def pallas_matmul_bias_act(x, w, b, *, activation=None, tile_m=512, out_dtype=None):
    """act(x @ w + b).  x: (M, K), w: (K, N), b: (N,) -> (M, N) out_dtype.

    No HBM padding copies: the K and N block dims equal the full array dims
    (the compiler pads the VMEM layout), and M uses a cdiv grid whose ragged
    last block is masked on the write side."""
    m, k = x.shape
    n = w.shape[1]
    out_dtype = x.dtype if out_dtype is None else out_dtype

    tm = min(tile_m, m)
    if tm < m:
        tm = _round_down_to(tm, 8)          # block row dim: multiple of 8 (or full dim)
    grid = (pl.cdiv(m, tm),)

    b2 = jnp.asarray(b, jnp.float32).reshape(1, n)

    xb, wb, ob = _itemsize(x.dtype), _itemsize(w.dtype), _itemsize(out_dtype)

    return pl.pallas_call(
        functools.partial(_matmul_bias_act_kernel, activation=activation),
        out_shape=jax.ShapeDtypeStruct((m, n), out_dtype),
        grid=grid,
        in_specs=[
            pl.BlockSpec((tm, k), lambda i: (i, 0)),   # activation row tile (pipelined)
            pl.BlockSpec((k, n), lambda i: (0, 0)),    # weights resident in VMEM
            pl.BlockSpec((1, n), lambda i: (0, 0)),    # bias resident in VMEM
        ],
        out_specs=pl.BlockSpec((tm, n), lambda i: (i, 0)),
        compiler_params=pltpu.CompilerParams(
            dimension_semantics=("parallel",),
            vmem_limit_bytes=_vmem_limit_bytes(
                (tm * k, xb), (k * n, wb), (n, 4), (tm * n, ob)),
        ),
        cost_estimate=pl.CostEstimate(
            flops=2 * m * k * n,
            transcendentals=0,
            bytes_accessed=m * k * xb + k * n * wb + n * 4 + m * n * ob,
        ),
    )(x, w, b2)


# ----------------------------------------------------------------------------
# Pallas kernel 2: sigmoid(x @ w^T + b) for the adversarial head (N == 1)
# ----------------------------------------------------------------------------
def _matvec_bias_sigmoid_kernel(x_ref, w_ref, b_ref, o_ref):
    x = x_ref[...].astype(jnp.float32)
    w = w_ref[...].astype(jnp.float32)                       # (1, K) row vector
    logit = jnp.sum(x * w, axis=1, keepdims=True) + b_ref[...]
    # sigmoid = EUP exp + approximate reciprocal (keeps the epilogue off the VALU)
    y = pl.reciprocal(1.0 + jnp.exp(-logit), approx=True)
    o_ref[...] = y.astype(o_ref.dtype)


def pallas_matvec_bias_sigmoid(x, w_row, b, *, tile_m=256):
    """sigmoid(x @ w_row.T + b).  x: (M, K), w_row: (1, K), b: (1, 1) -> (M, 1) f32.

    The weight stays a (1, K) row (never padded to (K, 128) lanes), so even for
    large img_size its VMEM footprint is K*4 bytes."""
    m, k = x.shape
    tm = min(tile_m, m)
    if tm < m:
        tm = _round_down_to(tm, 8)
    grid = (pl.cdiv(m, tm),)
    xb = _itemsize(x.dtype)

    return pl.pallas_call(
        _matvec_bias_sigmoid_kernel,
        out_shape=jax.ShapeDtypeStruct((m, 1), jnp.float32),
        grid=grid,
        in_specs=[
            pl.BlockSpec((tm, k), lambda i: (i, 0)),
            pl.BlockSpec((1, k), lambda i: (0, 0)),
            pl.BlockSpec((1, 1), lambda i: (0, 0)),
        ],
        out_specs=pl.BlockSpec((tm, 1), lambda i: (i, 0)),
        compiler_params=pltpu.CompilerParams(
            dimension_semantics=("parallel",),
            vmem_limit_bytes=_vmem_limit_bytes((tm * k, xb), (k, 4), (1, 4), (tm, 4)),
        ),
        cost_estimate=pl.CostEstimate(
            flops=2 * m * k,
            transcendentals=2 * m,
            bytes_accessed=m * k * xb + k * 4 + 4 + m * 4,
        ),
    )(x, w_row, b)


# ----------------------------------------------------------------------------
# Conv2d(3x3, stride 2, pad 1) = im2col (wrapper, data layout only) + Pallas GEMM
# ----------------------------------------------------------------------------
def _extract_patches_nhwc(x, ksize=3, stride=2, pad=1):
    """x: (N, H, W, C) -> patches (N*OH*OW, ksize*ksize*C), feature order (kh, kw, c)."""
    n, h, w, c = x.shape
    oh = (h + 2 * pad - ksize) // stride + 1
    ow = (w + 2 * pad - ksize) // stride + 1
    xp = jnp.pad(x, ((0, 0), (pad, pad), (pad, pad), (0, 0)))
    cols = []
    for kh in range(ksize):
        for kw in range(ksize):
            cols.append(
                jax.lax.slice(
                    xp,
                    (0, kh, kw, 0),
                    (n, kh + (oh - 1) * stride + 1, kw + (ow - 1) * stride + 1, c),
                    (1, stride, stride, 1),
                )
            )
    patches = jnp.concatenate(cols, axis=-1)  # (N, OH, OW, 9*C)
    return patches.reshape(n * oh * ow, ksize * ksize * c), (n, oh, ow)


def conv2d_leaky(x_nhwc, w, b, *, tile_m=512):
    """w: (KH, KW, Cin, Cout), b: (Cout,). Returns NHWC output after LeakyReLU(0.2)."""
    kh, kw, cin, cout = w.shape
    patches, (n, oh, ow) = _extract_patches_nhwc(x_nhwc, kh, 2, 1)
    wmat = w.reshape(kh * kw * cin, cout).astype(x_nhwc.dtype)  # bf16 MXU weights
    y = pallas_matmul_bias_act(
        patches, wmat, b, activation="leaky_relu", tile_m=tile_m,
        out_dtype=x_nhwc.dtype)
    return y.reshape(n, oh, ow, cout)


# ----------------------------------------------------------------------------
# Full Discriminator forward (inference mode)
# ----------------------------------------------------------------------------
def discriminator_forward(img, params, *, compute_dtype=jnp.bfloat16):
    """img: (N, C, H, W) float32 -> validity (N, 1) float32."""
    x = jnp.transpose(img, (0, 2, 3, 1)).astype(compute_dtype)  # NHWC, bf16
    tile_ms = (1024, 1024, 512, 512)   # bigger row tiles for the mem-bound early layers
    for i in range(1, 5):
        x = conv2d_leaky(x, params[f"w{i}"], params[f"b{i}"], tile_m=tile_ms[i - 1])
        # Dropout2d(0.25) is identity in eval/inference mode.
    n, oh, ow, c = x.shape
    # Flatten directly in NHWC order (no HBM transpose of the conv4 output);
    # instead, permute the adv weight rows once from the PyTorch NCHW-flatten order.
    flat = x.reshape(n, oh * ow * c)
    p = jnp.arange(oh * ow * c)
    perm = (p % c) * (oh * ow) + (p // c)
    w_row = params["w_adv"][perm, 0].reshape(1, oh * ow * c)   # stays f32 (tiny)
    b_adv = params["b_adv"].reshape(1, 1)
    return pallas_matvec_bias_sigmoid(flat, w_row, b_adv)


# ----------------------------------------------------------------------------
# Parameter init (torch-like fan-in uniform) and pure-JAX reference
# ----------------------------------------------------------------------------
def init_params(key, channels, img_size):
    ds = img_size // (2 ** 4)
    dims = [(channels, 64), (64, 128), (128, 256), (256, 512)]
    keys = jax.random.split(key, 10)
    params = {}
    for i, (cin, cout) in enumerate(dims, start=1):
        bound = 1.0 / jnp.sqrt(cin * 9.0)
        params[f"w{i}"] = jax.random.uniform(
            keys[2 * i - 2], (3, 3, cin, cout), jnp.float32, -bound, bound)
        params[f"b{i}"] = jax.random.uniform(
            keys[2 * i - 1], (cout,), jnp.float32, -bound, bound)
    in_f = 512 * ds * ds
    bound = 1.0 / jnp.sqrt(float(in_f))
    params["w_adv"] = jax.random.uniform(keys[8], (in_f, 1), jnp.float32, -bound, bound)
    params["b_adv"] = jax.random.uniform(keys[9], (1,), jnp.float32, -bound, bound)
    return params


def discriminator_forward_ref(img, params):
    """Pure-JAX (XLA conv, f32) reference for correctness checking."""
    x = img
    for i in range(1, 5):
        w = params[f"w{i}"]                      # (KH, KW, Cin, Cout)
        w_oihw = jnp.transpose(w, (3, 2, 0, 1))  # (Cout, Cin, KH, KW)
        x = jax.lax.conv_general_dilated(
            x, w_oihw,
            window_strides=(2, 2),
            padding=((1, 1), (1, 1)),
            dimension_numbers=("NCHW", "OIHW", "NCHW"),
            precision=jax.lax.Precision.HIGHEST,
        )
        x = x + params[f"b{i}"].reshape(1, -1, 1, 1)
        x = jnp.where(x > 0, x, 0.2 * x)
    flat = x.reshape(x.shape[0], -1)
    logits = jnp.dot(flat, params["w_adv"], precision=jax.lax.Precision.HIGHEST)
    logits = logits + params["b_adv"]
    return jax.nn.sigmoid(logits)


if __name__ == "__main__":
    # Small shapes consistent with the module: channels=4, img_size=16 -> ds_size=1
    batch, channels, img_size = 2, 4, 16

    key = jax.random.PRNGKey(0)
    k_img, k_par = jax.random.split(key)
    img = jax.random.normal(k_img, (batch, channels, img_size, img_size), jnp.float32)
    params = init_params(k_par, channels, img_size)

    fwd = jax.jit(discriminator_forward)
    out = jax.block_until_ready(fwd(img, params))

    ref = discriminator_forward_ref(img, params)
    assert out.shape == (batch, 1)
    # bf16 MXU inputs with f32 accumulation (+ approx-reciprocal sigmoid):
    # tolerance relaxed accordingly vs. a pure-f32 reference.
    assert jnp.allclose(out, ref, atol=1e-2, rtol=1e-2), (out, ref)

    print("KERNEL_OK")
</pallas_src>

<mosaic_0001>
module attributes {stable_mosaic.version = 11 : i64} {
  func.func @_matmul_bias_act_kernel(%arg0: i32, %arg1: memref<128x36xbf16, #tpu.memory_space<vmem>>, %arg2: memref<36x64xbf16, #tpu.memory_space<vmem>>, %arg3: memref<1x64xf32, #tpu.memory_space<vmem>>, %arg4: memref<128x64xbf16, #tpu.memory_space<vmem>>) attributes {dimension_semantics = [#tpu.dimension_semantics<parallel>], iteration_bounds = array<i64: 1>, scalar_prefetch = 0 : i64, scratch_operands = 0 : i64, tpu.core_type = #tpu.core_type<tc>, window_params = [{transform_indices = @transform_0, window_bounds = array<i64: 128, 36>}, {pipeline_mode = #tpu.pipeline_mode<synchronous>, transform_indices = @transform_1, window_bounds = array<i64: 36, 64>}, {pipeline_mode = #tpu.pipeline_mode<synchronous>, transform_indices = @transform_2, window_bounds = array<i64: 1, 64>}, {transform_indices = @transform_3, window_bounds = array<i64: 128, 64>}]} {
    %c0 = arith.constant 0 : index
    %c0_0 = arith.constant 0 : index
    %0 = vector.load %arg1[%c0, %c0_0] : memref<128x36xbf16, #tpu.memory_space<vmem>>, vector<128x36xbf16>
    %c0_1 = arith.constant 0 : index
    %c0_2 = arith.constant 0 : index
    %1 = vector.load %arg2[%c0_1, %c0_2] : memref<36x64xbf16, #tpu.memory_space<vmem>>, vector<36x64xbf16>
    %cst = arith.constant dense<0.000000e+00> : vector<128x64xf32>
    %2 = tpu.matmul %0, %1, %cst {dimension_numbers = #tpu.dot_dimension_numbers<[1], [0], [0], [1], [0, 0, 1, 1], [], []>} : vector<128x36xbf16>, vector<36x64xbf16>, vector<128x64xf32> -> vector<128x64xf32>
    %c0_3 = arith.constant 0 : index
    %c0_4 = arith.constant 0 : index
    %3 = vector.load %arg3[%c0_3, %c0_4] : memref<1x64xf32, #tpu.memory_space<vmem>>, vector<1x64xf32>
    %4 = vector.broadcast %3 : vector<1x64xf32> to vector<128x64xf32>
    %5 = arith.addf %2, %4 : vector<128x64xf32>
    %cst_5 = arith.constant 2.000000e-01 : f32
    %6 = vector.broadcast %cst_5 : f32 to vector<128x64xf32>
    %7 = arith.mulf %6, %5 : vector<128x64xf32>
    %8 = arith.maximumf %5, %7 : vector<128x64xf32>
    %9 = arith.truncf %8 : vector<128x64xf32> to vector<128x64xbf16>
    %c0_6 = arith.constant 0 : index
    %c0_7 = arith.constant 0 : index
    %10 = vector.load %arg4[%c0_6, %c0_7] : memref<128x64xbf16, #tpu.memory_space<vmem>>, vector<128x64xbf16>
    tpu.vector_store %arg4[%c0_6, %c0_7], %9 {strides = array<i32>} : memref<128x64xbf16, #tpu.memory_space<vmem>>, vector<128x64xbf16>,
    return
  }
  func.func @transform_0(%arg0: i32) -> (i32, i32) {
    %c0_i32 = arith.constant 0 : i32
    %c0_i32_0 = arith.constant 0 : i32
    return %arg0, %c0_i32 : i32, i32
  }
  func.func @transform_1(%arg0: i32) -> (i32, i32) {
    %c0_i32 = arith.constant 0 : i32
    %c0_i32_0 = arith.constant 0 : i32
    %c0_i32_1 = arith.constant 0 : i32
    return %c0_i32, %c0_i32_0 : i32, i32
  }
  func.func @transform_2(%arg0: i32) -> (i32, i32) {
    %c0_i32 = arith.constant 0 : i32
    %c0_i32_0 = arith.constant 0 : i32
    %c0_i32_1 = arith.constant 0 : i32
    return %c0_i32, %c0_i32_0 : i32, i32
  }
  func.func @transform_3(%arg0: i32) -> (i32, i32) {
    %c0_i32 = arith.constant 0 : i32
    %c0_i32_0 = arith.constant 0 : i32
    return %arg0, %c0_i32 : i32, i32
  }
}

module attributes {stable_mosaic.version = 11 : i64} {
  func.func @_matmul_bias_act_kernel(%arg0: i32, %arg1: memref<32x576xbf16, #tpu.memory_space<vmem>>, %arg2: memref<576x128xbf16, #tpu.memory_space<vmem>>, %arg3: memref<1x128xf32, #tpu.memory_space<vmem>>, %arg4: memref<32x128xbf16, #tpu.memory_space<vmem>>) attributes {dimension_semantics = [#tpu.dimension_semantics<parallel>], iteration_bounds = array<i64: 1>, scalar_prefetch = 0 : i64, scratch_operands = 0 : i64, tpu.core_type = #tpu.core_type<tc>, window_params = [{transform_indices = @transform_0, window_bounds = array<i64: 32, 576>}, {pipeline_mode = #tpu.pipeline_mode<synchronous>, transform_indices = @transform_1, window_bounds = array<i64: 576, 128>}, {pipeline_mode = #tpu.pipeline_mode<synchronous>, transform_indices = @transform_2, window_bounds = array<i64: 1, 128>}, {transform_indices = @transform_3, window_bounds = array<i64: 32, 128>}]} {
    %c0 = arith.constant 0 : index
    %c0_0 = arith.constant 0 : index
    %0 = vector.load %arg1[%c0, %c0_0] : memref<32x576xbf16, #tpu.memory_space<vmem>>, vector<32x576xbf16>
    %c0_1 = arith.constant 0 : index
    %c0_2 = arith.constant 0 : index
    %1 = vector.load %arg2[%c0_1, %c0_2] : memref<576x128xbf16, #tpu.memory_space<vmem>>, vector<576x128xbf16>
    %cst = arith.constant dense<0.000000e+00> : vector<32x128xf32>
    %2 = tpu.matmul %0, %1, %cst {dimension_numbers = #tpu.dot_dimension_numbers<[1], [0], [0], [1], [0, 0, 1, 1], [], []>} : vector<32x576xbf16>, vector<576x128xbf16>, vector<32x128xf32> -> vector<32x128xf32>
    %c0_3 = arith.constant 0 : index
    %c0_4 = arith.constant 0 : index
    %3 = vector.load %arg3[%c0_3, %c0_4] : memref<1x128xf32, #tpu.memory_space<vmem>>, vector<1x128xf32>
    %4 = vector.broadcast %3 : vector<1x128xf32> to vector<32x128xf32>
    %5 = arith.addf %2, %4 : vector<32x128xf32>
    %cst_5 = arith.constant 2.000000e-01 : f32
    %6 = vector.broadcast %cst_5 : f32 to vector<32x128xf32>
    %7 = arith.mulf %6, %5 : vector<32x128xf32>
    %8 = arith.maximumf %5, %7 : vector<32x128xf32>
    %9 = arith.truncf %8 : vector<32x128xf32> to vector<32x128xbf16>
    %c0_6 = arith.constant 0 : index
    %c0_7 = arith.constant 0 : index
    %10 = vector.load %arg4[%c0_6, %c0_7] : memref<32x128xbf16, #tpu.memory_space<vmem>>, vector<32x128xbf16>
    tpu.vector_store %arg4[%c0_6, %c0_7], %9 {strides = array<i32>} : memref<32x128xbf16, #tpu.memory_space<vmem>>, vector<32x128xbf16>,
    return
  }
  func.func @transform_0(%arg0: i32) -> (i32, i32) {
    %c0_i32 = arith.constant 0 : i32
    %c0_i32_0 = arith.constant 0 : i32
    return %arg0, %c0_i32 : i32, i32
  }
  func.func @transform_1(%arg0: i32) -> (i32, i32) {
    %c0_i32 = arith.constant 0 : i32
    %c0_i32_0 = arith.constant 0 : i32
    %c0_i32_1 = arith.constant 0 : i32
    return %c0_i32, %c0_i32_0 : i32, i32
  }
  func.func @transform_2(%arg0: i32) -> (i32, i32) {
    %c0_i32 = arith.constant 0 : i32
    %c0_i32_0 = arith.constant 0 : i32
    %c0_i32_1 = arith.constant 0 : i32
    return %c0_i32, %c0_i32_0 : i32, i32
  }
  func.func @transform_3(%arg0: i32) -> (i32, i32) {
    %c0_i32 = arith.constant 0 : i32
    %c0_i32_0 = arith.constant 0 : i32
    return %arg0, %c0_i32 : i32, i32
  }
}

module attributes {stable_mosaic.version = 11 : i64} {
  func.func @_matmul_bias_act_kernel(%arg0: i32, %arg1: memref<8x1152xbf16, #tpu.memory_space<vmem>>, %arg2: memref<1152x256xbf16, #tpu.memory_space<vmem>>, %arg3: memref<1x256xf32, #tpu.memory_space<vmem>>, %arg4: memref<8x256xbf16, #tpu.memory_space<vmem>>) attributes {dimension_semantics = [#tpu.dimension_semantics<parallel>], iteration_bounds = array<i64: 1>, scalar_prefetch = 0 : i64, scratch_operands = 0 : i64, tpu.core_type = #tpu.core_type<tc>, window_params = [{transform_indices = @transform_0, window_bounds = array<i64: 8, 1152>}, {pipeline_mode = #tpu.pipeline_mode<synchronous>, transform_indices = @transform_1, window_bounds = array<i64: 1152, 256>}, {pipeline_mode = #tpu.pipeline_mode<synchronous>, transform_indices = @transform_2, window_bounds = array<i64: 1, 256>}, {transform_indices = @transform_3, window_bounds = array<i64: 8, 256>}]} {
    %c0 = arith.constant 0 : index
    %c0_0 = arith.constant 0 : index
    %0 = vector.load %arg1[%c0, %c0_0] : memref<8x1152xbf16, #tpu.memory_space<vmem>>, vector<8x1152xbf16>
    %c0_1 = arith.constant 0 : index
    %c0_2 = arith.constant 0 : index
    %1 = vector.load %arg2[%c0_1, %c0_2] : memref<1152x256xbf16, #tpu.memory_space<vmem>>, vector<1152x256xbf16>
    %cst = arith.constant dense<0.000000e+00> : vector<8x256xf32>
    %2 = tpu.matmul %0, %1, %cst {dimension_numbers = #tpu.dot_dimension_numbers<[1], [0], [0], [1], [0, 0, 1, 1], [], []>} : vector<8x1152xbf16>, vector<1152x256xbf16>, vector<8x256xf32> -> vector<8x256xf32>
    %c0_3 = arith.constant 0 : index
    %c0_4 = arith.constant 0 : index
    %3 = vector.load %arg3[%c0_3, %c0_4] : memref<1x256xf32, #tpu.memory_space<vmem>>, vector<1x256xf32>
    %4 = vector.broadcast %3 : vector<1x256xf32> to vector<8x256xf32>
    %5 = arith.addf %2, %4 : vector<8x256xf32>
    %cst_5 = arith.constant 2.000000e-01 : f32
    %6 = vector.broadcast %cst_5 : f32 to vector<8x256xf32>
    %7 = arith.mulf %6, %5 : vector<8x256xf32>
    %8 = arith.maximumf %5, %7 : vector<8x256xf32>
    %9 = arith.truncf %8 : vector<8x256xf32> to vector<8x256xbf16>
    %c0_6 = arith.constant 0 : index
    %c0_7 = arith.constant 0 : index
    %10 = vector.load %arg4[%c0_6, %c0_7] : memref<8x256xbf16, #tpu.memory_space<vmem>>, vector<8x256xbf16>
    tpu.vector_store %arg4[%c0_6, %c0_7], %9 {strides = array<i32>} : memref<8x256xbf16, #tpu.memory_space<vmem>>, vector<8x256xbf16>,
    return
  }
  func.func @transform_0(%arg0: i32) -> (i32, i32) {
    %c0_i32 = arith.constant 0 : i32
    %c0_i32_0 = arith.constant 0 : i32
    return %arg0, %c0_i32 : i32, i32
  }
  func.func @transform_1(%arg0: i32) -> (i32, i32) {
    %c0_i32 = arith.constant 0 : i32
    %c0_i32_0 = arith.constant 0 : i32
    %c0_i32_1 = arith.constant 0 : i32
    return %c0_i32, %c0_i32_0 : i32, i32
  }
  func.func @transform_2(%arg0: i32) -> (i32, i32) {
    %c0_i32 = arith.constant 0 : i32
    %c0_i32_0 = arith.constant 0 : i32
    %c0_i32_1 = arith.constant 0 : i32
    return %c0_i32, %c0_i32_0 : i32, i32
  }
  func.func @transform_3(%arg0: i32) -> (i32, i32) {
    %c0_i32 = arith.constant 0 : i32
    %c0_i32_0 = arith.constant 0 : i32
    return %arg0, %c0_i32 : i32, i32
  }
}

module attributes {stable_mosaic.version = 11 : i64} {
  func.func @_matmul_bias_act_kernel(%arg0: i32, %arg1: memref<2x2304xbf16, #tpu.memory_space<vmem>>, %arg2: memref<2304x512xbf16, #tpu.memory_space<vmem>>, %arg3: memref<1x512xf32, #tpu.memory_space<vmem>>, %arg4: memref<2x512xbf16, #tpu.memory_space<vmem>>) attributes {dimension_semantics = [#tpu.dimension_semantics<parallel>], iteration_bounds = array<i64: 1>, scalar_prefetch = 0 : i64, scratch_operands = 0 : i64, tpu.core_type = #tpu.core_type<tc>, window_params = [{transform_indices = @transform_0, window_bounds = array<i64: 2, 2304>}, {pipeline_mode = #tpu.pipeline_mode<synchronous>, transform_indices = @transform_1, window_bounds = array<i64: 2304, 512>}, {pipeline_mode = #tpu.pipeline_mode<synchronous>, transform_indices = @transform_2, window_bounds = array<i64: 1, 512>}, {transform_indices = @transform_3, window_bounds = array<i64: 2, 512>}]} {
    %c0 = arith.constant 0 : index
    %c0_0 = arith.constant 0 : index
    %0 = vector.load %arg1[%c0, %c0_0] : memref<2x2304xbf16, #tpu.memory_space<vmem>>, vector<2x2304xbf16>
    %c0_1 = arith.constant 0 : index
    %c0_2 = arith.constant 0 : index
    %1 = vector.load %arg2[%c0_1, %c0_2] : memref<2304x512xbf16, #tpu.memory_space<vmem>>, vector<2304x512xbf16>
    %cst = arith.constant dense<0.000000e+00> : vector<2x512xf32>
    %2 = tpu.matmul %0, %1, %cst {dimension_numbers = #tpu.dot_dimension_numbers<[1], [0], [0], [1], [0, 0, 1, 1], [], []>} : vector<2x2304xbf16>, vector<2304x512xbf16>, vector<2x512xf32> -> vector<2x512xf32>
    %c0_3 = arith.constant 0 : index
    %c0_4 = arith.constant 0 : index
    %3 = vector.load %arg3[%c0_3, %c0_4] : memref<1x512xf32, #tpu.memory_space<vmem>>, vector<1x512xf32>
    %4 = vector.broadcast %3 : vector<1x512xf32> to vector<2x512xf32>
    %5 = arith.addf %2, %4 : vector<2x512xf32>
    %cst_5 = arith.constant 2.000000e-01 : f32
    %6 = vector.broadcast %cst_5 : f32 to vector<2x512xf32>
    %7 = arith.mulf %6, %5 : vector<2x512xf32>
    %8 = arith.maximumf %5, %7 : vector<2x512xf32>
    %9 = arith.truncf %8 : vector<2x512xf32> to vector<2x512xbf16>
    %c0_6 = arith.constant 0 : index
    %c0_7 = arith.constant 0 : index
    %10 = vector.load %arg4[%c0_6, %c0_7] : memref<2x512xbf16, #tpu.memory_space<vmem>>, vector<2x512xbf16>
    tpu.vector_store %arg4[%c0_6, %c0_7], %9 {strides = array<i32>} : memref<2x512xbf16, #tpu.memory_space<vmem>>, vector<2x512xbf16>,
    return
  }
  func.func @transform_0(%arg0: i32) -> (i32, i32) {
    %c0_i32 = arith.constant 0 : i32
    %c0_i32_0 = arith.constant 0 : i32
    return %arg0, %c0_i32 : i32, i32
  }
  func.func @transform_1(%arg0: i32) -> (i32, i32) {
    %c0_i32 = arith.constant 0 : i32
    %c0_i32_0 = arith.constant 0 : i32
    %c0_i32_1 = arith.constant 0 : i32
    return %c0_i32, %c0_i32_0 : i32, i32
  }
  func.func @transform_2(%arg0: i32) -> (i32, i32) {
    %c0_i32 = arith.constant 0 : i32
    %c0_i32_0 = arith.constant 0 : i32
    %c0_i32_1 = arith.constant 0 : i32
    return %c0_i32, %c0_i32_0 : i32, i32
  }
  func.func @transform_3(%arg0: i32) -> (i32, i32) {
    %c0_i32 = arith.constant 0 : i32
    %c0_i32_0 = arith.constant 0 : i32
    return %arg0, %c0_i32 : i32, i32
  }
}

module attributes {stable_mosaic.version = 11 : i64} {
  func.func @_matvec_bias_sigmoid_kernel(%arg0: i32, %arg1: memref<2x512xbf16, #tpu.memory_space<vmem>>, %arg2: memref<1x512xf32, #tpu.memory_space<vmem>>, %arg3: memref<1x1xf32, #tpu.memory_space<vmem>>, %arg4: memref<2x1xf32, #tpu.memory_space<vmem>>) attributes {dimension_semantics = [#tpu.dimension_semantics<parallel>], iteration_bounds = array<i64: 1>, scalar_prefetch = 0 : i64, scratch_operands = 0 : i64, tpu.core_type = #tpu.core_type<tc>, window_params = [{transform_indices = @transform_0, window_bounds = array<i64: 2, 512>}, {pipeline_mode = #tpu.pipeline_mode<synchronous>, transform_indices = @transform_1, window_bounds = array<i64: 1, 512>}, {pipeline_mode = #tpu.pipeline_mode<synchronous>, transform_indices = @transform_2, window_bounds = array<i64: 1, 1>}, {transform_indices = @transform_3, window_bounds = array<i64: 2, 1>}]} {
    %c0 = arith.constant 0 : index
    %c0_0 = arith.constant 0 : index
    %0 = vector.load %arg1[%c0, %c0_0] : memref<2x512xbf16, #tpu.memory_space<vmem>>, vector<2x512xbf16>
    %1 = arith.extf %0 : vector<2x512xbf16> to vector<2x512xf32>
    %c0_1 = arith.constant 0 : index
    %c0_2 = arith.constant 0 : index
    %2 = vector.load %arg2[%c0_1, %c0_2] : memref<1x512xf32, #tpu.memory_space<vmem>>, vector<1x512xf32>
    %3 = vector.broadcast %2 : vector<1x512xf32> to vector<2x512xf32>
    %4 = arith.mulf %1, %3 : vector<2x512xf32>
    %cst = arith.constant dense<0.000000e+00> : vector<2xf32>
    %5 = vector.multi_reduction <add>, %4, %cst [1] : vector<2x512xf32> to vector<2xf32>
    %6 = vector.shape_cast %5 : vector<2xf32> to vector<2x1xf32>
    %c0_3 = arith.constant 0 : index
    %c0_4 = arith.constant 0 : index
    %7 = vector.load %arg3[%c0_3, %c0_4] : memref<1x1xf32, #tpu.memory_space<vmem>>, vector<1x1xf32>
    %8 = vector.broadcast %7 : vector<1x1xf32> to vector<2x1xf32>
    %9 = arith.addf %6, %8 : vector<2x1xf32>
    %cst_5 = arith.constant 0.000000e+00 : f32
    %10 = vector.broadcast %cst_5 : f32 to vector<2x1xf32>
    %11 = arith.subf %10, %9 : vector<2x1xf32>
    %12 = math.exp %11 : vector<2x1xf32>
    %cst_6 = arith.constant 1.000000e+00 : f32
    %13 = vector.broadcast %cst_6 : f32 to vector<2x1xf32>
    %14 = arith.addf %13, %12 : vector<2x1xf32>
    %15 = tpu.reciprocal %14 {approx = true} : vector<2x1xf32> -> vector<2x1xf32>
    %c0_7 = arith.constant 0 : index
    %c0_8 = arith.constant 0 : index
    %16 = vector.load %arg4[%c0_7, %c0_8] : memref<2x1xf32, #tpu.memory_space<vmem>>, vector<2x1xf32>
    tpu.vector_store %arg4[%c0_7, %c0_8], %15 {strides = array<i32>} : memref<2x1xf32, #tpu.memory_space<vmem>>, vector<2x1xf32>,
    return
  }
  func.func @transform_0(%arg0: i32) -> (i32, i32) {
    %c0_i32 = arith.constant 0 : i32
    %c0_i32_0 = arith.constant 0 : i32
    return %arg0, %c0_i32 : i32, i32
  }
  func.func @transform_1(%arg0: i32) -> (i32, i32) {
    %c0_i32 = arith.constant 0 : i32
    %c0_i32_0 = arith.constant 0 : i32
    %c0_i32_1 = arith.constant 0 : i32
    return %c0_i32, %c0_i32_0 : i32, i32
  }
  func.func @transform_2(%arg0: i32) -> (i32, i32) {
    %c0_i32 = arith.constant 0 : i32
    %c0_i32_0 = arith.constant 0 : i32
    %c0_i32_1 = arith.constant 0 : i32
    return %c0_i32, %c0_i32_0 : i32, i32
  }
  func.func @transform_3(%arg0: i32) -> (i32, i32) {
    %c0_i32 = arith.constant 0 : i32
    %c0_i32_0 = arith.constant 0 : i32
    return %arg0, %c0_i32 : i32, i32
  }
}

</mosaic_0001>

<bundles_post_ra>
// kernel: discriminator_forward.5
= control target key start
LH: loop header
LB: loop body
LE: loop exit
PB: predicated region body
PF: predicated region fallthrough
CT: control target
= control target key end

     0   :  { %8 = vsyncpa [#allocation3], 0  ;;  %s481_s12 = smov [#allocation2]   ;;  %s628_s0 = inlined_call_operand.vmem [shape: bf16[128,36], index: 0, kind: input, shape index: {}]   ;;  %s629_s1 = inlined_call_operand.vmem [shape: bf16[36,64], index: 1, kind: input, shape index: {}]   ;;  %s630_s2 = inlined_call_operand.hbm [shape: f32[1,64], index: 2, kind: input, shape index: {}]   ;;  %s631_s3 = inlined_call_operand.vmem [shape: bf16[128,64], index: 3, kind: output, shape index: {}]  }
   0x1   :  { %s19_s13 = sshll.u32 %s481_s12, 4  ;;  %s20_s13 = int_to_ptr.vmem [resolvable:$true] %s19_s13 }
   0x2   :  { %s467_s14 = scalar_lea.vmem %s20_s13, 16  ;;  %s471_s15 = scalar_lea.vmem %s20_s13, 32 }
   0x3   :  { %p468_p0 = scmp.ne.s32.totalorder %s20_s13, %s467_s14  ;;  %p472_p1 = scmp.lt.s32.totalorder %s20_s13, %s20_s13 }
   0x4   :  { %p473_p2 = scmp.lt.s32.totalorder %s471_s15, %s467_s14 }
   0x6   :  { %p474_p3 = por %p473_p2, %p472_p1 }
   0x8   :  { %p475_p4 = pnand %p474_p3, %p468_p0 }
   0xa   :  { %478 = shalt.err (!%p475_p4)
}
   0xb   :  { %22 = dma.hbm_to_vmem [thread:$0]  %s630_s2, 16, %s20_s13, [#allocation3]  }
   0xc   :  { %479 = dma.done.wait [#allocation3], 16  }
   0xd   :  { %480 = vsyncadd [#allocation3], 4294967280  ;;  %vm135_vm0 = vcmask 1041408   ;;  %vm110_vm1 = vcmask 293888   ;;  %v449_v1 = vld [vmem:[%s629_s1 + $0x8] sm:$0xff]   ;;  %v450_v3 = vld [vmem:[%s629_s1] sm:$0xff]  }
   0xe   :  { %v448_v0 = vld [vmem:[%s629_s1 + $0x10] ss:$0 sps:$4 sm:$0x33]   ;;  %v451_v4 = vld [vmem:[%s628_s0] sm:$0xff]   ;;  %v453_v6 = vld [vmem:[%s628_s0 + $0x8] sm:$0xff]   ;;  %vm332_vm2 = vcmask 519168  }
   0xf   :  { %445 = vmatprep.subr.msk.bf16.mxu0 %vm135_vm0, %v448_v0  ;;  %446 = vmatprep.subr.msk.bf16.mxu1 %vm135_vm0, %v448_v0  ;;  %v137_v2 = vsel %vm135_vm0, %v448_v0, 0  ;;  %v452_v5 = vld [vmem:[%s628_s0 + $0x20] sm:$0xff]   ;;  %v454_v7 = vld [vmem:[%s628_s0 + $0x28] sm:$0xff]   ;;  %v455_v8 = vld [vmem:[%s628_s0 + $0x10] sm:$0xff]  }
  0x10   :  { %418 = vmatpush3.bf16.msra.mxu0 %v137_v2  ;;  %442 = vmatpush3.bf16.msra.mxu1 %v137_v2  ;;  %v456_v9 = vld [vmem:[%s628_s0 + $0x30] sm:$0xff]   ;;  %v457_v10 = vld [vmem:[%s628_s0 + $0x18] sm:$0xff]   ;;  %v546_v12 = vld [vmem:[#allocation2] ss:$0 sm:$0xff] }
  0x11   :  { %419 = vmatprep.subr.bf16.mxu0 %v449_v1  ;;  %440 = vmatprep.subr.bf16.mxu1 %v449_v1  ;;  %v458_v11 = vld [vmem:[%s628_s0 + $0x38] sm:$0xff]  }
  0x12   :  { %423 = vmatprep.mubr.msk.bf16.mxu0 %vm110_vm1, %v451_v4  ;;  %431 = vmatprep.mubr.msk.bf16.mxu1 %vm110_vm1, %v452_v5 }
  0x14   :  { %420 = vmatpush3.bf16.msra.mxu0 %v449_v1  ;;  %443 = vmatpush3.bf16.msra.mxu1 %v449_v1 }
  0x15   :  { %421 = vmatprep.subr.bf16.mxu0 %v450_v3  ;;  %441 = vmatprep.subr.bf16.mxu1 %v450_v3 }
  0x18   :  { %422 = vmatpush3.bf16.msra.mxu0 %v450_v3  ;;  %444 = vmatpush3.bf16.msra.mxu1 %v450_v3 }
  0x1b   :  { %424 = vmatmul.mubr.msk.bf16.vlgmr.msra.gmra.mxu0 %vm110_vm1, %v453_v6  ;;  %432 = vmatmul.mubr.msk.bf16.vlgmr.msra.gmra.mxu1 %vm110_vm1, %v454_v7 }
  0x1c   :  { %427 = vmatprep.mubr.msk.bf16.mxu0 %vm110_vm1, %v455_v8  ;;  %435 = vmatprep.mubr.msk.bf16.mxu1 %vm110_vm1, %v456_v9 }
  0x23   :  { %428 = vmatmul.mubr.msk.bf16.gmra.mxu0 %vm110_vm1, %v457_v10  ;;  %436 = vmatmul.mubr.msk.bf16.gmra.mxu1 %vm110_vm1, %v458_v11 }
  0xdb   :  { %v425_v13 = vpop.f32.mrf.mxu0  ;;  %v433_v14 = vpop.f32.mrf.mxu1 }
  0xdc   :  { %v182_v15 = vadd.f32 %v425_v13, %v546_v12  ;;  %v214_v16 = vadd.f32 %v433_v14, %v546_v12 }
  0xdd   :  { %v173_v17 = vpop.f32.mrf.mxu0  ;;  %v205_v18 = vpop.f32.mrf.mxu1 }
  0xde   :  { %v238_v19 = vmul.f32 0.2, %v182_v15  ;;  %v246_v20 = vmul.f32 0.2, %v214_v16  ;;  %v174_v21 = vadd.f32 %v546_v12, %v173_v17  ;;  %v206_v22 = vadd.f32 %v546_v12, %v205_v18 }
  0xdf   :  { %v426_v23 = vpop.f32.mrf.mxu0  ;;  %v434_v24 = vpop.f32.mrf.mxu1 }
  0xe0   :  { %v254_v25 = vmax.f32 %v182_v15, %v238_v19  ;;  %v262_v26 = vmax.f32 %v214_v16, %v246_v20  ;;  %v236_v27 = vmul.f32 0.2, %v174_v21  ;;  %v244_v28 = vmul.f32 0.2, %v206_v22 }
  0xe1   :  { %v185_v29 = vadd.f32 %v426_v23, %v546_v12  ;;  %v217_v30 = vadd.f32 %v434_v24, %v546_v12  ;;  %v176_v31 = vpop.f32.mrf.mxu0  ;;  %v208_v32 = vpop.f32.mrf.mxu1 }
  0xe2   :  { %v392_v33 = vpack.c.bf16 %v254_v25, %v254_v25  ;;  %v400_v34 = vpack.c.bf16 %v262_v26, %v262_v26  ;;  %v252_v35 = vmax.f32 %v174_v21, %v236_v27  ;;  %v260_v36 = vmax.f32 %v206_v22, %v244_v28 }
  0xe3   :  { %v239_v37 = vmul.f32 0.2, %v185_v29  ;;  %v247_v38 = vmul.f32 0.2, %v217_v30  ;;  %v177_v39 = vadd.f32 %v546_v12, %v176_v31  ;;  %v209_v40 = vadd.f32 %v546_v12, %v208_v32  ;;  %v429_v41 = vpop.f32.mrf.mxu0  ;;  %v437_v42 = vpop.f32.mrf.mxu1 }
  0xe4   :  { %335 = vst.msk [vmem:[%s631_s3 + $0x8] sm:$0xf] %vm332_vm2, %v392_v33  ;;  %343 = vst.msk [vmem:[%s631_s3 + $0x28] sm:$0xf] %vm332_vm2, %v400_v34  ;;  %v390_v43 = vpack.c.bf16 %v252_v35, %v252_v35  ;;  %v398_v44 = vpack.c.bf16 %v260_v36, %v260_v36  ;;  %v198_v45 = vadd.f32 %v429_v41, %v546_v12 }
  0xe5   :  { %v230_v46 = vadd.f32 %v437_v42, %v546_v12  ;;  %v255_v47 = vmax.f32 %v185_v29, %v239_v37  ;;  %v263_v48 = vmax.f32 %v217_v30, %v247_v38  ;;  %v237_v49 = vmul.f32 0.2, %v177_v39  ;;  %v189_v51 = vpop.f32.mrf.mxu0  ;;  %v221_v52 = vpop.f32.mrf.mxu1 }
  0xe6   :  { %v245_v50 = vmul.f32 0.2, %v209_v40  ;;  %333 = vst.msk [vmem:[%s631_s3] sm:$0xf] %vm332_vm2, %v390_v43  ;;  %341 = vst.msk [vmem:[%s631_s3 + $0x20] sm:$0xf] %vm332_vm2, %v398_v44  ;;  %v190_v55 = vadd.f32 %v546_v12, %v189_v51  ;;  %v222_v56 = vadd.f32 %v546_v12, %v221_v52 }
  0xe7   :  { %v242_v53 = vmul.f32 0.2, %v198_v45  ;;  %v250_v54 = vmul.f32 0.2, %v230_v46  ;;  %v393_v57 = vpack.c.bf16 %v255_v47, %v255_v47  ;;  %v401_v58 = vpack.c.bf16 %v263_v48, %v263_v48  ;;  %v430_v61 = vpop.f32.mrf.mxu0  ;;  %v438_v62 = vpop.f32.mrf.mxu1 }
  0xe8   :  { %v253_v59 = vmax.f32 %v177_v39, %v237_v49  ;;  %v261_v60 = vmax.f32 %v209_v40, %v245_v50  ;;  %v240_v1 = vmul.f32 0.2, %v190_v55  ;;  %v248_v2 = vmul.f32 0.2, %v222_v56 }
  0xe9   :  { %v258_v63 = vmax.f32 %v198_v45, %v242_v53  ;;  %v266_v0 = vmax.f32 %v230_v46, %v250_v54  ;;  %336 = vst.msk [vmem:[%s631_s3 + $0xc] sm:$0xf] %vm332_vm2, %v393_v57  ;;  %344 = vst.msk [vmem:[%s631_s3 + $0x2c] sm:$0xf] %vm332_vm2, %v401_v58  ;;  %v201_v5 = vadd.f32 %v430_v61, %v546_v12  ;;  %v192_v7 = vpop.f32.mrf.mxu0  ;;  %v224_v8 = vpop.f32.mrf.mxu1 }
  0xea   :  { %v391_v3 = vpack.c.bf16 %v253_v59, %v253_v59  ;;  %v399_v4 = vpack.c.bf16 %v261_v60, %v261_v60  ;;  %v233_v6 = vadd.f32 %v438_v62, %v546_v12  ;;  %v256_v11 = vmax.f32 %v190_v55, %v240_v1 }
  0xeb   :  { %v396_v9 = vpack.c.bf16 %v258_v63, %v258_v63  ;;  %v404_v10 = vpack.c.bf16 %v266_v0, %v266_v0  ;;  %v264_v13 = vmax.f32 %v222_v56, %v248_v2  ;;  %v243_v14 = vmul.f32 0.2, %v201_v5 }
  0xec   :  { %334 = vst.msk [vmem:[%s631_s3 + $0x4] sm:$0xf] %vm332_vm2, %v391_v3  ;;  %342 = vst.msk [vmem:[%s631_s3 + $0x24] sm:$0xf] %vm332_vm2, %v399_v4  ;;  %v251_v15 = vmul.f32 0.2, %v233_v6  ;;  %v193_v16 = vadd.f32 %v546_v12, %v192_v7  ;;  %v225_v17 = vadd.f32 %v546_v12, %v224_v8  ;;  %v394_v18 = vpack.c.bf16 %v256_v11, %v256_v11 }
  0xed   :  { %339 = vst.msk [vmem:[%s631_s3 + $0x18] sm:$0xf] %vm332_vm2, %v396_v9  ;;  %347 = vst.msk [vmem:[%s631_s3 + $0x38] sm:$0xf] %vm332_vm2, %v404_v10  ;;  %v402_v19 = vpack.c.bf16 %v264_v13, %v264_v13  ;;  %v259_v20 = vmax.f32 %v201_v5, %v243_v14 }
  0xee   :  { %v267_v21 = vmax.f32 %v233_v6, %v251_v15  ;;  %v241_v22 = vmul.f32 0.2, %v193_v16  ;;  %v249_v23 = vmul.f32 0.2, %v225_v17  ;;  %337 = vst.msk [vmem:[%s631_s3 + $0x10] sm:$0xf] %vm332_vm2, %v394_v18 }
  0xef   :  { %345 = vst.msk [vmem:[%s631_s3 + $0x30] sm:$0xf] %vm332_vm2, %v402_v19  ;;  %v397_v12 = vpack.c.bf16 %v259_v20, %v259_v20 }
  0xf0   :  { %v405_v24 = vpack.c.bf16 %v267_v21, %v267_v21  ;;  %v257_v25 = vmax.f32 %v193_v16, %v241_v22  ;;  %v265_v26 = vmax.f32 %v225_v17, %v249_v23 }
  0xf1   :  { %340 = vst.msk [vmem:[%s631_s3 + $0x1c] sm:$0xf] %vm332_vm2, %v397_v12 }
  0xf2   :  { %348 = vst.msk [vmem:[%s631_s3 + $0x3c] sm:$0xf] %vm332_vm2, %v405_v24  ;;  %v395_v27 = vpack.c.bf16 %v257_v25, %v257_v25  ;;  %v403_v28 = vpack.c.bf16 %v265_v26, %v265_v26 }
  0xf4   :  { %338 = vst.msk [vmem:[%s631_s3 + $0x14] sm:$0xf] %vm332_vm2, %v395_v27  ;;  %346 = vst.msk [vmem:[%s631_s3 + $0x34] sm:$0xf] %vm332_vm2, %v403_v28 }
  0xf5   :  { %353 = vsyncpa [#allocation3], 1 }

// kernel: discriminator_forward.6
= control target key start
LH: loop header
LB: loop body
LE: loop exit
PB: predicated region body
PF: predicated region fallthrough
CT: control target
= control target key end

     0   :  { %8 = vsyncpa [#allocation3], 0  ;;  %s786_s12 = smov [#allocation2]   ;;  %s954_s0 = inlined_call_operand.vmem [shape: bf16[32,576], index: 0, kind: input, shape index: {}]   ;;  %s955_s1 = inlined_call_operand.vmem [shape: bf16[576,128], index: 1, kind: input, shape index: {}]   ;;  %s956_s2 = inlined_call_operand.hbm [shape: f32[1,128], index: 2, kind: input, shape index: {}]   ;;  %s957_s3 = inlined_call_operand.vmem [shape: bf16[32,128], index: 3, kind: output, shape index: {}]  }
   0x1   :  { %s19_s13 = sshll.u32 %s786_s12, 4  ;;  %s20_s13 = int_to_ptr.vmem [resolvable:$true] %s19_s13 }
   0x2   :  { %s772_s14 = scalar_lea.vmem %s20_s13, 16  ;;  %s776_s15 = scalar_lea.vmem %s20_s13, 32 }
   0x3   :  { %p773_p0 = scmp.ne.s32.totalorder %s20_s13, %s772_s14  ;;  %p777_p1 = scmp.lt.s32.totalorder %s20_s13, %s20_s13 }
   0x4   :  { %p778_p2 = scmp.lt.s32.totalorder %s776_s15, %s772_s14 }
   0x6   :  { %p779_p3 = por %p778_p2, %p777_p1 }
   0x8   :  { %p780_p4 = pnand %p779_p3, %p773_p0 }
   0xa   :  { %783 = shalt.err (!%p780_p4)
}
   0xb   :  { %22 = dma.hbm_to_vmem [thread:$0]  %s956_s2, 16, %s20_s13, [#allocation3]  }
   0xc   :  { %784 = dma.done.wait [#allocation3], 16  }
   0xd   :  { %785 = vsyncadd [#allocation3], 4294967280  ;;  %v714_v0 = vld [vmem:[%s955_s1 + $0x78] sm:$0xff]   ;;  %v718_v4 = vld [vmem:[%s955_s1 + $0x70] sm:$0xff]   ;;  %vm384_vm0 = vcmask 523264  }
   0xe   :  { %v715_v1 = vld [vmem:[%s955_s1 + $0xf8] sm:$0xff]   ;;  %639 = vmatprep.subr.bf16.mxu0 %v714_v0  ;;  %v719_v5 = vld [vmem:[%s955_s1 + $0xf0] sm:$0xff]   ;;  %v722_v8 = vld [vmem:[%s955_s1 + $0x68] sm:$0xff]  }
   0xf   :  { %v716_v2 = vld [vmem:[%s955_s1 + $0x38] sm:$0xff]   ;;  %667 = vmatprep.subr.bf16.mxu1 %v715_v1  ;;  %v720_v6 = vld [vmem:[%s955_s1 + $0x30] sm:$0xff]   ;;  %v723_v9 = vld [vmem:[%s955_s1 + $0xe8] sm:$0xff]  }
  0x10   :  { %v717_v3 = vld [vmem:[%s955_s1 + $0xb8] sm:$0xff]   ;;  %640 = vmatpush3.bf16.msra.mxu0 %v716_v2  ;;  %v721_v7 = vld [vmem:[%s955_s1 + $0xb0] sm:$0xff]   ;;  %v724_v10 = vld [vmem:[%s955_s1 + $0x28] sm:$0xff]  }
  0x11   :  { %668 = vmatpush3.bf16.msra.mxu1 %v717_v3  ;;  %641 = vmatprep.subr.bf16.mxu0 %v718_v4  ;;  %v725_v11 = vld [vmem:[%s955_s1 + $0xa8] sm:$0xff]   ;;  %v726_v12 = vld [vmem:[%s955_s1 + $0x60] sm:$0xff]   ;;  %v730_v16 = vld [vmem:[%s955_s1 + $0x58] sm:$0xff]  }
  0x12   :  { %669 = vmatprep.subr.bf16.mxu1 %v719_v5  ;;  %v727_v13 = vld [vmem:[%s955_s1 + $0xe0] sm:$0xff]   ;;  %v731_v17 = vld [vmem:[%s955_s1 + $0xd8] sm:$0xff]   ;;  %v734_v20 = vld [vmem:[%s955_s1 + $0x50] sm:$0xff]  }
  0x13   :  { %v728_v14 = vld [vmem:[%s955_s1 + $0x20] sm:$0xff]   ;;  %v732_v18 = vld [vmem:[%s955_s1 + $0x18] sm:$0xff]   ;;  %v735_v21 = vld [vmem:[%s955_s1 + $0xd0] sm:$0xff]  }
  0x14   :  { %642 = vmatpush3.bf16.msra.mxu0 %v720_v6  ;;  %v729_v15 = vld [vmem:[%s955_s1 + $0xa0] sm:$0xff]   ;;  %v733_v19 = vld [vmem:[%s955_s1 + $0x98] sm:$0xff]   ;;  %v736_v22 = vld [vmem:[%s955_s1 + $0x10] sm:$0xff]  }
  0x15   :  { %670 = vmatpush3.bf16.msra.mxu1 %v721_v7  ;;  %643 = vmatprep.subr.bf16.mxu0 %v722_v8  ;;  %v737_v23 = vld [vmem:[%s955_s1 + $0x90] sm:$0xff]   ;;  %v738_v24 = vld [vmem:[%s955_s1 + $0x48] sm:$0xff]   ;;  %v742_v28 = vld [vmem:[%s955_s1 + $0x40] sm:$0xff]  }
  0x16   :  { %671 = vmatprep.subr.bf16.mxu1 %v723_v9  ;;  %v739_v25 = vld [vmem:[%s955_s1 + $0xc8] sm:$0xff]   ;;  %v743_v29 = vld [vmem:[%s955_s1 + $0xc0] sm:$0xff]   ;;  %v752_v36 = vld [vmem:[%s955_s1 + $0x118] sm:$0xff]  }
  0x17   :  { %v740_v26 = vld [vmem:[%s955_s1 + $0x8] sm:$0xff]   ;;  %v744_v30 = vld [vmem:[%s955_s1] sm:$0xff]   ;;  %v753_v37 = vld [vmem:[%s955_s1 + $0x110] sm:$0xff]  }
  0x18   :  { %644 = vmatpush3.bf16.msra.mxu0 %v724_v10  ;;  %v741_v27 = vld [vmem:[%s955_s1 + $0x88] sm:$0xff]   ;;  %v745_v31 = vld [vmem:[%s955_s1 + $0x80] sm:$0xff]  }
  0x19   :  { %672 = vmatpush3.bf16.msra.mxu1 %v725_v11  ;;  %645 = vmatprep.subr.bf16.mxu0 %v726_v12  ;;  %v746_v32 = vld [vmem:[%s954_s0] ss:$20 sps:$4 sm:$0xff]   ;;  %v748_v33 = vld [vmem:[%s954_s0 + $0x4] ss:$20 sps:$4 sm:$0xff]   ;;  %v749_v34 = vld [vmem:[%s954_s0 + $0x8] ss:$20 sps:$4 sm:$0xff]  }
  0x1a   :  { %673 = vmatprep.subr.bf16.mxu1 %v727_v13  ;;  %v751_v35 = vld [vmem:[%s954_s0 + $0xc] ss:$20 sps:$4 sm:$0xff]   ;;  %423 = vmatprep.mubr.bf16.mxu0 %v748_v33  ;;  %v756_v39 = vld [vmem:[%s954_s0 + $0x34] ss:$20 sps:$4 sm:$0xff]   ;;  %v759_v42 = vld [vmem:[%s954_s0 + $0x30] ss:$20 sps:$4 sm:$0xff]  }
  0x1b   :  { %472 = vmatprep.mubr.bf16.mxu1 %v751_v35  ;;  %v754_v38 = vld [vmem:[%s954_s0 + $0x2c] ss:$20 sps:$4 sm:$0xff]   ;;  %v758_v40 = vld [vmem:[%s954_s0 + $0x28] ss:$20 sps:$4 sm:$0xff]   ;;  %v762_v43 = vld [vmem:[%s954_s0 + $0x10] ss:$20 sps:$4 sm:$0xff]  }
  0x1c   :  { %646 = vmatpush3.bf16.msra.mxu0 %v728_v14  ;;  %v760_v41 = vld [vmem:[%s955_s1 + $0x108] sm:$0xff]   ;;  %v761_v44 = vld [vmem:[%s955_s1 + $0x100] sm:$0xff]  }
  0x1d   :  { %674 = vmatpush3.bf16.msra.mxu1 %v729_v15  ;;  %647 = vmatprep.subr.bf16.mxu0 %v730_v16  ;;  %v763_v45 = vld [vmem:[%s954_s0 + $0x38] ss:$20 sps:$4 sm:$0xff]   ;;  %v571_v58 = vld [vmem:[#allocation2] ss:$0 sm:$0xff] }
  0x1e   :  { %675 = vmatprep.subr.bf16.mxu1 %v731_v17 }
  0x20   :  { %648 = vmatpush3.bf16.msra.mxu0 %v732_v18 }
  0x21   :  { %676 = vmatpush3.bf16.msra.mxu1 %v733_v19  ;;  %649 = vmatprep.subr.bf16.mxu0 %v734_v20 }
  0x22   :  { %677 = vmatprep.subr.bf16.mxu1 %v735_v21 }
  0x24   :  { %650 = vmatpush3.bf16.msra.mxu0 %v736_v22 }
  0x25   :  { %678 = vmatpush3.bf16.msra.mxu1 %v737_v23  ;;  %651 = vmatprep.subr.bf16.mxu0 %v738_v24 }
  0x26   :  { %679 = vmatprep.subr.bf16.mxu1 %v739_v25 }
  0x28   :  { %652 = vmatpush3.bf16.msra.mxu0 %v740_v26 }
  0x29   :  { %680 = vmatpush3.bf16.msra.mxu1 %v741_v27  ;;  %653 = vmatprep.subr.bf16.mxu0 %v742_v28 }
  0x2a   :  { %681 = vmatprep.subr.bf16.mxu1 %v743_v29 }
  0x2c   :  { %654 = vmatpush3.bf16.msra.mxu0 %v744_v30 }
  0x2d   :  { %682 = vmatpush3.bf16.msra.mxu1 %v745_v31  ;;  %701 = vmatprep.subr.bf16.mxu0 %v752_v36 }
  0x2f   :  { %424 = vmatmul.mubr.bf16.vlgmr.msra.gmra.mxu0 %v746_v32 }
  0x30   :  { %473 = vmatmul.mubr.bf16.vlgmr.msra.gmra.mxu1 %v749_v34  ;;  %702 = vmatpush3.bf16.msra.mxu0 %v752_v36 }
  0x31   :  { %703 = vmatprep.subr.bf16.mxu0 %v753_v37  ;;  %431 = vmatprep.mubr.bf16.mxu0 %v754_v38 }
  0x32   :  { %480 = vmatprep.mubr.bf16.mxu1 %v756_v39 }
  0x34   :  { %704 = vmatpush3.bf16.msra.mxu0 %v753_v37 }
  0x35   :  { %705 = vmatprep.subr.bf16.mxu0 %v760_v41 }
  0x37   :  { %432 = vmatmul.mubr.bf16.gmra.mxu0 %v758_v40 }
  0x38   :  { %481 = vmatmul.mubr.bf16.gmra.mxu1 %v759_v42  ;;  %709 = vmatprep.mubr.msk.bf16.mxu0 %vm384_vm0, %v762_v43 }
  0x39   :  { %706 = vmatpush3.bf16.msra.mxu0 %v760_v41 }
  0x3a   :  { %707 = vmatprep.subr.bf16.mxu0 %v761_v44 }
  0x3d   :  { %708 = vmatpush3.bf16.msra.mxu0 %v761_v44 }
  0x40   :  { %710 = vmatmul.mubr.msk.bf16.vlgmr.msra.gmra.mxu0 %vm384_vm0, %v763_v45 }
  0xef   :  { %v655_v46 = vpop.f32.mrf.mxu0 }
  0xf0   :  { %v683_v47 = vpop.f32.mrf.mxu1 }
  0xf1   :  { %v656_v48 = vpop.f32.mrf.mxu0 }
  0xf2   :  { %v684_v49 = vpop.f32.mrf.mxu1  ;;  %v657_v56 = vadd.f32 %v656_v48, %v655_v46 }
  0xf3   :  { %v658_v50 = vpop.f32.mrf.mxu0  ;;  %v685_v2 = vadd.f32 %v684_v49, %v683_v47 }
  0xf4   :  { %v686_v51 = vpop.f32.mrf.mxu1  ;;  %v426_v1 = vadd.f32 %v657_v56, %v571_v58 }
  0xf5   :  { %v659_v52 = vpop.f32.mrf.mxu0 }
  0xf6   :  { %v687_v53 = vpop.f32.mrf.mxu1  ;;  %v660_v3 = vadd.f32 %v659_v52, %v658_v50  ;;  %v475_v13 = vadd.f32 %v685_v2, %v426_v1 }
  0xf7   :  { %v661_v54 = vpop.f32.mrf.mxu0  ;;  %v688_v16 = vadd.f32 %v687_v53, %v686_v51 }
  0xf8   :  { %v689_v55 = vpop.f32.mrf.mxu1  ;;  %v429_v11 = vadd.f32 %v660_v3, %v571_v58 }
  0xf9   :  { %v662_v57 = vpop.f32.mrf.mxu0 }
  0xfa   :  { %v663_v59 = vadd.f32 %v662_v57, %v661_v54  ;;  %v690_v60 = vpop.f32.mrf.mxu1  ;;  %v478_v21 = vadd.f32 %v688_v16, %v429_v11 }
  0xfb   :  { %v691_v61 = vadd.f32 %v690_v60, %v689_v55  ;;  %v664_v62 = vpop.f32.mrf.mxu0 }
  0xfc   :  { %v434_v63 = vadd.f32 %v663_v59, %v571_v58  ;;  %v692_v0 = vpop.f32.mrf.mxu1 }
  0xfd   :  { %v665_v4 = vpop.f32.mrf.mxu0 }
  0xfe   :  { %v666_v5 = vadd.f32 %v665_v4, %v664_v62  ;;  %v693_v6 = vpop.f32.mrf.mxu1  ;;  %v483_v7 = vadd.f32 %v691_v61, %v434_v63 }
  0xff   :  { %v694_v9 = vadd.f32 %v693_v6, %v692_v0 }
 0x100   :  { %v437_v8 = vadd.f32 %v666_v5, %v571_v58  ;;  %v711_v10 = vpop.f32.mrf.mxu0 }
 0x101   :  { %v532_v12 = vadd.f32 %v711_v10, %v483_v7 }
 0x102   :  { %v523_v14 = vpop.f32.mrf.mxu0  ;;  %v486_v15 = vadd.f32 %v694_v9, %v437_v8 }
 0x103   :  { %v524_v17 = vadd.f32 %v523_v14, %v475_v13  ;;  %v540_v19 = vmul.f32 0.2, %v532_v12 }
 0x104   :  { %v712_v18 = vpop.f32.mrf.mxu0 }
 0x105   :  { %v535_v20 = vadd.f32 %v712_v18, %v486_v15  ;;  %v538_v23 = vmul.f32 0.2, %v524_v17  ;;  %v544_v26 = vmax.f32 %v532_v12, %v540_v19 }
 0x106   :  { %v526_v22 = vpop.f32.mrf.mxu0 }
 0x107   :  { %v541_v24 = vmul.f32 0.2, %v535_v20  ;;  %v527_v25 = vadd.f32 %v526_v22, %v478_v21  ;;  %v542_v29 = vmax.f32 %v524_v17, %v538_v23 }
 0x109   :  { %v545_v27 = vmax.f32 %v535_v20, %v541_v24  ;;  %v539_v28 = vmul.f32 0.2, %v527_v25 }
 0x10b   :  { %v636_v30 = vpack.c.bf16 %v545_v27, %v544_v26  ;;  %v543_v31 = vmax.f32 %v527_v25, %v539_v28 }
 0x10d   :  { %638 = vst [vmem:[%s957_s3 + $0x8] sm:$0xff] %v636_v30   ;;  %v631_v32 = vpack.c.bf16 %v543_v31, %v542_v29 }
 0x10f   :  { %632 = vst [vmem:[%s957_s3] sm:$0xff] %v631_v32  }
 0x110   :  { %570 = vsyncpa [#allocation3], 1 }

// kernel: discriminator_forward.7
= control target key start
LH: loop header
LB: loop body
LE: loop exit
PB: predicated region body
PF: predicated region fallthrough
CT: control target
= control target key end

     0   :  { %s2017_s1 = inlined_call_operand.vmem [shape: bf16[1152,256], index: 1, kind: input, shape index: {}]   ;;  %s2018_s0 = inlined_call_operand.vmem [shape: bf16[8,1152], index: 0, kind: input, shape index: {}]   ;;  %s2019_s2 = inlined_call_operand.vmem [shape: f32[1,256], index: 2, kind: input, shape index: {}]   ;;  %s2020_s3 = inlined_call_operand.vmem [shape: bf16[8,256], index: 3, kind: output, shape index: {}]  }
   0x1   :  { %v1306_v0 = vld [vmem:[%s2017_s1 + $0x74] ss:$8 sps:$4 sm:$0xff]   ;;  %v1308_v1 = vld [vmem:[%s2017_s1 + $0x70] ss:$8 sps:$4 sm:$0xff]   ;;  %v1312_v4 = vld [vmem:[%s2017_s1 + $0x64] ss:$8 sps:$4 sm:$0xff]  }
   0x2   :  { %928 = vmatprep.subr.bf16.mxu0 %v1306_v0  ;;  %v1309_v2 = vld [vmem:[%s2017_s1 + $0x174] ss:$8 sps:$4 sm:$0xff]   ;;  %v1311_v3 = vld [vmem:[%s2017_s1 + $0x170] ss:$8 sps:$4 sm:$0xff]   ;;  %v1314_v5 = vld [vmem:[%s2017_s1 + $0x60] ss:$8 sps:$4 sm:$0xff]  }
   0x3   :  { %929 = vmatpush1.bf16.msra.mxu0 %v1308_v1  ;;  %969 = vmatprep.subr.bf16.mxu1 %v1309_v2  ;;  %v1315_v6 = vld [vmem:[%s2017_s1 + $0x164] ss:$8 sps:$4 sm:$0xff]   ;;  %v1317_v7 = vld [vmem:[%s2017_s1 + $0x160] ss:$8 sps:$4 sm:$0xff]   ;;  %v1318_v8 = vld [vmem:[%s2017_s1 + $0x54] ss:$8 sps:$4 sm:$0xff]  }
   0x4   :  { %970 = vmatpush1.bf16.msra.mxu1 %v1311_v3  ;;  %930 = vmatprep.subr.bf16.mxu0 %v1312_v4  ;;  %v1320_v9 = vld [vmem:[%s2017_s1 + $0x50] ss:$8 sps:$4 sm:$0xff]   ;;  %v1321_v10 = vld [vmem:[%s2017_s1 + $0x154] ss:$8 sps:$4 sm:$0xff]   ;;  %v1324_v11 = vld [vmem:[%s2017_s1 + $0x44] ss:$8 sps:$4 sm:$0xff]  }
   0x5   :  { %971 = vmatprep.subr.bf16.mxu1 %v1315_v6  ;;  %v1323_v12 = vld [vmem:[%s2017_s1 + $0x150] ss:$8 sps:$4 sm:$0xff]   ;;  %v1327_v13 = vld [vmem:[%s2017_s1 + $0x144] ss:$8 sps:$4 sm:$0xff]   ;;  %v1326_v14 = vld [vmem:[%s2017_s1 + $0x40] ss:$8 sps:$4 sm:$0xff]  }
   0x6   :  { %v1330_v15 = vld [vmem:[%s2017_s1 + $0x34] ss:$8 sps:$4 sm:$0xff]   ;;  %v1329_v16 = vld [vmem:[%s2017_s1 + $0x140] ss:$8 sps:$4 sm:$0xff]   ;;  %v1332_v18 = vld [vmem:[%s2017_s1 + $0x30] ss:$8 sps:$4 sm:$0xff]  }
   0x7   :  { %931 = vmatpush1.bf16.msra.mxu0 %v1314_v5  ;;  %v1333_v17 = vld [vmem:[%s2017_s1 + $0x134] ss:$8 sps:$4 sm:$0xff]   ;;  %v1336_v19 = vld [vmem:[%s2017_s1 + $0x24] ss:$8 sps:$4 sm:$0xff]   ;;  %v1335_v20 = vld [vmem:[%s2017_s1 + $0x130] ss:$8 sps:$4 sm:$0xff]  }
   0x8   :  { %932 = vmatprep.subr.bf16.mxu0 %v1318_v8  ;;  %972 = vmatpush1.bf16.msra.mxu1 %v1317_v7  ;;  %v1339_v21 = vld [vmem:[%s2017_s1 + $0x124] ss:$8 sps:$4 sm:$0xff]   ;;  %v1338_v22 = vld [vmem:[%s2017_s1 + $0x20] ss:$8 sps:$4 sm:$0xff]   ;;  %v1342_v23 = vld [vmem:[%s2017_s1 + $0x14] ss:$8 sps:$4 sm:$0xff]  }
   0x9   :  { %973 = vmatprep.subr.bf16.mxu1 %v1321_v10  ;;  %v1341_v24 = vld [vmem:[%s2017_s1 + $0x120] ss:$8 sps:$4 sm:$0xff]   ;;  %v1345_v25 = vld [vmem:[%s2017_s1 + $0x114] ss:$8 sps:$4 sm:$0xff]   ;;  %v1344_v26 = vld [vmem:[%s2017_s1 + $0x10] ss:$8 sps:$4 sm:$0xff]  }
   0xa   :  { %v1348_v27 = vld [vmem:[%s2017_s1 + $0x4] ss:$8 sps:$4 sm:$0xff]   ;;  %v1347_v28 = vld [vmem:[%s2017_s1 + $0x110] ss:$8 sps:$4 sm:$0xff]   ;;  %v1350_v30 = vld [vmem:[%s2017_s1] ss:$8 sps:$4 sm:$0xff]  }
   0xb   :  { %933 = vmatpush1.bf16.msra.mxu0 %v1320_v9  ;;  %v1351_v29 = vld [vmem:[%s2017_s1 + $0x104] ss:$8 sps:$4 sm:$0xff]   ;;  %v1354_v31 = vld [vmem:[%s2017_s1 + $0xf4] ss:$8 sps:$4 sm:$0xff]   ;;  %v1353_v32 = vld [vmem:[%s2017_s1 + $0x100] ss:$8 sps:$4 sm:$0xff]  }
   0xc   :  { %934 = vmatprep.subr.bf16.mxu0 %v1324_v11  ;;  %974 = vmatpush1.bf16.msra.mxu1 %v1323_v12  ;;  %v1357_v33 = vld [vmem:[%s2017_s1 + $0x1f4] ss:$8 sps:$4 sm:$0xff]   ;;  %v1356_v34 = vld [vmem:[%s2017_s1 + $0xf0] ss:$8 sps:$4 sm:$0xff]   ;;  %v1360_v35 = vld [vmem:[%s2017_s1 + $0xe4] ss:$8 sps:$4 sm:$0xff]  }
   0xd   :  { %975 = vmatprep.subr.bf16.mxu1 %v1327_v13  ;;  %v1359_v36 = vld [vmem:[%s2017_s1 + $0x1f0] ss:$8 sps:$4 sm:$0xff]   ;;  %v1363_v37 = vld [vmem:[%s2017_s1 + $0x1e4] ss:$8 sps:$4 sm:$0xff]   ;;  %v1362_v38 = vld [vmem:[%s2017_s1 + $0xe0] ss:$8 sps:$4 sm:$0xff]  }
   0xe   :  { %v1366_v39 = vld [vmem:[%s2017_s1 + $0xd4] ss:$8 sps:$4 sm:$0xff]   ;;  %v1365_v40 = vld [vmem:[%s2017_s1 + $0x1e0] ss:$8 sps:$4 sm:$0xff]   ;;  %v1368_v42 = vld [vmem:[%s2017_s1 + $0xd0] ss:$8 sps:$4 sm:$0xff]  }
   0xf   :  { %935 = vmatpush1.bf16.msra.mxu0 %v1326_v14  ;;  %v1369_v41 = vld [vmem:[%s2017_s1 + $0x1d4] ss:$8 sps:$4 sm:$0xff]   ;;  %v1372_v43 = vld [vmem:[%s2017_s1 + $0xc4] ss:$8 sps:$4 sm:$0xff]   ;;  %v1371_v44 = vld [vmem:[%s2017_s1 + $0x1d0] ss:$8 sps:$4 sm:$0xff]  }
  0x10   :  { %936 = vmatprep.subr.bf16.mxu0 %v1330_v15  ;;  %976 = vmatpush1.bf16.msra.mxu1 %v1329_v16  ;;  %v1375_v45 = vld [vmem:[%s2017_s1 + $0x1c4] ss:$8 sps:$4 sm:$0xff]   ;;  %v1374_v47 = vld [vmem:[%s2017_s1 + $0xc0] ss:$8 sps:$4 sm:$0xff]   ;;  %v1378_v49 = vld [vmem:[%s2017_s1 + $0xb4] ss:$8 sps:$4 sm:$0xff]  }
  0x11   :  { %977 = vmatprep.subr.bf16.mxu1 %v1333_v17  ;;  %v15_v46 = vld [vmem:[%s2018_s0] sm:$0xff]  ;;  %v16_v50 = vld [vmem:[%s2018_s0 + $0x8] sm:$0xff]  ;;  %v1381_v53 = vld [vmem:[%s2017_s1 + $0x1b4] ss:$8 sps:$4 sm:$0xff]  }
  0x12   :  { %v1151_v48 = vcombine.high %v15_v46, %v15_v46  ;;  %v1377_v51 = vld [vmem:[%s2017_s1 + $0x1c0] ss:$8 sps:$4 sm:$0xff]   ;;  %v1153_v52 = vcombine.high %v16_v50, %v16_v50  ;;  %v1380_v54 = vld [vmem:[%s2017_s1 + $0xb0] ss:$8 sps:$4 sm:$0xff]   ;;  %v1384_v55 = vld [vmem:[%s2017_s1 + $0xa4] ss:$8 sps:$4 sm:$0xff]   ;;  %v1150_v5 = vcombine.low %v15_v46, %v15_v46  ;;  %v1152_v8 = vcombine.low %v16_v50, %v16_v50 }
  0x13   :  { %937 = vmatpush1.bf16.msra.mxu0 %v1332_v18  ;;  %v1383_v56 = vld [vmem:[%s2017_s1 + $0x1b0] ss:$8 sps:$4 sm:$0xff]   ;;  %v1387_v57 = vld [vmem:[%s2017_s1 + $0x1a4] ss:$8 sps:$4 sm:$0xff]   ;;  %v1386_v58 = vld [vmem:[%s2017_s1 + $0xa0] ss:$8 sps:$4 sm:$0xff]  }
  0x14   :  { %938 = vmatprep.subr.bf16.mxu0 %v1336_v19  ;;  %978 = vmatpush1.bf16.msra.mxu1 %v1335_v20  ;;  %v1390_v59 = vld [vmem:[%s2017_s1 + $0x94] ss:$8 sps:$4 sm:$0xff]   ;;  %v1389_v60 = vld [vmem:[%s2017_s1 + $0x1a0] ss:$8 sps:$4 sm:$0xff]   ;;  %v1392_v62 = vld [vmem:[%s2017_s1 + $0x90] ss:$8 sps:$4 sm:$0xff]  }
  0x15   :  { %979 = vmatprep.subr.bf16.mxu1 %v1339_v21  ;;  %960 = vmatprep.mubr.bf16.mxu0 %v1151_v48  ;;  %v1393_v61 = vld [vmem:[%s2017_s1 + $0x194] ss:$8 sps:$4 sm:$0xff]   ;;  %v1396_v63 = vld [vmem:[%s2017_s1 + $0x84] ss:$8 sps:$4 sm:$0xff]   ;;  %v1395_v0 = vld [vmem:[%s2017_s1 + $0x190] ss:$8 sps:$4 sm:$0xff]  }
  0x16   :  { %1001 = vmatprep.mubr.bf16.mxu1 %v1153_v52  ;;  %v1399_v1 = vld [vmem:[%s2017_s1 + $0x184] ss:$8 sps:$4 sm:$0xff]   ;;  %v1398_v2 = vld [vmem:[%s2017_s1 + $0x80] ss:$8 sps:$4 sm:$0xff]   ;;  %v1406_v3 = vld [vmem:[%s2017_s1 + $0x274] ss:$8 sps:$4 sm:$0xff]  }
  0x17   :  { %939 = vmatpush1.bf16.msra.mxu0 %v1338_v22  ;;  %v1403_v4 = vld [vmem:[%s2017_s1 + $0x180] ss:$8 sps:$4 sm:$0xff]   ;;  %v1411_v6 = vld [vmem:[%s2017_s1 + $0x374] ss:$8 sps:$4 sm:$0xff]   ;;  %v1404_v7 = vld [vmem:[%s2017_s1 + $0x270] ss:$8 sps:$4 sm:$0xff]  }
  0x18   :  { %940 = vmatprep.subr.bf16.mxu0 %v1342_v23  ;;  %980 = vmatpush1.bf16.msra.mxu1 %v1341_v24  ;;  %v1414_v9 = vld [vmem:[%s2017_s1 + $0x264] ss:$8 sps:$4 sm:$0xff]   ;;  %v1409_v10 = vld [vmem:[%s2017_s1 + $0x370] ss:$8 sps:$4 sm:$0xff]   ;;  %v1412_v12 = vld [vmem:[%s2017_s1 + $0x260] ss:$8 sps:$4 sm:$0xff]  }
  0x19   :  { %981 = vmatprep.subr.bf16.mxu1 %v1345_v25  ;;  %v1417_v11 = vld [vmem:[%s2017_s1 + $0x364] ss:$8 sps:$4 sm:$0xff]   ;;  %v1420_v13 = vld [vmem:[%s2017_s1 + $0x254] ss:$8 sps:$4 sm:$0xff]   ;;  %v1415_v14 = vld [vmem:[%s2017_s1 + $0x360] ss:$8 sps:$4 sm:$0xff]  }
  0x1a   :  { %v1423_v15 = vld [vmem:[%s2017_s1 + $0x354] ss:$8 sps:$4 sm:$0xff]   ;;  %v1418_v16 = vld [vmem:[%s2017_s1 + $0x250] ss:$8 sps:$4 sm:$0xff]   ;;  %v1426_v17 = vld [vmem:[%s2017_s1 + $0x244] ss:$8 sps:$4 sm:$0xff]  }
  0x1b   :  { %941 = vmatpush1.bf16.msra.mxu0 %v1344_v26  ;;  %v1421_v18 = vld [vmem:[%s2017_s1 + $0x350] ss:$8 sps:$4 sm:$0xff]   ;;  %v1429_v19 = vld [vmem:[%s2017_s1 + $0x344] ss:$8 sps:$4 sm:$0xff]   ;;  %v1424_v20 = vld [vmem:[%s2017_s1 + $0x240] ss:$8 sps:$4 sm:$0xff]  }
  0x1c   :  { %942 = vmatprep.subr.bf16.mxu0 %v1348_v27  ;;  %982 = vmatpush1.bf16.msra.mxu1 %v1347_v28  ;;  %v1432_v21 = vld [vmem:[%s2017_s1 + $0x234] ss:$8 sps:$4 sm:$0xff]   ;;  %v1427_v22 = vld [vmem:[%s2017_s1 + $0x340] ss:$8 sps:$4 sm:$0xff]   ;;  %v1430_v24 = vld [vmem:[%s2017_s1 + $0x230] ss:$8 sps:$4 sm:$0xff]  }
  0x1d   :  { %983 = vmatprep.subr.bf16.mxu1 %v1351_v29  ;;  %v1435_v23 = vld [vmem:[%s2017_s1 + $0x334] ss:$8 sps:$4 sm:$0xff]   ;;  %v1438_v25 = vld [vmem:[%s2017_s1 + $0x224] ss:$8 sps:$4 sm:$0xff]   ;;  %v1433_v26 = vld [vmem:[%s2017_s1 + $0x330] ss:$8 sps:$4 sm:$0xff]  }
  0x1e   :  { %v1441_v27 = vld [vmem:[%s2017_s1 + $0x324] ss:$8 sps:$4 sm:$0xff]   ;;  %v1436_v28 = vld [vmem:[%s2017_s1 + $0x220] ss:$8 sps:$4 sm:$0xff]   ;;  %v1444_v29 = vld [vmem:[%s2017_s1 + $0x214] ss:$8 sps:$4 sm:$0xff]  }
  0x1f   :  { %943 = vmatpush1.bf16.msra.mxu0 %v1350_v30  ;;  %v1439_v30 = vld [vmem:[%s2017_s1 + $0x320] ss:$8 sps:$4 sm:$0xff]   ;;  %v1457_v46 = vld [vmem:[%s2017_s1 + $0x3f0] ss:$8 sps:$4 sm:$0xff]  }
  0x20   :  { %944 = vmatprep.subr.bf16.mxu0 %v1354_v31  ;;  %984 = vmatpush1.bf16.msra.mxu1 %v1353_v32  ;;  %v1447_v31 = vld [vmem:[%s2017_s1 + $0x314] ss:$8 sps:$4 sm:$0xff]   ;;  %v1460_v48 = vld [vmem:[%s2017_s1 + $0x2e0] ss:$8 sps:$4 sm:$0xff]   ;;  %v1466_v52 = vld [vmem:[%s2017_s1 + $0x2d0] ss:$8 sps:$4 sm:$0xff]  }
  0x21   :  { %985 = vmatprep.subr.bf16.mxu1 %v1357_v33  ;;  %v1831_v32 = vld [vmem:[%s2018_s0 + $0x10] sm:$0xff]  ;;  %v1463_v50 = vld [vmem:[%s2017_s1 + $0x3e0] ss:$8 sps:$4 sm:$0xff]  }
  0x22   :  { %v1442_v33 = vld [vmem:[%s2017_s1 + $0x210] ss:$8 sps:$4 sm:$0xff]  }
  0x23   :  { %945 = vmatpush2.bf16.msra.mxu0 %v1356_v34  ;;  %v1155_v34 = vcombine.high %v1831_v32, %v1831_v32 }
  0x24   :  { %946 = vmatprep.subr.bf16.mxu0 %v1360_v35  ;;  %986 = vmatpush2.bf16.msra.mxu1 %v1359_v36  ;;  %v1841_v35 = vld [vmem:[%s2018_s0 + $0x18] sm:$0xff]  ;;  %v1450_v36 = vld [vmem:[%s2017_s1 + $0x204] ss:$8 sps:$4 sm:$0xff]  }
  0x25   :  { %987 = vmatprep.subr.bf16.mxu1 %v1363_v37  ;;  %v1157_v37 = vcombine.high %v1841_v35, %v1841_v35 }
  0x27   :  { %947 = vmatpush2.bf16.msra.mxu0 %v1362_v38  ;;  %v1445_v38 = vld [vmem:[%s2017_s1 + $0x310] ss:$8 sps:$4 sm:$0xff]  }
  0x28   :  { %948 = vmatprep.subr.bf16.mxu0 %v1366_v39  ;;  %988 = vmatpush2.bf16.msra.mxu1 %v1365_v40  ;;  %v1453_v39 = vld [vmem:[%s2017_s1 + $0x304] ss:$8 sps:$4 sm:$0xff]   ;;  %v1448_v40 = vld [vmem:[%s2017_s1 + $0x200] ss:$8 sps:$4 sm:$0xff]  }
  0x29   :  { %989 = vmatprep.subr.bf16.mxu1 %v1369_v41  ;;  %v1456_v41 = vld [vmem:[%s2017_s1 + $0x2f4] ss:$8 sps:$4 sm:$0xff]  }
  0x2b   :  { %949 = vmatpush2.bf16.msra.mxu0 %v1368_v42  ;;  %v1451_v42 = vld [vmem:[%s2017_s1 + $0x300] ss:$8 sps:$4 sm:$0xff]  }
  0x2c   :  { %950 = vmatprep.subr.bf16.mxu0 %v1372_v43  ;;  %990 = vmatpush2.bf16.msra.mxu1 %v1371_v44  ;;  %v1459_v43 = vld [vmem:[%s2017_s1 + $0x3f4] ss:$8 sps:$4 sm:$0xff]   ;;  %v1454_v44 = vld [vmem:[%s2017_s1 + $0x2f0] ss:$8 sps:$4 sm:$0xff]  }
  0x2d   :  { %991 = vmatprep.subr.bf16.mxu1 %v1375_v45  ;;  %v1462_v45 = vld [vmem:[%s2017_s1 + $0x2e4] ss:$8 sps:$4 sm:$0xff]  }
  0x2f   :  { %951 = vmatpush2.bf16.msra.mxu0 %v1374_v47  ;;  %v1465_v47 = vld [vmem:[%s2017_s1 + $0x3e4] ss:$8 sps:$4 sm:$0xff]  }
  0x30   :  { %952 = vmatprep.subr.bf16.mxu0 %v1378_v49  ;;  %992 = vmatpush2.bf16.msra.mxu1 %v1377_v51  ;;  %v1468_v49 = vld [vmem:[%s2017_s1 + $0x2d4] ss:$8 sps:$4 sm:$0xff]  }
  0x31   :  { %993 = vmatprep.subr.bf16.mxu1 %v1381_v53  ;;  %v1471_v51 = vld [vmem:[%s2017_s1 + $0x3d4] ss:$8 sps:$4 sm:$0xff]   ;;  %v1474_v53 = vld [vmem:[%s2017_s1 + $0x2c4] ss:$8 sps:$4 sm:$0xff]  }
  0x33   :  { %953 = vmatpush2.bf16.msra.mxu0 %v1380_v54  ;;  %v1469_v54 = vld [vmem:[%s2017_s1 + $0x3d0] ss:$8 sps:$4 sm:$0xff]  }
  0x34   :  { %954 = vmatprep.subr.bf16.mxu0 %v1384_v55  ;;  %994 = vmatpush2.bf16.msra.mxu1 %v1383_v56  ;;  %v1477_v55 = vld [vmem:[%s2017_s1 + $0x3c4] ss:$8 sps:$4 sm:$0xff]   ;;  %v1472_v56 = vld [vmem:[%s2017_s1 + $0x2c0] ss:$8 sps:$4 sm:$0xff]  }
  0x35   :  { %995 = vmatprep.subr.bf16.mxu1 %v1387_v57  ;;  %v1480_v57 = vld [vmem:[%s2017_s1 + $0x2b4] ss:$8 sps:$4 sm:$0xff]  }
  0x37   :  { %955 = vmatpush2.bf16.msra.mxu0 %v1386_v58  ;;  %v1475_v58 = vld [vmem:[%s2017_s1 + $0x3c0] ss:$8 sps:$4 sm:$0xff]  }
  0x38   :  { %956 = vmatprep.subr.bf16.mxu0 %v1390_v59  ;;  %996 = vmatpush2.bf16.msra.mxu1 %v1389_v60  ;;  %v1483_v59 = vld [vmem:[%s2017_s1 + $0x3b4] ss:$8 sps:$4 sm:$0xff]   ;;  %v1478_v60 = vld [vmem:[%s2017_s1 + $0x2b0] ss:$8 sps:$4 sm:$0xff]  }
  0x39   :  { %997 = vmatprep.subr.bf16.mxu1 %v1393_v61  ;;  %v1486_v61 = vld [vmem:[%s2017_s1 + $0x2a4] ss:$8 sps:$4 sm:$0xff]  }
  0x3b   :  { %957 = vmatpush2.bf16.msra.mxu0 %v1392_v62  ;;  %v1481_v62 = vld [vmem:[%s2017_s1 + $0x3b0] ss:$8 sps:$4 sm:$0xff]  }
  0x3c   :  { %958 = vmatprep.subr.bf16.mxu0 %v1396_v63  ;;  %998 = vmatpush2.bf16.msra.mxu1 %v1395_v0  ;;  %v1489_v63 = vld [vmem:[%s2017_s1 + $0x3a4] ss:$8 sps:$4 sm:$0xff]   ;;  %v1484_v0 = vld [vmem:[%s2017_s1 + $0x2a0] ss:$8 sps:$4 sm:$0xff]  }
  0x3d   :  { %999 = vmatprep.subr.bf16.mxu1 %v1399_v1  ;;  %v1492_v1 = vld [vmem:[%s2017_s1 + $0x294] ss:$8 sps:$4 sm:$0xff]  }
  0x3f   :  { %959 = vmatpush2.bf16.msra.mxu0 %v1398_v2  ;;  %v1487_v2 = vld [vmem:[%s2017_s1 + $0x3a0] ss:$8 sps:$4 sm:$0xff]  }
  0x40   :  { %1010 = vmatprep.subr.bf16.mxu0 %v1406_v3  ;;  %1000 = vmatpush2.bf16.msra.mxu1 %v1403_v4  ;;  %v1495_v3 = vld [vmem:[%s2017_s1 + $0x394] ss:$8 sps:$4 sm:$0xff]   ;;  %v1490_v4 = vld [vmem:[%s2017_s1 + $0x290] ss:$8 sps:$4 sm:$0xff]  }
  0x41   :  { %1051 = vmatprep.subr.bf16.mxu1 %v1411_v6  ;;  %v1493_v6 = vld [vmem:[%s2017_s1 + $0x390] ss:$8 sps:$4 sm:$0xff]  }
  0x42   :  { %961 = vmatmul.mubr.bf16.vlgmr.msra.gmra.mxu0 %v1150_v5  ;;  %v1498_v5 = vld [vmem:[%s2017_s1 + $0x284] ss:$8 sps:$4 sm:$0xff]  }
  0x43   :  { %1011 = vmatpush1.bf16.msra.mxu0 %v1404_v7  ;;  %1002 = vmatmul.mubr.bf16.vlgmr.msra.gmra.mxu1 %v1152_v8  ;;  %v1501_v7 = vld [vmem:[%s2017_s1 + $0x384] ss:$8 sps:$4 sm:$0xff]   ;;  %v1496_v8 = vld [vmem:[%s2017_s1 + $0x280] ss:$8 sps:$4 sm:$0xff]  }
  0x44   :  { %1012 = vmatprep.subr.bf16.mxu0 %v1414_v9  ;;  %1052 = vmatpush1.bf16.msra.mxu1 %v1409_v10  ;;  %v1506_v9 = vld [vmem:[%s2017_s1 + $0x474] ss:$8 sps:$4 sm:$0xff]   ;;  %v1499_v10 = vld [vmem:[%s2017_s1 + $0x380] ss:$8 sps:$4 sm:$0xff]  }
  0x45   :  { %1053 = vmatprep.subr.bf16.mxu1 %v1417_v11  ;;  %1042 = vmatprep.mubr.bf16.mxu0 %v1155_v34  ;;  %v1154_v11 = vcombine.low %v1831_v32, %v1831_v32 }
  0x46   :  { %1083 = vmatprep.mubr.bf16.mxu1 %v1157_v37 }
  0x47   :  { %1013 = vmatpush1.bf16.msra.mxu0 %v1412_v12  ;;  %v1504_v12 = vld [vmem:[%s2017_s1 + $0x470] ss:$8 sps:$4 sm:$0xff]  }
  0x48   :  { %1014 = vmatprep.subr.bf16.mxu0 %v1420_v13  ;;  %1054 = vmatpush1.bf16.msra.mxu1 %v1415_v14  ;;  %v1156_v13 = vcombine.low %v1841_v35, %v1841_v35  ;;  %v1511_v14 = vld [vmem:[%s2017_s1 + $0x464] ss:$8 sps:$4 sm:$0xff]  }
  0x49   :  { %1055 = vmatprep.subr.bf16.mxu1 %v1423_v15  ;;  %v1509_v15 = vld [vmem:[%s2017_s1 + $0x460] ss:$8 sps:$4 sm:$0xff]  }
  0x4b   :  { %1015 = vmatpush1.bf16.msra.mxu0 %v1418_v16  ;;  %v1531_v16 = vmov 0  }
  0x4c   :  { %1016 = vmatprep.subr.bf16.mxu0 %v1426_v17  ;;  %1056 = vmatpush1.bf16.msra.mxu1 %v1421_v18  ;;  %v1514_v17 = vld [vmem:[%s2017_s1 + $0x454] ss:$8 sps:$4 sm:$0xff]   ;;  %v1512_v18 = vld [vmem:[%s2017_s1 + $0x450] ss:$8 sps:$4 sm:$0xff]  }
  0x4d   :  { %1057 = vmatprep.subr.bf16.mxu1 %v1429_v19  ;;  %v1517_v19 = vld [vmem:[%s2017_s1 + $0x444] ss:$8 sps:$4 sm:$0xff]  }
  0x4f   :  { %1017 = vmatpush1.bf16.msra.mxu0 %v1424_v20  ;;  %v1515_v20 = vld [vmem:[%s2017_s1 + $0x440] ss:$8 sps:$4 sm:$0xff]  }
  0x50   :  { %1018 = vmatprep.subr.bf16.mxu0 %v1432_v21  ;;  %1058 = vmatpush1.bf16.msra.mxu1 %v1427_v22  ;;  %v1520_v21 = vld [vmem:[%s2017_s1 + $0x434] ss:$8 sps:$4 sm:$0xff]   ;;  %v1518_v22 = vld [vmem:[%s2017_s1 + $0x430] ss:$8 sps:$4 sm:$0xff]  }
  0x51   :  { %1059 = vmatprep.subr.bf16.mxu1 %v1435_v23  ;;  %v1523_v23 = vld [vmem:[%s2017_s1 + $0x424] ss:$8 sps:$4 sm:$0xff]  }
  0x53   :  { %1019 = vmatpush1.bf16.msra.mxu0 %v1430_v24  ;;  %v1521_v24 = vld [vmem:[%s2017_s1 + $0x420] ss:$8 sps:$4 sm:$0xff]  }
  0x54   :  { %1020 = vmatprep.subr.bf16.mxu0 %v1438_v25  ;;  %1060 = vmatpush1.bf16.msra.mxu1 %v1433_v26  ;;  %v1526_v25 = vld [vmem:[%s2017_s1 + $0x414] ss:$8 sps:$4 sm:$0xff]   ;;  %v1524_v26 = vld [vmem:[%s2017_s1 + $0x410] ss:$8 sps:$4 sm:$0xff]  }
  0x55   :  { %1061 = vmatprep.subr.bf16.mxu1 %v1441_v27  ;;  %v1529_v27 = vld [vmem:[%s2017_s1 + $0x404] ss:$8 sps:$4 sm:$0xff]  }
  0x57   :  { %1021 = vmatpush1.bf16.msra.mxu0 %v1436_v28  ;;  %v1527_v28 = vld [vmem:[%s2017_s1 + $0x400] ss:$8 sps:$4 sm:$0xff]  }
  0x58   :  { %1022 = vmatprep.subr.bf16.mxu0 %v1444_v29  ;;  %1062 = vmatpush1.bf16.msra.mxu1 %v1439_v30  ;;  %v1530_v29 = vld [vmem:[%s2018_s0 + $0x20] ss:$0 sps:$4 sm:$0xff]   ;;  %v166_v30 = vlaneseq }
  0x59   :  { %1063 = vmatprep.subr.bf16.mxu1 %v1447_v31 }
  0x5a   :  { %v167_v31 = vshrl.u32 %v166_v30, 7 }
  0x5b   :  { %1023 = vmatpush1.bf16.msra.mxu0 %v1442_v33  ;;  %v164_v33 = vld [vmem:[%s2019_s2] sm:$0x3] }
  0x5c   :  { %1024 = vmatprep.subr.bf16.mxu0 %v1450_v36  ;;  %1064 = vmatpush1.bf16.msra.mxu1 %v1445_v38  ;;  %v168_v32 = vsub.s32 0, %v167_v31  ;;  %v172_v34 = vsub.s32 1, %v167_v31 }
  0x5d   :  { %1065 = vmatprep.subr.bf16.mxu1 %v1453_v39 }
  0x5e   :  { %v169_v35 = vrot.slane %v164_v33, %v168_v32  ;;  %v173_v36 = vrot.slane %v164_v33, %v172_v34 }
  0x5f   :  { %1025 = vmatpush1.bf16.msra.mxu0 %v1448_v40 }
  0x60   :  { %1026 = vmatprep.subr.bf16.mxu0 %v1456_v41  ;;  %1066 = vmatpush1.bf16.msra.mxu1 %v1451_v42 }
  0x61   :  { %1067 = vmatprep.subr.bf16.mxu1 %v1459_v43 }
  0x63   :  { %1027 = vmatpush2.bf16.msra.mxu0 %v1454_v44 }
  0x64   :  { %1028 = vmatprep.subr.bf16.mxu0 %v1462_v45  ;;  %1068 = vmatpush2.bf16.msra.mxu1 %v1457_v46 }
  0x65   :  { %1069 = vmatprep.subr.bf16.mxu1 %v1465_v47 }
  0x67   :  { %1029 = vmatpush2.bf16.msra.mxu0 %v1460_v48 }
  0x68   :  { %1030 = vmatprep.subr.bf16.mxu0 %v1468_v49  ;;  %1070 = vmatpush2.bf16.msra.mxu1 %v1463_v50 }
  0x69   :  { %1071 = vmatprep.subr.bf16.mxu1 %v1471_v51 }
  0x6b   :  { %1031 = vmatpush2.bf16.msra.mxu0 %v1466_v52 }
  0x6c   :  { %1032 = vmatprep.subr.bf16.mxu0 %v1474_v53  ;;  %1072 = vmatpush2.bf16.msra.mxu1 %v1469_v54 }
  0x6d   :  { %1073 = vmatprep.subr.bf16.mxu1 %v1477_v55 }
  0x6f   :  { %1033 = vmatpush2.bf16.msra.mxu0 %v1472_v56 }
  0x70   :  { %1034 = vmatprep.subr.bf16.mxu0 %v1480_v57  ;;  %1074 = vmatpush2.bf16.msra.mxu1 %v1475_v58 }
  0x71   :  { %1075 = vmatprep.subr.bf16.mxu1 %v1483_v59 }
  0x73   :  { %1035 = vmatpush2.bf16.msra.mxu0 %v1478_v60 }
  0x74   :  { %1036 = vmatprep.subr.bf16.mxu0 %v1486_v61  ;;  %1076 = vmatpush2.bf16.msra.mxu1 %v1481_v62 }
  0x75   :  { %1077 = vmatprep.subr.bf16.mxu1 %v1489_v63 }
  0x77   :  { %1037 = vmatpush2.bf16.msra.mxu0 %v1484_v0 }
  0x78   :  { %1038 = vmatprep.subr.bf16.mxu0 %v1492_v1  ;;  %1078 = vmatpush2.bf16.msra.mxu1 %v1487_v2 }
  0x79   :  { %1079 = vmatprep.subr.bf16.mxu1 %v1495_v3 }
  0x7b   :  { %1039 = vmatpush2.bf16.msra.mxu0 %v1490_v4 }
  0x7c   :  { %1040 = vmatprep.subr.bf16.mxu0 %v1498_v5  ;;  %1080 = vmatpush2.bf16.msra.mxu1 %v1493_v6 }
  0x7d   :  { %1081 = vmatprep.subr.bf16.mxu1 %v1501_v7 }
  0x7f   :  { %1041 = vmatpush2.bf16.msra.mxu0 %v1496_v8 }
  0x80   :  { %1092 = vmatprep.subr.bf16.mxu0 %v1506_v9  ;;  %1082 = vmatpush2.bf16.msra.mxu1 %v1499_v10 }
  0x82   :  { %1043 = vmatmul.mubr.bf16.vlgmr.msra.gmra.mxu0 %v1154_v11 }
  0x83   :  { %1093 = vmatpush1.bf16.msra.mxu0 %v1504_v12  ;;  %1124 = vmatprep.mubr.bf16.mxu0 %v1531_v16 }
  0x84   :  { %1084 = vmatmul.mubr.bf16.vlgmr.msra.gmra.mxu1 %v1156_v13  ;;  %1094 = vmatprep.subr.bf16.mxu0 %v1511_v14 }
  0x87   :  { %1095 = vmatpush1.bf16.msra.mxu0 %v1509_v15 }
  0x88   :  { %1096 = vmatprep.subr.bf16.mxu0 %v1514_v17 }
  0x8b   :  { %1097 = vmatpush1.bf16.msra.mxu0 %v1512_v18 }
  0x8c   :  { %1098 = vmatprep.subr.bf16.mxu0 %v1517_v19 }
  0x8f   :  { %1099 = vmatpush1.bf16.msra.mxu0 %v1515_v20 }
  0x90   :  { %1100 = vmatprep.subr.bf16.mxu0 %v1520_v21 }
  0x93   :  { %1101 = vmatpush1.bf16.msra.mxu0 %v1518_v22 }
  0x94   :  { %1102 = vmatprep.subr.bf16.mxu0 %v1523_v23 }
  0x97   :  { %1103 = vmatpush1.bf16.msra.mxu0 %v1521_v24 }
  0x98   :  { %1104 = vmatprep.subr.bf16.mxu0 %v1526_v25 }
  0x9b   :  { %1105 = vmatpush1.bf16.msra.mxu0 %v1524_v26 }
  0x9c   :  { %1106 = vmatprep.subr.bf16.mxu0 %v1529_v27 }
  0x9f   :  { %1107 = vmatpush1.bf16.msra.mxu0 %v1527_v28 }
  0xa2   :  { %1125 = vmatmul.mubr.bf16.vlgmr.msra.gmra.mxu0 %v1530_v29 }
 0x102   :  { %v962_v37 = vpop.f32.mrf.mxu0 }
 0x103   :  { %v963_v38 = vadd.f32 %v962_v37, %v169_v35  ;;  %v1003_v40 = vpop.f32.mrf.mxu1 }
 0x104   :  { %v964_v39 = vpop.f32.mrf.mxu0 }
 0x105   :  { %v965_v41 = vadd.f32 %v964_v39, %v173_v36  ;;  %v1004_v42 = vadd.f32 %v1003_v40, %v963_v38  ;;  %v1005_v44 = vpop.f32.mrf.mxu1 }
 0x106   :  { %v966_v43 = vpop.f32.mrf.mxu0 }
 0x107   :  { %v1006_v45 = vadd.f32 %v1005_v44, %v965_v41  ;;  %v1007_v47 = vpop.f32.mrf.mxu1 }
 0x108   :  { %v967_v46 = vpop.f32.mrf.mxu0 }
 0x109   :  { %v1008_v48 = vpop.f32.mrf.mxu1 }
 0x142   :  { %v1044_v49 = vpop.f32.mrf.mxu0 }
 0x143   :  { %v1045_v57 = vadd.f32 %v1044_v49, %v1004_v42 }
 0x144   :  { %v1046_v50 = vpop.f32.mrf.mxu0  ;;  %v1085_v51 = vpop.f32.mrf.mxu1 }
 0x145   :  { %v1047_v58 = vadd.f32 %v1046_v50, %v1006_v45  ;;  %v1086_v59 = vadd.f32 %v1085_v51, %v1045_v57 }
 0x146   :  { %v1048_v52 = vpop.f32.mrf.mxu0  ;;  %v1087_v53 = vpop.f32.mrf.mxu1 }
 0x147   :  { %v1088_v61 = vadd.f32 %v1087_v53, %v1047_v58 }
 0x148   :  { %v1049_v54 = vpop.f32.mrf.mxu0  ;;  %v1089_v55 = vpop.f32.mrf.mxu1 }
 0x14a   :  { %v1090_v56 = vpop.f32.mrf.mxu1 }
 0x162   :  { %v1126_v60 = vpop.f32.mrf.mxu0 }
 0x163   :  { %v1127_v62 = vadd.f32 %v1126_v60, %v1086_v59 }
 0x164   :  { %v1128_v63 = vpop.f32.mrf.mxu0 }
 0x165   :  { %v1133_v0 = vmul.f32 0.2, %v1127_v62  ;;  %v1129_v1 = vadd.f32 %v1128_v63, %v1088_v61 }
 0x166   :  { %v1130_v2 = vpop.f32.mrf.mxu0 }
 0x167   :  { %v1134_v3 = vmul.f32 0.2, %v1129_v1  ;;  %v1135_v5 = vmax.f32 %v1127_v62, %v1133_v0 }
 0x168   :  { %v1131_v4 = vpop.f32.mrf.mxu0 }
 0x169   :  { %v1136_v6 = vmax.f32 %v1129_v1, %v1134_v3 }
 0x16b   :  { %v1304_v7 = vpack.c.bf16 %v1136_v6, %v1135_v5 }
 0x16d   :  { %1145 = vst [vmem:[%s2020_s3] sm:$0xff] %v1304_v7 }

// kernel: discriminator_forward.9
= control target key start
LH: loop header
LB: loop body
LE: loop exit
PB: predicated region body
PF: predicated region fallthrough
CT: control target
= control target key end

     0   :  { %v20_v0 = vlaneseq  ;;  %v112_v1 = vmov 1983009808   ;;  %vm77_vm0 = vcmask 1041408   ;;  %vm100_vm1 = vcmask 1024   ;;  %s145_s1 = inlined_call_operand.vmem [shape: f32[1,512], index: 1, kind: input, shape index: {}]   ;;  %s146_s2 = inlined_call_operand.<no memory space> [shape: f32[1,1], index: 2, kind: input, shape index: {}]   ;;  %s147_s0 = inlined_call_operand.vmem [shape: bf16[2,512], index: 0, kind: input, shape index: {}]   ;;  %s148_s3 = inlined_call_operand.vmem [shape: f32[2,1], index: 3, kind: output, shape index: {}]  }
   0x1   :  { %v39_v2 = vunpack.c.l.s4 %v112_v1  ;;  %v8_v3 = vstv %s146_s2  ;;  %v18_v5 = vld [vmem:[%s145_s1] sm:$0xf] }
   0x2   :  { %v21_v4 = vshrl.u32 %v20_v0, 7  ;;  %9 = vst [vmem:[#allocation2] sm:$0x1] %v8_v3  ;;  %v16_v16 = vld [vmem:[%s147_s0] sm:$0xf] }
   0x3   :  { %v40_v6 = vunpack.c.0.s8 %v39_v2  ;;  %v17_v19 = vunpack.c.l.bf16 %v16_v16 }
   0x4   :  { %v22_v7 = vsub.s32 0, %v21_v4  ;;  %v26_v8 = vsub.s32 1, %v21_v4  ;;  %v30_v9 = vsub.s32 2, %v21_v4  ;;  %v34_v10 = vsub.s32 3, %v21_v4 }
   0x5   :  { %v43_v11 = vsub.s32 %v40_v6, %v21_v4 }
   0x6   :  { %v23_v12 = vrot.slane %v18_v5, %v22_v7  ;;  %v27_v13 = vrot.slane %v18_v5, %v26_v8  ;;  %v31_v14 = vrot.slane %v18_v5, %v30_v9  ;;  %v35_v15 = vrot.slane %v18_v5, %v34_v10 }
   0x8   :  { %v36_v17 = vcombine.low %v23_v12, %v27_v13  ;;  %v37_v18 = vcombine.low %v31_v14, %v35_v15 }
   0x9   :  { %v106_v36 = vld [vmem:[#allocation2] ss:$0 sm:$0xff] }
   0xa   :  { %v44_v20 = vrot.slane %v36_v17, %v43_v11  ;;  %v51_v21 = vrot.slane %v37_v18, %v43_v11 }
   0xc   :  { %v52_v22 = vcombine.low %v44_v20, %v51_v21 }
   0xe   :  { %v54_v23 = vmul.f32 %v52_v22, %v17_v19 }
  0x10   :  { %v56_v24 = vcombine.high %v54_v23, %v54_v23  ;;  %v63_v25 = vrot.slane %v54_v23, %v43_v11 }
  0x12   :  { %v70_v26 = vrot.slane %v56_v24, %v43_v11  ;;  %v71_v27 = vcombine.high %v63_v25, %v63_v25  ;;  %v78_v28 = vsel %vm77_vm0, %v63_v25, 0.0 }
  0x14   :  { %v72_v29 = vcombine.high %v70_v26, %v70_v26  ;;  %v79_v30 = vsel %vm77_vm0, %v71_v27, 0.0  ;;  %v81_v31 = vsel %vm77_vm0, %v70_v26, 0.0 }
  0x15   :  { %v80_v32 = vadd.f32 %v79_v30, %v78_v28 }
  0x16   :  { %v83_v33 = vsel %vm77_vm0, %v72_v29, 0.0 }
  0x17   :  { %v82_v34 = vadd.f32 %v81_v31, %v80_v32 }
  0x19   :  { %v84_v35 = vadd.f32 %v83_v33, %v82_v34 }
  0x1b   :  { %85 = vadd.xlane.f32.xlu0 %v84_v35 }
  0xa4   :  { %v86_v37 = vpop.xlane.xlu0 %85 }
  0xa5   :  { %v94_v38 = vadd.f32 %v106_v36, %v86_v37 }
  0xa7   :  { %v95_v39 = vsub.f32 0.0, %v94_v38 }
  0xa9   :  { %v96_v40 = vmul.f32 1.442695, %v95_v39 }
  0xab   :  { %108 = vpow2.f32 %v96_v40 }
  0xb8   :  { %v109_v41 = vpop.eup %108 }
  0xb9   :  { %v98_v42 = vadd.f32 1.0, %v109_v41 }
  0xbb   :  { %110 = vrcp.f32 %v98_v42 }
  0xc8   :  { %v111_v43 = vpop.eup %110 }
  0xc9   :  { %101 = vst.msk [vmem:[%s148_s3] sm:$0x3] %vm100_vm1, %v111_v43 }

// kernel: discriminator_forward.8
= control target key start
LH: loop header
LB: loop body
LE: loop exit
PB: predicated region body
PF: predicated region fallthrough
CT: control target
= control target key end

     0   :  { %v595_v36 = vlaneseq  ;;  %v5868_v37 = vmov 1966171168   ;;  %s7806_s1 = inlined_call_operand.vmem [shape: bf16[2304,512], index: 1, kind: input, shape index: {}]   ;;  %s7807_s0 = inlined_call_operand.vmem [shape: bf16[2,2304], index: 0, kind: input, shape index: {}]   ;;  %s7808_s2 = inlined_call_operand.vmem [shape: f32[1,512], index: 2, kind: input, shape index: {}]   ;;  %s7809_s3 = inlined_call_operand.vmem [shape: bf16[2,512], index: 3, kind: output, shape index: {}]  }
   0x1   :  { %v5001_v0 = vld [vmem:[%s7806_s1 + $0xe4] ss:$16 sps:$4 sm:$0xff]   ;;  %v5005_v2 = vld [vmem:[%s7806_s1 + $0xe0] ss:$16 sps:$4 sm:$0xff]   ;;  %v620_v38 = vunpack.c.l.s4 %v5868_v37 }
   0x2   :  { %v5003_v1 = vld [vmem:[%s7806_s1 + $0x2e4] ss:$16 sps:$4 sm:$0xff]   ;;  %3636 = vmatprep.subr.bf16.mxu0 %v5001_v0  ;;  %v5006_v3 = vld [vmem:[%s7806_s1 + $0x2e0] ss:$16 sps:$4 sm:$0xff]   ;;  %v6006_v42 = vshrl.u32 %v595_v36, 7 }
   0x3   :  { %3677 = vmatprep.subr.bf16.mxu1 %v5003_v1  ;;  %v5007_v4 = vld [vmem:[%s7806_s1 + $0xc4] ss:$16 sps:$4 sm:$0xff]   ;;  %3637 = vmatpush1.bf16.msra.mxu0 %v5005_v2  ;;  %v5011_v6 = vld [vmem:[%s7806_s1 + $0xc0] ss:$16 sps:$4 sm:$0xff]   ;;  %v621_v43 = vunpack.c.0.s8 %v620_v38 }
   0x4   :  { %3678 = vmatpush1.bf16.msra.mxu1 %v5006_v3  ;;  %v5009_v5 = vld [vmem:[%s7806_s1 + $0x2c4] ss:$16 sps:$4 sm:$0xff]   ;;  %3638 = vmatprep.subr.bf16.mxu0 %v5007_v4  ;;  %v5012_v7 = vld [vmem:[%s7806_s1 + $0x2c0] ss:$16 sps:$4 sm:$0xff]  }
   0x5   :  { %3679 = vmatprep.subr.bf16.mxu1 %v5009_v5  ;;  %v5013_v8 = vld [vmem:[%s7806_s1 + $0xa4] ss:$16 sps:$4 sm:$0xff]   ;;  %v5017_v10 = vld [vmem:[%s7806_s1 + $0xa0] ss:$16 sps:$4 sm:$0xff]   ;;  %v6024_v49 = vsub.s32 %v621_v43, %v6006_v42 }
   0x6   :  { %v5015_v9 = vld [vmem:[%s7806_s1 + $0x2a4] ss:$16 sps:$4 sm:$0xff]   ;;  %v5018_v11 = vld [vmem:[%s7806_s1 + $0x2a0] ss:$16 sps:$4 sm:$0xff]  }
   0x7   :  { %3639 = vmatpush1.bf16.msra.mxu0 %v5011_v6  ;;  %v5019_v12 = vld [vmem:[%s7806_s1 + $0x84] ss:$16 sps:$4 sm:$0xff]   ;;  %v5023_v14 = vld [vmem:[%s7806_s1 + $0x80] ss:$16 sps:$4 sm:$0xff]  }
   0x8   :  { %3680 = vmatpush1.bf16.msra.mxu1 %v5012_v7  ;;  %3640 = vmatprep.subr.bf16.mxu0 %v5013_v8  ;;  %v5021_v13 = vld [vmem:[%s7806_s1 + $0x284] ss:$16 sps:$4 sm:$0xff]   ;;  %v5024_v15 = vld [vmem:[%s7806_s1 + $0x280] ss:$16 sps:$4 sm:$0xff]  }
   0x9   :  { %3681 = vmatprep.subr.bf16.mxu1 %v5015_v9  ;;  %v5025_v16 = vld [vmem:[%s7806_s1 + $0x64] ss:$16 sps:$4 sm:$0xff]   ;;  %v5029_v18 = vld [vmem:[%s7806_s1 + $0x60] ss:$16 sps:$4 sm:$0xff]  }
   0xa   :  { %v5027_v17 = vld [vmem:[%s7806_s1 + $0x264] ss:$16 sps:$4 sm:$0xff]   ;;  %v5030_v19 = vld [vmem:[%s7806_s1 + $0x260] ss:$16 sps:$4 sm:$0xff]  }
   0xb   :  { %3641 = vmatpush1.bf16.msra.mxu0 %v5017_v10  ;;  %v5031_v20 = vld [vmem:[%s7806_s1 + $0x44] ss:$16 sps:$4 sm:$0xff]   ;;  %v5035_v22 = vld [vmem:[%s7806_s1 + $0x40] ss:$16 sps:$4 sm:$0xff]  }
   0xc   :  { %3682 = vmatpush1.bf16.msra.mxu1 %v5018_v11  ;;  %3642 = vmatprep.subr.bf16.mxu0 %v5019_v12  ;;  %v5033_v21 = vld [vmem:[%s7806_s1 + $0x244] ss:$16 sps:$4 sm:$0xff]   ;;  %v5036_v23 = vld [vmem:[%s7806_s1 + $0x240] ss:$16 sps:$4 sm:$0xff]  }
   0xd   :  { %3683 = vmatprep.subr.bf16.mxu1 %v5021_v13  ;;  %v5037_v24 = vld [vmem:[%s7806_s1 + $0x24] ss:$16 sps:$4 sm:$0xff]   ;;  %v5041_v26 = vld [vmem:[%s7806_s1 + $0x20] ss:$16 sps:$4 sm:$0xff]  }
   0xe   :  { %v5039_v25 = vld [vmem:[%s7806_s1 + $0x224] ss:$16 sps:$4 sm:$0xff]   ;;  %v5042_v27 = vld [vmem:[%s7806_s1 + $0x220] ss:$16 sps:$4 sm:$0xff]  }
   0xf   :  { %3643 = vmatpush1.bf16.msra.mxu0 %v5023_v14  ;;  %v5043_v28 = vld [vmem:[%s7806_s1 + $0x4] ss:$16 sps:$4 sm:$0xff]   ;;  %v5047_v30 = vld [vmem:[%s7806_s1] ss:$16 sps:$4 sm:$0xff]  }
  0x10   :  { %3684 = vmatpush1.bf16.msra.mxu1 %v5024_v15  ;;  %3644 = vmatprep.subr.bf16.mxu0 %v5025_v16  ;;  %v5045_v29 = vld [vmem:[%s7806_s1 + $0x204] ss:$16 sps:$4 sm:$0xff]   ;;  %v5048_v31 = vld [vmem:[%s7806_s1 + $0x200] ss:$16 sps:$4 sm:$0xff]  }
  0x11   :  { %3685 = vmatprep.subr.bf16.mxu1 %v5027_v17  ;;  %v5049_v32 = vld [vmem:[%s7806_s1 + $0x1e4] ss:$16 sps:$4 sm:$0xff]   ;;  %v5053_v34 = vld [vmem:[%s7806_s1 + $0x1e0] ss:$16 sps:$4 sm:$0xff]  }
  0x12   :  { %v5051_v33 = vld [vmem:[%s7806_s1 + $0x3e4] ss:$16 sps:$4 sm:$0xff]   ;;  %v5054_v35 = vld [vmem:[%s7806_s1 + $0x3e0] ss:$16 sps:$4 sm:$0xff]  }
  0x13   :  { %3645 = vmatpush1.bf16.msra.mxu0 %v5029_v18  ;;  %v5055_v39 = vld [vmem:[%s7806_s1 + $0x1c4] ss:$16 sps:$4 sm:$0xff]   ;;  %v5059_v41 = vld [vmem:[%s7806_s1 + $0x1c0] ss:$16 sps:$4 sm:$0xff]  }
  0x14   :  { %3686 = vmatpush1.bf16.msra.mxu1 %v5030_v19  ;;  %3646 = vmatprep.subr.bf16.mxu0 %v5031_v20  ;;  %v5057_v40 = vld [vmem:[%s7806_s1 + $0x3c4] ss:$16 sps:$4 sm:$0xff]   ;;  %v5060_v44 = vld [vmem:[%s7806_s1 + $0x3c0] ss:$16 sps:$4 sm:$0xff]  }
  0x15   :  { %3687 = vmatprep.subr.bf16.mxu1 %v5033_v21  ;;  %v5061_v45 = vld [vmem:[%s7806_s1 + $0x1a4] ss:$16 sps:$4 sm:$0xff]   ;;  %v5065_v47 = vld [vmem:[%s7806_s1 + $0x1a0] ss:$16 sps:$4 sm:$0xff]  }
  0x16   :  { %v5063_v46 = vld [vmem:[%s7806_s1 + $0x3a4] ss:$16 sps:$4 sm:$0xff]   ;;  %v5066_v48 = vld [vmem:[%s7806_s1 + $0x3a0] ss:$16 sps:$4 sm:$0xff]  }
  0x17   :  { %3647 = vmatpush1.bf16.msra.mxu0 %v5035_v22  ;;  %v5067_v50 = vld [vmem:[%s7806_s1 + $0x184] ss:$16 sps:$4 sm:$0xff]   ;;  %v5071_v53 = vld [vmem:[%s7806_s1 + $0x180] ss:$16 sps:$4 sm:$0xff]  }
  0x18   :  { %3688 = vmatpush1.bf16.msra.mxu1 %v5036_v23  ;;  %3648 = vmatprep.subr.bf16.mxu0 %v5037_v24  ;;  %v5069_v51 = vld [vmem:[%s7806_s1 + $0x384] ss:$16 sps:$4 sm:$0xff]   ;;  %v5072_v55 = vld [vmem:[%s7806_s1 + $0x380] ss:$16 sps:$4 sm:$0xff]  }
  0x19   :  { %3689 = vmatprep.subr.bf16.mxu1 %v5039_v25  ;;  %v14_v52 = vld [vmem:[%s7807_s0] sm:$0xff] }
  0x1a   :  { %v625_v54 = vrot.slane %v14_v52, %v6024_v49  ;;  %v5073_v56 = vld [vmem:[%s7806_s1 + $0x164] ss:$16 sps:$4 sm:$0xff]   ;;  %v5077_v59 = vld [vmem:[%s7806_s1 + $0x160] ss:$16 sps:$4 sm:$0xff]   ;;  %v618_v1 = vcombine.high %v14_v52, %v14_v52 }
  0x1b   :  { %3649 = vmatpush1.bf16.msra.mxu0 %v5041_v26  ;;  %v5075_v57 = vld [vmem:[%s7806_s1 + $0x364] ss:$16 sps:$4 sm:$0xff]   ;;  %v5078_v61 = vld [vmem:[%s7806_s1 + $0x360] ss:$16 sps:$4 sm:$0xff]  }
  0x1c   :  { %3690 = vmatpush1.bf16.msra.mxu1 %v5042_v27  ;;  %3650 = vmatprep.subr.bf16.mxu0 %v5043_v28  ;;  %v633_v58 = vcombine.high %v625_v54, %v625_v54  ;;  %v5079_v62 = vld [vmem:[%s7806_s1 + $0x144] ss:$16 sps:$4 sm:$0xff]   ;;  %v5083_v2 = vld [vmem:[%s7806_s1 + $0x140] ss:$16 sps:$4 sm:$0xff]   ;;  %v6082_v6 = vrot.slane %v618_v1, %v6024_v49  ;;  %v6102_v13 = vrot.slane %v625_v54, %v6024_v49 }
  0x1d   :  { %3691 = vmatprep.subr.bf16.mxu1 %v5045_v29  ;;  %v5081_v63 = vld [vmem:[%s7806_s1 + $0x344] ss:$16 sps:$4 sm:$0xff]   ;;  %v5084_v3 = vld [vmem:[%s7806_s1 + $0x340] ss:$16 sps:$4 sm:$0xff]  }
  0x1e   :  { %v6052_v60 = vrot.slane %v633_v58, %v6024_v49  ;;  %v5085_v4 = vld [vmem:[%s7806_s1 + $0x124] ss:$16 sps:$4 sm:$0xff]   ;;  %v5089_v7 = vld [vmem:[%s7806_s1 + $0x120] ss:$16 sps:$4 sm:$0xff]   ;;  %v634_v11 = vcombine.high %v6082_v6, %v6082_v6  ;;  %v6118_v18 = vcombine.high %v6102_v13, %v6102_v13 }
  0x1f   :  { %3651 = vmatpush1.bf16.msra.mxu0 %v5047_v30  ;;  %v5087_v5 = vld [vmem:[%s7806_s1 + $0x324] ss:$16 sps:$4 sm:$0xff]   ;;  %v5090_v8 = vld [vmem:[%s7806_s1 + $0x320] ss:$16 sps:$4 sm:$0xff]  }
  0x20   :  { %3692 = vmatpush1.bf16.msra.mxu1 %v5048_v31  ;;  %3652 = vmatprep.subr.bf16.mxu0 %v5049_v32  ;;  %v6065_v0 = vcombine.high %v6052_v60, %v6052_v60  ;;  %v5091_v9 = vld [vmem:[%s7806_s1 + $0x104] ss:$16 sps:$4 sm:$0xff]   ;;  %v5095_v12 = vld [vmem:[%s7806_s1 + $0x100] ss:$16 sps:$4 sm:$0xff]   ;;  %v6114_v17 = vrot.slane %v634_v11, %v6024_v49 }
  0x21   :  { %3693 = vmatprep.subr.bf16.mxu1 %v5051_v33  ;;  %3668 = vmatprep.mubr.bf16.mxu0 %v6052_v60  ;;  %v5093_v10 = vld [vmem:[%s7806_s1 + $0x304] ss:$16 sps:$4 sm:$0xff]   ;;  %v5096_v14 = vld [vmem:[%s7806_s1 + $0x300] ss:$16 sps:$4 sm:$0xff]  }
  0x22   :  { %3709 = vmatprep.mubr.bf16.mxu1 %v6065_v0  ;;  %v5099_v15 = vld [vmem:[%s7806_s1 + $0x4e4] ss:$16 sps:$4 sm:$0xff]   ;;  %v5097_v19 = vld [vmem:[%s7806_s1 + $0x4e0] ss:$16 sps:$4 sm:$0xff]   ;;  %v6134_v23 = vcombine.high %v6114_v17, %v6114_v17 }
  0x23   :  { %3653 = vmatpush2.bf16.msra.mxu0 %v5053_v34  ;;  %v5102_v16 = vld [vmem:[%s7806_s1 + $0x6e4] ss:$16 sps:$4 sm:$0xff]   ;;  %v5100_v20 = vld [vmem:[%s7806_s1 + $0x6e0] ss:$16 sps:$4 sm:$0xff]  }
  0x24   :  { %3694 = vmatpush2.bf16.msra.mxu1 %v5054_v35  ;;  %3654 = vmatprep.subr.bf16.mxu0 %v5055_v39  ;;  %v5105_v21 = vld [vmem:[%s7806_s1 + $0x4c4] ss:$16 sps:$4 sm:$0xff]   ;;  %v5103_v24 = vld [vmem:[%s7806_s1 + $0x4c0] ss:$16 sps:$4 sm:$0xff]  }
  0x25   :  { %3695 = vmatprep.subr.bf16.mxu1 %v5057_v40  ;;  %v5108_v22 = vld [vmem:[%s7806_s1 + $0x6c4] ss:$16 sps:$4 sm:$0xff]   ;;  %v5106_v25 = vld [vmem:[%s7806_s1 + $0x6c0] ss:$16 sps:$4 sm:$0xff]  }
  0x26   :  { %v5111_v26 = vld [vmem:[%s7806_s1 + $0x4a4] ss:$16 sps:$4 sm:$0xff]   ;;  %v5109_v28 = vld [vmem:[%s7806_s1 + $0x4a0] ss:$16 sps:$4 sm:$0xff]  }
  0x27   :  { %3655 = vmatpush2.bf16.msra.mxu0 %v5059_v41  ;;  %v5114_v27 = vld [vmem:[%s7806_s1 + $0x6a4] ss:$16 sps:$4 sm:$0xff]   ;;  %v5112_v29 = vld [vmem:[%s7806_s1 + $0x6a0] ss:$16 sps:$4 sm:$0xff]  }
  0x28   :  { %3696 = vmatpush2.bf16.msra.mxu1 %v5060_v44  ;;  %3656 = vmatprep.subr.bf16.mxu0 %v5061_v45  ;;  %v5117_v30 = vld [vmem:[%s7806_s1 + $0x484] ss:$16 sps:$4 sm:$0xff]   ;;  %v5115_v32 = vld [vmem:[%s7806_s1 + $0x480] ss:$16 sps:$4 sm:$0xff]  }
  0x29   :  { %3697 = vmatprep.subr.bf16.mxu1 %v5063_v46  ;;  %v5120_v31 = vld [vmem:[%s7806_s1 + $0x684] ss:$16 sps:$4 sm:$0xff]   ;;  %v5118_v33 = vld [vmem:[%s7806_s1 + $0x680] ss:$16 sps:$4 sm:$0xff]  }
  0x2a   :  { %v5123_v34 = vld [vmem:[%s7806_s1 + $0x464] ss:$16 sps:$4 sm:$0xff]   ;;  %v5121_v36 = vld [vmem:[%s7806_s1 + $0x460] ss:$16 sps:$4 sm:$0xff]  }
  0x2b   :  { %3657 = vmatpush2.bf16.msra.mxu0 %v5065_v47  ;;  %v5126_v35 = vld [vmem:[%s7806_s1 + $0x664] ss:$16 sps:$4 sm:$0xff]   ;;  %v5124_v37 = vld [vmem:[%s7806_s1 + $0x660] ss:$16 sps:$4 sm:$0xff]  }
  0x2c   :  { %3698 = vmatpush2.bf16.msra.mxu1 %v5066_v48  ;;  %3658 = vmatprep.subr.bf16.mxu0 %v5067_v50  ;;  %v5129_v38 = vld [vmem:[%s7806_s1 + $0x444] ss:$16 sps:$4 sm:$0xff]   ;;  %v5127_v40 = vld [vmem:[%s7806_s1 + $0x440] ss:$16 sps:$4 sm:$0xff]  }
  0x2d   :  { %3699 = vmatprep.subr.bf16.mxu1 %v5069_v51  ;;  %v5132_v39 = vld [vmem:[%s7806_s1 + $0x644] ss:$16 sps:$4 sm:$0xff]   ;;  %v5130_v41 = vld [vmem:[%s7806_s1 + $0x640] ss:$16 sps:$4 sm:$0xff]  }
  0x2e   :  { %v5135_v43 = vld [vmem:[%s7806_s1 + $0x424] ss:$16 sps:$4 sm:$0xff]   ;;  %v5133_v45 = vld [vmem:[%s7806_s1 + $0x420] ss:$16 sps:$4 sm:$0xff]  }
  0x2f   :  { %3659 = vmatpush2.bf16.msra.mxu0 %v5071_v53  ;;  %v5138_v44 = vld [vmem:[%s7806_s1 + $0x624] ss:$16 sps:$4 sm:$0xff]   ;;  %v5136_v46 = vld [vmem:[%s7806_s1 + $0x620] ss:$16 sps:$4 sm:$0xff]  }
  0x30   :  { %3700 = vmatpush2.bf16.msra.mxu1 %v5072_v55  ;;  %3660 = vmatprep.subr.bf16.mxu0 %v5073_v56  ;;  %v5141_v47 = vld [vmem:[%s7806_s1 + $0x404] ss:$16 sps:$4 sm:$0xff]   ;;  %v5139_v50 = vld [vmem:[%s7806_s1 + $0x400] ss:$16 sps:$4 sm:$0xff]  }
  0x31   :  { %3701 = vmatprep.subr.bf16.mxu1 %v5075_v57  ;;  %v5144_v48 = vld [vmem:[%s7806_s1 + $0x604] ss:$16 sps:$4 sm:$0xff]   ;;  %v5142_v51 = vld [vmem:[%s7806_s1 + $0x600] ss:$16 sps:$4 sm:$0xff]  }
  0x32   :  { %v5147_v52 = vld [vmem:[%s7806_s1 + $0x5e4] ss:$16 sps:$4 sm:$0xff]   ;;  %v5145_v54 = vld [vmem:[%s7806_s1 + $0x5e0] ss:$16 sps:$4 sm:$0xff]  }
  0x33   :  { %3661 = vmatpush2.bf16.msra.mxu0 %v5077_v59  ;;  %v5150_v53 = vld [vmem:[%s7806_s1 + $0x7e4] ss:$16 sps:$4 sm:$0xff]   ;;  %v5148_v55 = vld [vmem:[%s7806_s1 + $0x7e0] ss:$16 sps:$4 sm:$0xff]  }
  0x34   :  { %3702 = vmatpush2.bf16.msra.mxu1 %v5078_v61  ;;  %3662 = vmatprep.subr.bf16.mxu0 %v5079_v62  ;;  %v5153_v56 = vld [vmem:[%s7806_s1 + $0x5c4] ss:$16 sps:$4 sm:$0xff]   ;;  %v5151_v58 = vld [vmem:[%s7806_s1 + $0x5c0] ss:$16 sps:$4 sm:$0xff]  }
  0x35   :  { %3703 = vmatprep.subr.bf16.mxu1 %v5081_v63  ;;  %v5156_v57 = vld [vmem:[%s7806_s1 + $0x7c4] ss:$16 sps:$4 sm:$0xff]   ;;  %v5154_v59 = vld [vmem:[%s7806_s1 + $0x7c0] ss:$16 sps:$4 sm:$0xff]  }
  0x36   :  { %v5159_v61 = vld [vmem:[%s7806_s1 + $0x5a4] ss:$16 sps:$4 sm:$0xff]   ;;  %v5157_v63 = vld [vmem:[%s7806_s1 + $0x5a0] ss:$16 sps:$4 sm:$0xff]  }
  0x37   :  { %3663 = vmatpush2.bf16.msra.mxu0 %v5083_v2  ;;  %v5162_v62 = vld [vmem:[%s7806_s1 + $0x7a4] ss:$16 sps:$4 sm:$0xff]   ;;  %v5160_v1 = vld [vmem:[%s7806_s1 + $0x7a0] ss:$16 sps:$4 sm:$0xff]  }
  0x38   :  { %3704 = vmatpush2.bf16.msra.mxu1 %v5084_v3  ;;  %3664 = vmatprep.subr.bf16.mxu0 %v5085_v4  ;;  %v5165_v2 = vld [vmem:[%s7806_s1 + $0x584] ss:$16 sps:$4 sm:$0xff]   ;;  %v5163_v4 = vld [vmem:[%s7806_s1 + $0x580] ss:$16 sps:$4 sm:$0xff]  }
  0x39   :  { %3705 = vmatprep.subr.bf16.mxu1 %v5087_v5  ;;  %v5168_v3 = vld [vmem:[%s7806_s1 + $0x784] ss:$16 sps:$4 sm:$0xff]   ;;  %v5166_v5 = vld [vmem:[%s7806_s1 + $0x780] ss:$16 sps:$4 sm:$0xff]  }
  0x3a   :  { %v5177_v11 = vld [vmem:[%s7806_s1 + $0x544] ss:$16 sps:$4 sm:$0xff]  }
  0x3b   :  { %3665 = vmatpush2.bf16.msra.mxu0 %v5089_v7  ;;  %v5171_v7 = vld [vmem:[%s7806_s1 + $0x564] ss:$16 sps:$4 sm:$0xff]  }
  0x3c   :  { %3706 = vmatpush2.bf16.msra.mxu1 %v5090_v8  ;;  %3666 = vmatprep.subr.bf16.mxu0 %v5091_v9  ;;  %v5174_v8 = vld [vmem:[%s7806_s1 + $0x764] ss:$16 sps:$4 sm:$0xff]   ;;  %v5169_v9 = vld [vmem:[%s7806_s1 + $0x560] ss:$16 sps:$4 sm:$0xff]  }
  0x3d   :  { %3707 = vmatprep.subr.bf16.mxu1 %v5093_v10  ;;  %v5172_v10 = vld [vmem:[%s7806_s1 + $0x760] ss:$16 sps:$4 sm:$0xff]  }
  0x3f   :  { %3667 = vmatpush2.bf16.msra.mxu0 %v5095_v12  ;;  %v5180_v12 = vld [vmem:[%s7806_s1 + $0x744] ss:$16 sps:$4 sm:$0xff]  }
  0x40   :  { %3708 = vmatpush2.bf16.msra.mxu1 %v5096_v14  ;;  %3718 = vmatprep.subr.bf16.mxu0 %v5099_v15  ;;  %v5175_v14 = vld [vmem:[%s7806_s1 + $0x540] ss:$16 sps:$4 sm:$0xff]  }
  0x41   :  { %3759 = vmatprep.subr.bf16.mxu1 %v5102_v16  ;;  %v5178_v15 = vld [vmem:[%s7806_s1 + $0x740] ss:$16 sps:$4 sm:$0xff]   ;;  %v5183_v16 = vld [vmem:[%s7806_s1 + $0x524] ss:$16 sps:$4 sm:$0xff]  }
  0x42   :  { %3669 = vmatmul.mubr.bf16.vlgmr.msra.gmra.mxu0 %v6102_v13 }
  0x43   :  { %3710 = vmatmul.mubr.bf16.vlgmr.msra.gmra.mxu1 %v6118_v18  ;;  %3719 = vmatpush1.bf16.msra.mxu0 %v5097_v19  ;;  %v5186_v19 = vld [vmem:[%s7806_s1 + $0x724] ss:$16 sps:$4 sm:$0xff]  }
  0x44   :  { %3760 = vmatpush1.bf16.msra.mxu1 %v5100_v20  ;;  %3720 = vmatprep.subr.bf16.mxu0 %v5105_v21  ;;  %v5181_v20 = vld [vmem:[%s7806_s1 + $0x520] ss:$16 sps:$4 sm:$0xff]  }
  0x45   :  { %3761 = vmatprep.subr.bf16.mxu1 %v5108_v22  ;;  %3750 = vmatprep.mubr.bf16.mxu0 %v6114_v17  ;;  %v5184_v21 = vld [vmem:[%s7806_s1 + $0x720] ss:$16 sps:$4 sm:$0xff]   ;;  %v5189_v22 = vld [vmem:[%s7806_s1 + $0x504] ss:$16 sps:$4 sm:$0xff]  }
  0x46   :  { %3791 = vmatprep.mubr.bf16.mxu1 %v6134_v23 }
  0x47   :  { %3721 = vmatpush1.bf16.msra.mxu0 %v5103_v24  ;;  %v5192_v24 = vld [vmem:[%s7806_s1 + $0x704] ss:$16 sps:$4 sm:$0xff]  }
  0x48   :  { %3762 = vmatpush1.bf16.msra.mxu1 %v5106_v25  ;;  %3722 = vmatprep.subr.bf16.mxu0 %v5111_v26  ;;  %v5187_v25 = vld [vmem:[%s7806_s1 + $0x500] ss:$16 sps:$4 sm:$0xff]   ;;  %v6313_v26 = vrot.slane %v6082_v6, %v6024_v49 }
  0x49   :  { %3763 = vmatprep.subr.bf16.mxu1 %v5114_v27  ;;  %v5190_v27 = vld [vmem:[%s7806_s1 + $0x700] ss:$16 sps:$4 sm:$0xff]  }
  0x4a   :  { %v6326_v6 = vcombine.high %v6313_v26, %v6313_v26 }
  0x4b   :  { %3723 = vmatpush1.bf16.msra.mxu0 %v5109_v28  ;;  %v5196_v28 = vld [vmem:[%s7806_s1 + $0x8e4] ss:$16 sps:$4 sm:$0xff]  }
  0x4c   :  { %3764 = vmatpush1.bf16.msra.mxu1 %v5112_v29  ;;  %3724 = vmatprep.subr.bf16.mxu0 %v5117_v30  ;;  %v5199_v29 = vld [vmem:[%s7806_s1 + $0xae4] ss:$16 sps:$4 sm:$0xff]   ;;  %v5194_v30 = vld [vmem:[%s7806_s1 + $0x8e0] ss:$16 sps:$4 sm:$0xff]  }
  0x4d   :  { %3765 = vmatprep.subr.bf16.mxu1 %v5120_v31  ;;  %v5197_v31 = vld [vmem:[%s7806_s1 + $0xae0] ss:$16 sps:$4 sm:$0xff]  }
  0x4f   :  { %3725 = vmatpush1.bf16.msra.mxu0 %v5115_v32  ;;  %v6337_v32 = vld [vmem:[%s7807_s0 + $0x8] sm:$0xff] }
  0x50   :  { %3766 = vmatpush1.bf16.msra.mxu1 %v5118_v33  ;;  %3726 = vmatprep.subr.bf16.mxu0 %v5123_v34  ;;  %v5202_v33 = vld [vmem:[%s7806_s1 + $0x8c4] ss:$16 sps:$4 sm:$0xff]  }
  0x51   :  { %3767 = vmatprep.subr.bf16.mxu1 %v5126_v35  ;;  %v5205_v34 = vld [vmem:[%s7806_s1 + $0xac4] ss:$16 sps:$4 sm:$0xff]   ;;  %v6347_v35 = vrot.slane %v6337_v32, %v6024_v49 }
  0x53   :  { %3727 = vmatpush1.bf16.msra.mxu0 %v5121_v36  ;;  %v682_v36 = vcombine.high %v6347_v35, %v6347_v35 }
  0x54   :  { %3768 = vmatpush1.bf16.msra.mxu1 %v5124_v37  ;;  %3728 = vmatprep.subr.bf16.mxu0 %v5129_v38  ;;  %v5200_v37 = vld [vmem:[%s7806_s1 + $0x8c0] ss:$16 sps:$4 sm:$0xff]  }
  0x55   :  { %3769 = vmatprep.subr.bf16.mxu1 %v5132_v39  ;;  %v5203_v38 = vld [vmem:[%s7806_s1 + $0xac0] ss:$16 sps:$4 sm:$0xff]   ;;  %v5208_v39 = vld [vmem:[%s7806_s1 + $0x8a4] ss:$16 sps:$4 sm:$0xff]  }
  0x57   :  { %3729 = vmatpush1.bf16.msra.mxu0 %v5127_v40  ;;  %v5211_v40 = vld [vmem:[%s7806_s1 + $0xaa4] ss:$16 sps:$4 sm:$0xff]  }
  0x58   :  { %3770 = vmatpush1.bf16.msra.mxu1 %v5130_v41  ;;  %3730 = vmatprep.subr.bf16.mxu0 %v5135_v43  ;;  %v6366_v41 = vrot.slane %v682_v36, %v6024_v49  ;;  %v5272_v36 = vld [vmem:[%s7806_s1 + $0x940] ss:$16 sps:$4 sm:$0xff]  }
  0x59   :  { %3771 = vmatprep.subr.bf16.mxu1 %v5138_v44  ;;  %v5206_v44 = vld [vmem:[%s7806_s1 + $0x8a0] ss:$16 sps:$4 sm:$0xff]  }
  0x5a   :  { %v6371_v43 = vcombine.high %v6366_v41, %v6366_v41 }
  0x5b   :  { %3731 = vmatpush1.bf16.msra.mxu0 %v5133_v45  ;;  %v5209_v45 = vld [vmem:[%s7806_s1 + $0xaa0] ss:$16 sps:$4 sm:$0xff]  }
  0x5c   :  { %3772 = vmatpush1.bf16.msra.mxu1 %v5136_v46  ;;  %3732 = vmatprep.subr.bf16.mxu0 %v5141_v47  ;;  %v5214_v46 = vld [vmem:[%s7806_s1 + $0x884] ss:$16 sps:$4 sm:$0xff]  }
  0x5d   :  { %3773 = vmatprep.subr.bf16.mxu1 %v5144_v48  ;;  %v5217_v47 = vld [vmem:[%s7806_s1 + $0xa84] ss:$16 sps:$4 sm:$0xff]   ;;  %v5212_v48 = vld [vmem:[%s7806_s1 + $0x880] ss:$16 sps:$4 sm:$0xff]  }
  0x5f   :  { %3733 = vmatpush1.bf16.msra.mxu0 %v5139_v50  ;;  %v5215_v50 = vld [vmem:[%s7806_s1 + $0xa80] ss:$16 sps:$4 sm:$0xff]  }
  0x60   :  { %3774 = vmatpush1.bf16.msra.mxu1 %v5142_v51  ;;  %3734 = vmatprep.subr.bf16.mxu0 %v5147_v52  ;;  %v5220_v51 = vld [vmem:[%s7806_s1 + $0x864] ss:$16 sps:$4 sm:$0xff]  }
  0x61   :  { %3775 = vmatprep.subr.bf16.mxu1 %v5150_v53  ;;  %v5223_v52 = vld [vmem:[%s7806_s1 + $0xa64] ss:$16 sps:$4 sm:$0xff]   ;;  %v5218_v53 = vld [vmem:[%s7806_s1 + $0x860] ss:$16 sps:$4 sm:$0xff]  }
  0x63   :  { %3735 = vmatpush2.bf16.msra.mxu0 %v5145_v54  ;;  %v5221_v54 = vld [vmem:[%s7806_s1 + $0xa60] ss:$16 sps:$4 sm:$0xff]  }
  0x64   :  { %3776 = vmatpush2.bf16.msra.mxu1 %v5148_v55  ;;  %3736 = vmatprep.subr.bf16.mxu0 %v5153_v56  ;;  %v5226_v55 = vld [vmem:[%s7806_s1 + $0x844] ss:$16 sps:$4 sm:$0xff]  }
  0x65   :  { %3777 = vmatprep.subr.bf16.mxu1 %v5156_v57  ;;  %v5229_v56 = vld [vmem:[%s7806_s1 + $0xa44] ss:$16 sps:$4 sm:$0xff]   ;;  %v5224_v57 = vld [vmem:[%s7806_s1 + $0x840] ss:$16 sps:$4 sm:$0xff]  }
  0x67   :  { %3737 = vmatpush2.bf16.msra.mxu0 %v5151_v58  ;;  %v5227_v58 = vld [vmem:[%s7806_s1 + $0xa40] ss:$16 sps:$4 sm:$0xff]  }
  0x68   :  { %3778 = vmatpush2.bf16.msra.mxu1 %v5154_v59  ;;  %3738 = vmatprep.subr.bf16.mxu0 %v5159_v61  ;;  %v5232_v59 = vld [vmem:[%s7806_s1 + $0x824] ss:$16 sps:$4 sm:$0xff]  }
  0x69   :  { %3779 = vmatprep.subr.bf16.mxu1 %v5162_v62  ;;  %v5235_v61 = vld [vmem:[%s7806_s1 + $0xa24] ss:$16 sps:$4 sm:$0xff]   ;;  %v5230_v62 = vld [vmem:[%s7806_s1 + $0x820] ss:$16 sps:$4 sm:$0xff]  }
  0x6b   :  { %3739 = vmatpush2.bf16.msra.mxu0 %v5157_v63  ;;  %v5233_v63 = vld [vmem:[%s7806_s1 + $0xa20] ss:$16 sps:$4 sm:$0xff]  }
  0x6c   :  { %3780 = vmatpush2.bf16.msra.mxu1 %v5160_v1  ;;  %3740 = vmatprep.subr.bf16.mxu0 %v5165_v2  ;;  %v5238_v1 = vld [vmem:[%s7806_s1 + $0x804] ss:$16 sps:$4 sm:$0xff]  }
  0x6d   :  { %3781 = vmatprep.subr.bf16.mxu1 %v5168_v3  ;;  %v5241_v2 = vld [vmem:[%s7806_s1 + $0xa04] ss:$16 sps:$4 sm:$0xff]   ;;  %v5236_v3 = vld [vmem:[%s7806_s1 + $0x800] ss:$16 sps:$4 sm:$0xff]  }
  0x6f   :  { %3741 = vmatpush2.bf16.msra.mxu0 %v5163_v4  ;;  %v5239_v4 = vld [vmem:[%s7806_s1 + $0xa00] ss:$16 sps:$4 sm:$0xff]  }
  0x70   :  { %3782 = vmatpush2.bf16.msra.mxu1 %v5166_v5  ;;  %3742 = vmatprep.subr.bf16.mxu0 %v5171_v7  ;;  %v5244_v5 = vld [vmem:[%s7806_s1 + $0x9e4] ss:$16 sps:$4 sm:$0xff]  }
  0x71   :  { %3783 = vmatprep.subr.bf16.mxu1 %v5174_v8  ;;  %v5247_v7 = vld [vmem:[%s7806_s1 + $0xbe4] ss:$16 sps:$4 sm:$0xff]   ;;  %v5242_v8 = vld [vmem:[%s7806_s1 + $0x9e0] ss:$16 sps:$4 sm:$0xff]  }
  0x73   :  { %3743 = vmatpush2.bf16.msra.mxu0 %v5169_v9  ;;  %v5245_v9 = vld [vmem:[%s7806_s1 + $0xbe0] ss:$16 sps:$4 sm:$0xff]  }
  0x74   :  { %3784 = vmatpush2.bf16.msra.mxu1 %v5172_v10  ;;  %3744 = vmatprep.subr.bf16.mxu0 %v5177_v11  ;;  %v5250_v10 = vld [vmem:[%s7806_s1 + $0x9c4] ss:$16 sps:$4 sm:$0xff]  }
  0x75   :  { %3785 = vmatprep.subr.bf16.mxu1 %v5180_v12  ;;  %v5253_v11 = vld [vmem:[%s7806_s1 + $0xbc4] ss:$16 sps:$4 sm:$0xff]   ;;  %v5248_v12 = vld [vmem:[%s7806_s1 + $0x9c0] ss:$16 sps:$4 sm:$0xff]  }
  0x77   :  { %3745 = vmatpush2.bf16.msra.mxu0 %v5175_v14  ;;  %v5251_v14 = vld [vmem:[%s7806_s1 + $0xbc0] ss:$16 sps:$4 sm:$0xff]  }
  0x78   :  { %3786 = vmatpush2.bf16.msra.mxu1 %v5178_v15  ;;  %3746 = vmatprep.subr.bf16.mxu0 %v5183_v16  ;;  %v5256_v15 = vld [vmem:[%s7806_s1 + $0x9a4] ss:$16 sps:$4 sm:$0xff]  }
  0x79   :  { %3787 = vmatprep.subr.bf16.mxu1 %v5186_v19  ;;  %v5259_v16 = vld [vmem:[%s7806_s1 + $0xba4] ss:$16 sps:$4 sm:$0xff]   ;;  %v5254_v19 = vld [vmem:[%s7806_s1 + $0x9a0] ss:$16 sps:$4 sm:$0xff]  }
  0x7b   :  { %3747 = vmatpush2.bf16.msra.mxu0 %v5181_v20  ;;  %v5257_v20 = vld [vmem:[%s7806_s1 + $0xba0] ss:$16 sps:$4 sm:$0xff]  }
  0x7c   :  { %3788 = vmatpush2.bf16.msra.mxu1 %v5184_v21  ;;  %3748 = vmatprep.subr.bf16.mxu0 %v5189_v22  ;;  %v5262_v21 = vld [vmem:[%s7806_s1 + $0x984] ss:$16 sps:$4 sm:$0xff]  }
  0x7d   :  { %3789 = vmatprep.subr.bf16.mxu1 %v5192_v24  ;;  %v5265_v22 = vld [vmem:[%s7806_s1 + $0xb84] ss:$16 sps:$4 sm:$0xff]   ;;  %v5260_v24 = vld [vmem:[%s7806_s1 + $0x980] ss:$16 sps:$4 sm:$0xff]  }
  0x7f   :  { %3749 = vmatpush2.bf16.msra.mxu0 %v5187_v25  ;;  %v5263_v25 = vld [vmem:[%s7806_s1 + $0xb80] ss:$16 sps:$4 sm:$0xff]  }
  0x80   :  { %3790 = vmatpush2.bf16.msra.mxu1 %v5190_v27  ;;  %3800 = vmatprep.subr.bf16.mxu0 %v5196_v28  ;;  %v5268_v27 = vld [vmem:[%s7806_s1 + $0x964] ss:$16 sps:$4 sm:$0xff]  }
  0x81   :  { %3841 = vmatprep.subr.bf16.mxu1 %v5199_v29  ;;  %v5271_v28 = vld [vmem:[%s7806_s1 + $0xb64] ss:$16 sps:$4 sm:$0xff]   ;;  %v5266_v29 = vld [vmem:[%s7806_s1 + $0x960] ss:$16 sps:$4 sm:$0xff]  }
  0x82   :  { %3751 = vmatmul.mubr.bf16.vlgmr.msra.gmra.mxu0 %v6313_v26 }
  0x83   :  { %3792 = vmatmul.mubr.bf16.vlgmr.msra.gmra.mxu1 %v6326_v6  ;;  %3801 = vmatpush1.bf16.msra.mxu0 %v5194_v30  ;;  %v5269_v30 = vld [vmem:[%s7806_s1 + $0xb60] ss:$16 sps:$4 sm:$0xff]  }
  0x84   :  { %3842 = vmatpush1.bf16.msra.mxu1 %v5197_v31  ;;  %3802 = vmatprep.subr.bf16.mxu0 %v5202_v33  ;;  %v5274_v31 = vld [vmem:[%s7806_s1 + $0x944] ss:$16 sps:$4 sm:$0xff]  }
  0x85   :  { %3843 = vmatprep.subr.bf16.mxu1 %v5205_v34  ;;  %3832 = vmatprep.mubr.bf16.mxu0 %v6366_v41  ;;  %v5277_v33 = vld [vmem:[%s7806_s1 + $0xb44] ss:$16 sps:$4 sm:$0xff]   ;;  %v667_v34 = vcombine.high %v6337_v32, %v6337_v32 }
  0x86   :  { %3873 = vmatprep.mubr.bf16.mxu1 %v6371_v43  ;;  %v5283_v32 = vld [vmem:[%s7806_s1 + $0xb24] ss:$16 sps:$4 sm:$0xff]  }
  0x87   :  { %3803 = vmatpush1.bf16.msra.mxu0 %v5200_v37  ;;  %v5275_v37 = vld [vmem:[%s7806_s1 + $0xb40] ss:$16 sps:$4 sm:$0xff]  }
  0x88   :  { %3844 = vmatpush1.bf16.msra.mxu1 %v5203_v38  ;;  %3804 = vmatprep.subr.bf16.mxu0 %v5208_v39  ;;  %v5280_v38 = vld [vmem:[%s7806_s1 + $0x924] ss:$16 sps:$4 sm:$0xff]   ;;  %v6521_v39 = vrot.slane %v667_v34, %v6024_v49  ;;  %v5341_v34 = vld [vmem:[%s7806_s1 + $0xfe0] ss:$16 sps:$4 sm:$0xff]  }
  0x89   :  { %3845 = vmatprep.subr.bf16.mxu1 %v5211_v40  ;;  %v5278_v40 = vld [vmem:[%s7806_s1 + $0x920] ss:$16 sps:$4 sm:$0xff]  }
  0x8b   :  { %3805 = vmatpush1.bf16.msra.mxu0 %v5206_v44  ;;  %v5281_v44 = vld [vmem:[%s7806_s1 + $0xb20] ss:$16 sps:$4 sm:$0xff]  }
  0x8c   :  { %3846 = vmatpush1.bf16.msra.mxu1 %v5209_v45  ;;  %3806 = vmatprep.subr.bf16.mxu0 %v5214_v46  ;;  %v5286_v45 = vld [vmem:[%s7806_s1 + $0x904] ss:$16 sps:$4 sm:$0xff]  }
  0x8d   :  { %3847 = vmatprep.subr.bf16.mxu1 %v5217_v47  ;;  %v5289_v46 = vld [vmem:[%s7806_s1 + $0xb04] ss:$16 sps:$4 sm:$0xff]   ;;  %v683_v47 = vcombine.high %v6521_v39, %v6521_v39 }
  0x8f   :  { %3807 = vmatpush1.bf16.msra.mxu0 %v5212_v48  ;;  %v5284_v48 = vld [vmem:[%s7806_s1 + $0x900] ss:$16 sps:$4 sm:$0xff]  }
  0x90   :  { %3848 = vmatpush1.bf16.msra.mxu1 %v5215_v50  ;;  %3808 = vmatprep.subr.bf16.mxu0 %v5220_v51  ;;  %v6542_v50 = vrot.slane %v6347_v35, %v6024_v49  ;;  %v5287_v51 = vld [vmem:[%s7806_s1 + $0xb00] ss:$16 sps:$4 sm:$0xff]  }
  0x91   :  { %3849 = vmatprep.subr.bf16.mxu1 %v5223_v52  ;;  %v5292_v52 = vld [vmem:[%s7806_s1 + $0xce4] ss:$16 sps:$4 sm:$0xff]  }
  0x92   :  { %v6558_v35 = vcombine.high %v6542_v50, %v6542_v50 }
  0x93   :  { %3809 = vmatpush1.bf16.msra.mxu0 %v5218_v53  ;;  %v5295_v53 = vld [vmem:[%s7806_s1 + $0xee4] ss:$16 sps:$4 sm:$0xff]  }
  0x94   :  { %3850 = vmatpush1.bf16.msra.mxu1 %v5221_v54  ;;  %3810 = vmatprep.subr.bf16.mxu0 %v5226_v55  ;;  %v6554_v54 = vrot.slane %v683_v47, %v6024_v49  ;;  %v5290_v55 = vld [vmem:[%s7806_s1 + $0xce0] ss:$16 sps:$4 sm:$0xff]   ;;  %v5358_v47 = vld [vmem:[%s7806_s1 + $0xd84] ss:$16 sps:$4 sm:$0xff]  }
  0x95   :  { %3851 = vmatprep.subr.bf16.mxu1 %v5229_v56  ;;  %v5293_v56 = vld [vmem:[%s7806_s1 + $0xee0] ss:$16 sps:$4 sm:$0xff]  }
  0x97   :  { %3811 = vmatpush1.bf16.msra.mxu0 %v5224_v57  ;;  %v5298_v57 = vld [vmem:[%s7806_s1 + $0xcc4] ss:$16 sps:$4 sm:$0xff]  }
  0x98   :  { %3852 = vmatpush1.bf16.msra.mxu1 %v5227_v58  ;;  %3812 = vmatprep.subr.bf16.mxu0 %v5232_v59  ;;  %v5301_v58 = vld [vmem:[%s7806_s1 + $0xec4] ss:$16 sps:$4 sm:$0xff]   ;;  %v6574_v59 = vcombine.high %v6554_v54, %v6554_v54 }
  0x99   :  { %3853 = vmatprep.subr.bf16.mxu1 %v5235_v61  ;;  %v5296_v61 = vld [vmem:[%s7806_s1 + $0xcc0] ss:$16 sps:$4 sm:$0xff]  }
  0x9b   :  { %3813 = vmatpush1.bf16.msra.mxu0 %v5230_v62  ;;  %v5299_v62 = vld [vmem:[%s7806_s1 + $0xec0] ss:$16 sps:$4 sm:$0xff]  }
  0x9c   :  { %3854 = vmatpush1.bf16.msra.mxu1 %v5233_v63  ;;  %3814 = vmatprep.subr.bf16.mxu0 %v5238_v1  ;;  %v5304_v63 = vld [vmem:[%s7806_s1 + $0xca4] ss:$16 sps:$4 sm:$0xff]  }
  0x9d   :  { %3855 = vmatprep.subr.bf16.mxu1 %v5241_v2  ;;  %v5307_v1 = vld [vmem:[%s7806_s1 + $0xea4] ss:$16 sps:$4 sm:$0xff]   ;;  %v5302_v2 = vld [vmem:[%s7806_s1 + $0xca0] ss:$16 sps:$4 sm:$0xff]  }
  0x9f   :  { %3815 = vmatpush1.bf16.msra.mxu0 %v5236_v3  ;;  %v5305_v3 = vld [vmem:[%s7806_s1 + $0xea0] ss:$16 sps:$4 sm:$0xff]  }
  0xa0   :  { %3856 = vmatpush1.bf16.msra.mxu1 %v5239_v4  ;;  %3816 = vmatprep.subr.bf16.mxu0 %v5244_v5  ;;  %v5310_v4 = vld [vmem:[%s7806_s1 + $0xc84] ss:$16 sps:$4 sm:$0xff]  }
  0xa1   :  { %3857 = vmatprep.subr.bf16.mxu1 %v5247_v7  ;;  %v5313_v5 = vld [vmem:[%s7806_s1 + $0xe84] ss:$16 sps:$4 sm:$0xff]   ;;  %v5308_v7 = vld [vmem:[%s7806_s1 + $0xc80] ss:$16 sps:$4 sm:$0xff]  }
  0xa3   :  { %3817 = vmatpush2.bf16.msra.mxu0 %v5242_v8  ;;  %v5311_v8 = vld [vmem:[%s7806_s1 + $0xe80] ss:$16 sps:$4 sm:$0xff]  }
  0xa4   :  { %3858 = vmatpush2.bf16.msra.mxu1 %v5245_v9  ;;  %3818 = vmatprep.subr.bf16.mxu0 %v5250_v10  ;;  %v5316_v9 = vld [vmem:[%s7806_s1 + $0xc64] ss:$16 sps:$4 sm:$0xff]  }
  0xa5   :  { %3859 = vmatprep.subr.bf16.mxu1 %v5253_v11  ;;  %v5319_v10 = vld [vmem:[%s7806_s1 + $0xe64] ss:$16 sps:$4 sm:$0xff]   ;;  %v5314_v11 = vld [vmem:[%s7806_s1 + $0xc60] ss:$16 sps:$4 sm:$0xff]  }
  0xa7   :  { %3819 = vmatpush2.bf16.msra.mxu0 %v5248_v12  ;;  %v5317_v12 = vld [vmem:[%s7806_s1 + $0xe60] ss:$16 sps:$4 sm:$0xff]  }
  0xa8   :  { %3860 = vmatpush2.bf16.msra.mxu1 %v5251_v14  ;;  %3820 = vmatprep.subr.bf16.mxu0 %v5256_v15  ;;  %v5322_v14 = vld [vmem:[%s7806_s1 + $0xc44] ss:$16 sps:$4 sm:$0xff]  }
  0xa9   :  { %3861 = vmatprep.subr.bf16.mxu1 %v5259_v16  ;;  %v5325_v15 = vld [vmem:[%s7806_s1 + $0xe44] ss:$16 sps:$4 sm:$0xff]   ;;  %v5320_v16 = vld [vmem:[%s7806_s1 + $0xc40] ss:$16 sps:$4 sm:$0xff]  }
  0xab   :  { %3821 = vmatpush2.bf16.msra.mxu0 %v5254_v19  ;;  %v5323_v19 = vld [vmem:[%s7806_s1 + $0xe40] ss:$16 sps:$4 sm:$0xff]  }
  0xac   :  { %3862 = vmatpush2.bf16.msra.mxu1 %v5257_v20  ;;  %3822 = vmatprep.subr.bf16.mxu0 %v5262_v21  ;;  %v5328_v20 = vld [vmem:[%s7806_s1 + $0xc24] ss:$16 sps:$4 sm:$0xff]  }
  0xad   :  { %3863 = vmatprep.subr.bf16.mxu1 %v5265_v22  ;;  %v5331_v21 = vld [vmem:[%s7806_s1 + $0xe24] ss:$16 sps:$4 sm:$0xff]   ;;  %v5326_v22 = vld [vmem:[%s7806_s1 + $0xc20] ss:$16 sps:$4 sm:$0xff]  }
  0xaf   :  { %3823 = vmatpush2.bf16.msra.mxu0 %v5260_v24  ;;  %v5329_v24 = vld [vmem:[%s7806_s1 + $0xe20] ss:$16 sps:$4 sm:$0xff]  }
  0xb0   :  { %3864 = vmatpush2.bf16.msra.mxu1 %v5263_v25  ;;  %3824 = vmatprep.subr.bf16.mxu0 %v5268_v27  ;;  %v5334_v25 = vld [vmem:[%s7806_s1 + $0xc04] ss:$16 sps:$4 sm:$0xff]  }
  0xb1   :  { %3865 = vmatprep.subr.bf16.mxu1 %v5271_v28  ;;  %v5337_v27 = vld [vmem:[%s7806_s1 + $0xe04] ss:$16 sps:$4 sm:$0xff]   ;;  %v5332_v28 = vld [vmem:[%s7806_s1 + $0xc00] ss:$16 sps:$4 sm:$0xff]  }
  0xb3   :  { %3825 = vmatpush2.bf16.msra.mxu0 %v5266_v29  ;;  %v5335_v29 = vld [vmem:[%s7806_s1 + $0xe00] ss:$16 sps:$4 sm:$0xff]  }
  0xb4   :  { %3866 = vmatpush2.bf16.msra.mxu1 %v5269_v30  ;;  %3826 = vmatprep.subr.bf16.mxu0 %v5274_v31  ;;  %v5340_v30 = vld [vmem:[%s7806_s1 + $0xde4] ss:$16 sps:$4 sm:$0xff]  }
  0xb5   :  { %3867 = vmatprep.subr.bf16.mxu1 %v5277_v33  ;;  %v5343_v31 = vld [vmem:[%s7806_s1 + $0xfe4] ss:$16 sps:$4 sm:$0xff]   ;;  %v5338_v33 = vld [vmem:[%s7806_s1 + $0xde0] ss:$16 sps:$4 sm:$0xff]  }
  0xb7   :  { %3827 = vmatpush2.bf16.msra.mxu0 %v5272_v36  ;;  %v5346_v36 = vld [vmem:[%s7806_s1 + $0xdc4] ss:$16 sps:$4 sm:$0xff]  }
  0xb8   :  { %3868 = vmatpush2.bf16.msra.mxu1 %v5275_v37  ;;  %3828 = vmatprep.subr.bf16.mxu0 %v5280_v38  ;;  %v5349_v37 = vld [vmem:[%s7806_s1 + $0xfc4] ss:$16 sps:$4 sm:$0xff]   ;;  %v5344_v38 = vld [vmem:[%s7806_s1 + $0xdc0] ss:$16 sps:$4 sm:$0xff]  }
  0xb9   :  { %3869 = vmatprep.subr.bf16.mxu1 %v5283_v32  ;;  %v5347_v32 = vld [vmem:[%s7806_s1 + $0xfc0] ss:$16 sps:$4 sm:$0xff]  }
  0xbb   :  { %3829 = vmatpush2.bf16.msra.mxu0 %v5278_v40  ;;  %v5352_v40 = vld [vmem:[%s7806_s1 + $0xda4] ss:$16 sps:$4 sm:$0xff]  }
  0xbc   :  { %3870 = vmatpush2.bf16.msra.mxu1 %v5281_v44  ;;  %3830 = vmatprep.subr.bf16.mxu0 %v5286_v45  ;;  %v5355_v44 = vld [vmem:[%s7806_s1 + $0xfa4] ss:$16 sps:$4 sm:$0xff]   ;;  %v5350_v45 = vld [vmem:[%s7806_s1 + $0xda0] ss:$16 sps:$4 sm:$0xff]  }
  0xbd   :  { %3871 = vmatprep.subr.bf16.mxu1 %v5289_v46  ;;  %v5353_v46 = vld [vmem:[%s7806_s1 + $0xfa0] ss:$16 sps:$4 sm:$0xff]  }
  0xbf   :  { %3831 = vmatpush2.bf16.msra.mxu0 %v5284_v48  ;;  %v5361_v48 = vld [vmem:[%s7806_s1 + $0xf84] ss:$16 sps:$4 sm:$0xff]  }
  0xc0   :  { %3872 = vmatpush2.bf16.msra.mxu1 %v5287_v51  ;;  %3882 = vmatprep.subr.bf16.mxu0 %v5292_v52  ;;  %v5356_v51 = vld [vmem:[%s7806_s1 + $0xd80] ss:$16 sps:$4 sm:$0xff]  }
  0xc1   :  { %3923 = vmatprep.subr.bf16.mxu1 %v5295_v53  ;;  %v5359_v52 = vld [vmem:[%s7806_s1 + $0xf80] ss:$16 sps:$4 sm:$0xff]   ;;  %v5364_v53 = vld [vmem:[%s7806_s1 + $0xd64] ss:$16 sps:$4 sm:$0xff]  }
  0xc2   :  { %3833 = vmatmul.mubr.bf16.vlgmr.msra.gmra.mxu0 %v6542_v50 }
  0xc3   :  { %3874 = vmatmul.mubr.bf16.vlgmr.msra.gmra.mxu1 %v6558_v35  ;;  %3883 = vmatpush1.bf16.msra.mxu0 %v5290_v55  ;;  %v5367_v55 = vld [vmem:[%s7806_s1 + $0xf64] ss:$16 sps:$4 sm:$0xff]  }
  0xc4   :  { %3924 = vmatpush1.bf16.msra.mxu1 %v5293_v56  ;;  %3884 = vmatprep.subr.bf16.mxu0 %v5298_v57  ;;  %v5362_v56 = vld [vmem:[%s7806_s1 + $0xd60] ss:$16 sps:$4 sm:$0xff]  }
  0xc5   :  { %3925 = vmatprep.subr.bf16.mxu1 %v5301_v58  ;;  %3914 = vmatprep.mubr.bf16.mxu0 %v6554_v54  ;;  %v5365_v57 = vld [vmem:[%s7806_s1 + $0xf60] ss:$16 sps:$4 sm:$0xff]   ;;  %v5370_v58 = vld [vmem:[%s7806_s1 + $0xd44] ss:$16 sps:$4 sm:$0xff]  }
  0xc6   :  { %3955 = vmatprep.mubr.bf16.mxu1 %v6574_v59 }
  0xc7   :  { %3885 = vmatpush1.bf16.msra.mxu0 %v5296_v61  ;;  %v5373_v61 = vld [vmem:[%s7806_s1 + $0xf44] ss:$16 sps:$4 sm:$0xff]  }
  0xc8   :  { %3926 = vmatpush1.bf16.msra.mxu1 %v5299_v62  ;;  %3886 = vmatprep.subr.bf16.mxu0 %v5304_v63  ;;  %v5368_v62 = vld [vmem:[%s7806_s1 + $0xd40] ss:$16 sps:$4 sm:$0xff]  }
  0xc9   :  { %3927 = vmatprep.subr.bf16.mxu1 %v5307_v1  ;;  %v5371_v63 = vld [vmem:[%s7806_s1 + $0xf40] ss:$16 sps:$4 sm:$0xff]   ;;  %v5376_v1 = vld [vmem:[%s7806_s1 + $0xd24] ss:$16 sps:$4 sm:$0xff]  }
  0xcb   :  { %3887 = vmatpush1.bf16.msra.mxu0 %v5302_v2  ;;  %v5379_v2 = vld [vmem:[%s7806_s1 + $0xf24] ss:$16 sps:$4 sm:$0xff]  }
  0xcc   :  { %3928 = vmatpush1.bf16.msra.mxu1 %v5305_v3  ;;  %3888 = vmatprep.subr.bf16.mxu0 %v5310_v4  ;;  %v5374_v3 = vld [vmem:[%s7806_s1 + $0xd20] ss:$16 sps:$4 sm:$0xff]  }
  0xcd   :  { %3929 = vmatprep.subr.bf16.mxu1 %v5313_v5  ;;  %v5377_v4 = vld [vmem:[%s7806_s1 + $0xf20] ss:$16 sps:$4 sm:$0xff]   ;;  %v5382_v5 = vld [vmem:[%s7806_s1 + $0xd04] ss:$16 sps:$4 sm:$0xff]  }
  0xcf   :  { %3889 = vmatpush1.bf16.msra.mxu0 %v5308_v7  ;;  %v5385_v7 = vld [vmem:[%s7806_s1 + $0xf04] ss:$16 sps:$4 sm:$0xff]  }
  0xd0   :  { %3930 = vmatpush1.bf16.msra.mxu1 %v5311_v8  ;;  %3890 = vmatprep.subr.bf16.mxu0 %v5316_v9  ;;  %v5380_v8 = vld [vmem:[%s7806_s1 + $0xd00] ss:$16 sps:$4 sm:$0xff]  }
  0xd1   :  { %3931 = vmatprep.subr.bf16.mxu1 %v5319_v10  ;;  %v5383_v9 = vld [vmem:[%s7806_s1 + $0xf00] ss:$16 sps:$4 sm:$0xff]   ;;  %v6756_v10 = vrot.slane %v6521_v39, %v6024_v49  ;;  %v5389_v39 = vld [vmem:[%s7806_s1 + $0x10e4] ss:$16 sps:$4 sm:$0xff]  }
  0xd3   :  { %3891 = vmatpush1.bf16.msra.mxu0 %v5314_v11  ;;  %v6761_v11 = vld.sshfl [vmem:[%s7807_s0 + $0x10] sm:$0x11 pattern:$0x75316420] }
  0xd4   :  { %3932 = vmatpush1.bf16.msra.mxu1 %v5317_v12  ;;  %3892 = vmatprep.subr.bf16.mxu0 %v5322_v14  ;;  %v593_v12 = vld [vmem:[%s7808_s2] sm:$0xf]  ;;  %v597_v14 = vsub.s32 0, %v6006_v42 }
  0xd5   :  { %3933 = vmatprep.subr.bf16.mxu1 %v5325_v15  ;;  %v5392_v15 = vld [vmem:[%s7806_s1 + $0xec] ss:$16 sps:$4 sm:$0xff]  }
  0xd7   :  { %3893 = vmatpush1.bf16.msra.mxu0 %v5320_v16  ;;  %v601_v16 = vsub.s32 1, %v6006_v42 }
  0xd8   :  { %3934 = vmatpush1.bf16.msra.mxu1 %v5323_v19  ;;  %3894 = vmatprep.subr.bf16.mxu0 %v5328_v20  ;;  %v723_v19 = vcombine.high %v6761_v11, %v6761_v11  ;;  %v6778_v20 = vcombine.high %v6756_v10, %v6756_v10 }
  0xd9   :  { %3935 = vmatprep.subr.bf16.mxu1 %v5331_v21  ;;  %v5387_v21 = vld [vmem:[%s7806_s1 + $0x10e0] ss:$16 sps:$4 sm:$0xff]  }
  0xdb   :  { %3895 = vmatpush1.bf16.msra.mxu0 %v5326_v22  ;;  %v598_v22 = vrot.slane %v593_v12, %v597_v14  ;;  %v5431_v14 = vld [vmem:[%s7806_s1 + $0x1004] ss:$16 sps:$4 sm:$0xff]  }
  0xdc   :  { %3936 = vmatpush1.bf16.msra.mxu1 %v5329_v24  ;;  %3896 = vmatprep.subr.bf16.mxu0 %v5334_v25  ;;  %v5390_v24 = vld [vmem:[%s7806_s1 + $0xe8] ss:$16 sps:$4 sm:$0xff]   ;;  %v5395_v25 = vld [vmem:[%s7806_s1 + $0x10c4] ss:$16 sps:$4 sm:$0xff]  }
  0xdd   :  { %3937 = vmatprep.subr.bf16.mxu1 %v5337_v27  ;;  %v5398_v27 = vld [vmem:[%s7806_s1 + $0xcc] ss:$16 sps:$4 sm:$0xff]  }
  0xdf   :  { %3897 = vmatpush1.bf16.msra.mxu0 %v5332_v28  ;;  %v602_v28 = vrot.slane %v593_v12, %v601_v16  ;;  %v5426_v12 = vld [vmem:[%s7806_s1 + $0x28] ss:$16 sps:$4 sm:$0xff]  }
  0xe0   :  { %3938 = vmatpush1.bf16.msra.mxu1 %v5335_v29  ;;  %3898 = vmatprep.subr.bf16.mxu0 %v5340_v30  ;;  %v5393_v29 = vld [vmem:[%s7806_s1 + $0x10c0] ss:$16 sps:$4 sm:$0xff]   ;;  %v6796_v30 = vrot.slane %v723_v19, %v6024_v49  ;;  %v5432_v16 = vld [vmem:[%s7806_s1 + $0x8] ss:$16 sps:$4 sm:$0xff]   ;;  %v5437_v19 = vld [vmem:[%s7806_s1 + $0x11e4] ss:$16 sps:$4 sm:$0xff]  }
  0xe1   :  { %3939 = vmatprep.subr.bf16.mxu1 %v5343_v31 }
  0xe3   :  { %3899 = vmatpush2.bf16.msra.mxu0 %v5338_v33 }
  0xe4   :  { %3940 = vmatpush2.bf16.msra.mxu1 %v5341_v34  ;;  %3900 = vmatprep.subr.bf16.mxu0 %v5346_v36  ;;  %v5396_v34 = vld [vmem:[%s7806_s1 + $0xc8] ss:$16 sps:$4 sm:$0xff]  }
  0xe5   :  { %3941 = vmatprep.subr.bf16.mxu1 %v5349_v37  ;;  %v5401_v37 = vld [vmem:[%s7806_s1 + $0x10a4] ss:$16 sps:$4 sm:$0xff]  }
  0xe7   :  { %3901 = vmatpush2.bf16.msra.mxu0 %v5344_v38 }
  0xe8   :  { %3942 = vmatpush2.bf16.msra.mxu1 %v5347_v32  ;;  %3902 = vmatprep.subr.bf16.mxu0 %v5352_v40  ;;  %v5404_v40 = vld [vmem:[%s7806_s1 + $0xac] ss:$16 sps:$4 sm:$0xff]  }
  0xe9   :  { %3943 = vmatprep.subr.bf16.mxu1 %v5355_v44 }
  0xeb   :  { %3903 = vmatpush2.bf16.msra.mxu0 %v5350_v45 }
  0xec   :  { %3944 = vmatpush2.bf16.msra.mxu1 %v5353_v46  ;;  %3904 = vmatprep.subr.bf16.mxu0 %v5358_v47  ;;  %v5399_v46 = vld [vmem:[%s7806_s1 + $0x10a0] ss:$16 sps:$4 sm:$0xff]   ;;  %v5402_v47 = vld [vmem:[%s7806_s1 + $0xa8] ss:$16 sps:$4 sm:$0xff]  }
  0xed   :  { %3945 = vmatprep.subr.bf16.mxu1 %v5361_v48 }
  0xef   :  { %3905 = vmatpush2.bf16.msra.mxu0 %v5356_v51 }
  0xf0   :  { %3946 = vmatpush2.bf16.msra.mxu1 %v5359_v52  ;;  %3906 = vmatprep.subr.bf16.mxu0 %v5364_v53 }
  0xf1   :  { %3947 = vmatprep.subr.bf16.mxu1 %v5367_v55 }
  0xf3   :  { %3907 = vmatpush2.bf16.msra.mxu0 %v5362_v56  ;;  %v5407_v56 = vld [vmem:[%s7806_s1 + $0x1084] ss:$16 sps:$4 sm:$0xff]  }
  0xf4   :  { %3948 = vmatpush2.bf16.msra.mxu1 %v5365_v57  ;;  %3908 = vmatprep.subr.bf16.mxu0 %v5370_v58  ;;  %v5410_v57 = vld [vmem:[%s7806_s1 + $0x8c] ss:$16 sps:$4 sm:$0xff]   ;;  %v5408_v58 = vld [vmem:[%s7806_s1 + $0x88] ss:$16 sps:$4 sm:$0xff]  }
  0xf5   :  { %3949 = vmatprep.subr.bf16.mxu1 %v5373_v61  ;;  %v5413_v61 = vld [vmem:[%s7806_s1 + $0x1064] ss:$16 sps:$4 sm:$0xff]  }
  0xf7   :  { %3909 = vmatpush2.bf16.msra.mxu0 %v5368_v62  ;;  %v5416_v62 = vld [vmem:[%s7806_s1 + $0x6c] ss:$16 sps:$4 sm:$0xff]  }
  0xf8   :  { %3950 = vmatpush2.bf16.msra.mxu1 %v5371_v63  ;;  %3910 = vmatprep.subr.bf16.mxu0 %v5376_v1  ;;  %v5411_v63 = vld [vmem:[%s7806_s1 + $0x1060] ss:$16 sps:$4 sm:$0xff]   ;;  %v5414_v1 = vld [vmem:[%s7806_s1 + $0x68] ss:$16 sps:$4 sm:$0xff]  }
  0xf9   :  { %3951 = vmatprep.subr.bf16.mxu1 %v5379_v2  ;;  %v5419_v2 = vld [vmem:[%s7806_s1 + $0x1044] ss:$16 sps:$4 sm:$0xff]  }
  0xfb   :  { %3911 = vmatpush2.bf16.msra.mxu0 %v5374_v3  ;;  %v5422_v3 = vld [vmem:[%s7806_s1 + $0x4c] ss:$16 sps:$4 sm:$0xff]  }
  0xfc   :  { %3952 = vmatpush2.bf16.msra.mxu1 %v5377_v4  ;;  %3912 = vmatprep.subr.bf16.mxu0 %v5382_v5  ;;  %v5417_v4 = vld [vmem:[%s7806_s1 + $0x1040] ss:$16 sps:$4 sm:$0xff]   ;;  %v5420_v5 = vld [vmem:[%s7806_s1 + $0x48] ss:$16 sps:$4 sm:$0xff]  }
  0xfd   :  { %3953 = vmatprep.subr.bf16.mxu1 %v5385_v7  ;;  %v5425_v7 = vld [vmem:[%s7806_s1 + $0x1024] ss:$16 sps:$4 sm:$0xff]  }
  0xff   :  { %3913 = vmatpush2.bf16.msra.mxu0 %v5380_v8  ;;  %v5428_v8 = vld [vmem:[%s7806_s1 + $0x2c] ss:$16 sps:$4 sm:$0xff]  }
 0x100   :  { %3954 = vmatpush2.bf16.msra.mxu1 %v5383_v9  ;;  %3964 = vmatprep.subr.bf16.mxu0 %v5389_v39  ;;  %v5423_v9 = vld [vmem:[%s7806_s1 + $0x1020] ss:$16 sps:$4 sm:$0xff]   ;;  %v5434_v39 = vld [vmem:[%s7806_s1 + $0xc] ss:$16 sps:$4 sm:$0xff]  }
 0x101   :  { %4005 = vmatprep.subr.bf16.mxu1 %v5392_v15  ;;  %v5429_v15 = vld [vmem:[%s7806_s1 + $0x1000] ss:$16 sps:$4 sm:$0xff]  }
 0x102   :  { %v3670_v31 = vpop.f32.mrf.mxu0  ;;  %3915 = vmatmul.mubr.bf16.vlgmr.msra.gmra.mxu0 %v6756_v10 }
 0x103   :  { %v3711_v33 = vpop.f32.mrf.mxu1  ;;  %3956 = vmatmul.mubr.bf16.vlgmr.msra.gmra.mxu1 %v6778_v20  ;;  %v3671_v36 = vadd.f32 %v3670_v31, %v598_v22  ;;  %3965 = vmatpush1.bf16.msra.mxu0 %v5387_v21  ;;  %v5440_v21 = vld [vmem:[%s7806_s1 + $0x1ec] ss:$16 sps:$4 sm:$0xff]   ;;  %v5435_v22 = vld [vmem:[%s7806_s1 + $0x11e0] ss:$16 sps:$4 sm:$0xff]   ;;  %v5449_v31 = vld [vmem:[%s7806_s1 + $0x11a4] ss:$16 sps:$4 sm:$0xff]  }
 0x104   :  { %4006 = vmatpush1.bf16.msra.mxu1 %v5390_v24  ;;  %v3672_v38 = vpop.f32.mrf.mxu0  ;;  %3966 = vmatprep.subr.bf16.mxu0 %v5395_v25  ;;  %v5438_v24 = vld [vmem:[%s7806_s1 + $0x1e8] ss:$16 sps:$4 sm:$0xff]   ;;  %v5443_v25 = vld [vmem:[%s7806_s1 + $0x11c4] ss:$16 sps:$4 sm:$0xff]  }
 0x105   :  { %v3713_v32 = vpop.f32.mrf.mxu1  ;;  %4007 = vmatprep.subr.bf16.mxu1 %v5398_v27  ;;  %v6809_v44 = vadd.f32 %v3711_v33, %v3671_v36  ;;  %v3673_v45 = vadd.f32 %v3672_v38, %v602_v28  ;;  %3996 = vmatprep.mubr.bf16.mxu0 %v6796_v30  ;;  %v5446_v27 = vld [vmem:[%s7806_s1 + $0x1cc] ss:$16 sps:$4 sm:$0xff]   ;;  %v5441_v28 = vld [vmem:[%s7806_s1 + $0x11c0] ss:$16 sps:$4 sm:$0xff]   ;;  %v5450_v36 = vld [vmem:[%s7806_s1 + $0x1a8] ss:$16 sps:$4 sm:$0xff]  }
 0x106   :  { %4037 = vmatprep.mubr.bf16.mxu1 %v6052_v60  ;;  %v3674_v48 = vpop.f32.mrf.mxu0  ;;  %v5405_v60 = vld [vmem:[%s7806_s1 + $0x1080] ss:$16 sps:$4 sm:$0xff]   ;;  %v5452_v33 = vld [vmem:[%s7806_s1 + $0x1ac] ss:$16 sps:$4 sm:$0xff]  }
 0x107   :  { %v3715_v51 = vpop.f32.mrf.mxu1  ;;  %v6819_v52 = vadd.f32 %v3713_v32, %v3673_v45  ;;  %3967 = vmatpush1.bf16.msra.mxu0 %v5393_v29  ;;  %v5444_v29 = vld [vmem:[%s7806_s1 + $0x1c8] ss:$16 sps:$4 sm:$0xff]   ;;  %v5458_v38 = vld [vmem:[%s7806_s1 + $0x18c] ss:$16 sps:$4 sm:$0xff]   ;;  %v5453_v32 = vld [vmem:[%s7806_s1 + $0x1180] ss:$16 sps:$4 sm:$0xff]  }
 0x108   :  { %4008 = vmatpush1.bf16.msra.mxu1 %v5396_v34  ;;  %v3675_v53 = vpop.f32.mrf.mxu0  ;;  %3968 = vmatprep.subr.bf16.mxu0 %v5401_v37  ;;  %v5447_v34 = vld [vmem:[%s7806_s1 + $0x11a0] ss:$16 sps:$4 sm:$0xff]   ;;  %v5455_v37 = vld [vmem:[%s7806_s1 + $0x1184] ss:$16 sps:$4 sm:$0xff]   ;;  %v5462_v48 = vld [vmem:[%s7806_s1 + $0x168] ss:$16 sps:$4 sm:$0xff]  }
 0x109   :  { %v3716_v55 = vpop.f32.mrf.mxu1  ;;  %4009 = vmatprep.subr.bf16.mxu1 %v5404_v40  ;;  %v5456_v40 = vld [vmem:[%s7806_s1 + $0x188] ss:$16 sps:$4 sm:$0xff]   ;;  %v5461_v45 = vld [vmem:[%s7806_s1 + $0x1164] ss:$16 sps:$4 sm:$0xff]   ;;  %v5470_v53 = vld [vmem:[%s7806_s1 + $0x14c] ss:$16 sps:$4 sm:$0xff]  }
 0x10a   :  { %v5467_v51 = vld [vmem:[%s7806_s1 + $0x1144] ss:$16 sps:$4 sm:$0xff]   ;;  %v5465_v55 = vld [vmem:[%s7806_s1 + $0x1140] ss:$16 sps:$4 sm:$0xff]  }
 0x10b   :  { %3969 = vmatpush1.bf16.msra.mxu0 %v5399_v46  ;;  %v5464_v46 = vld [vmem:[%s7806_s1 + $0x16c] ss:$16 sps:$4 sm:$0xff]  }
 0x10c   :  { %4010 = vmatpush1.bf16.msra.mxu1 %v5402_v47  ;;  %3970 = vmatprep.subr.bf16.mxu0 %v5407_v56  ;;  %v5459_v47 = vld [vmem:[%s7806_s1 + $0x1160] ss:$16 sps:$4 sm:$0xff]   ;;  %v5468_v56 = vld [vmem:[%s7806_s1 + $0x148] ss:$16 sps:$4 sm:$0xff]  }
 0x10d   :  { %4011 = vmatprep.subr.bf16.mxu1 %v5410_v57  ;;  %v5473_v57 = vld [vmem:[%s7806_s1 + $0x1124] ss:$16 sps:$4 sm:$0xff]  }
 0x10f   :  { %3971 = vmatpush1.bf16.msra.mxu0 %v5405_v60  ;;  %v5476_v60 = vld [vmem:[%s7806_s1 + $0x12c] ss:$16 sps:$4 sm:$0xff]  }
 0x110   :  { %4012 = vmatpush1.bf16.msra.mxu1 %v5408_v58  ;;  %3972 = vmatprep.subr.bf16.mxu0 %v5413_v61  ;;  %v5471_v58 = vld [vmem:[%s7806_s1 + $0x1120] ss:$16 sps:$4 sm:$0xff]   ;;  %v5474_v61 = vld [vmem:[%s7806_s1 + $0x128] ss:$16 sps:$4 sm:$0xff]  }
 0x111   :  { %4013 = vmatprep.subr.bf16.mxu1 %v5416_v62  ;;  %v5479_v62 = vld [vmem:[%s7806_s1 + $0x1104] ss:$16 sps:$4 sm:$0xff]  }
 0x113   :  { %3973 = vmatpush1.bf16.msra.mxu0 %v5411_v63  ;;  %v5482_v63 = vld [vmem:[%s7806_s1 + $0x10c] ss:$16 sps:$4 sm:$0xff]  }
 0x114   :  { %4014 = vmatpush1.bf16.msra.mxu1 %v5414_v1  ;;  %3974 = vmatprep.subr.bf16.mxu0 %v5419_v2  ;;  %v5477_v1 = vld [vmem:[%s7806_s1 + $0x1100] ss:$16 sps:$4 sm:$0xff]   ;;  %v5480_v2 = vld [vmem:[%s7806_s1 + $0x108] ss:$16 sps:$4 sm:$0xff]  }
 0x115   :  { %4015 = vmatprep.subr.bf16.mxu1 %v5422_v3  ;;  %v5485_v3 = vld [vmem:[%s7806_s1 + $0x2ec] ss:$16 sps:$4 sm:$0xff]  }
 0x117   :  { %3975 = vmatpush1.bf16.msra.mxu0 %v5417_v4  ;;  %v5488_v4 = vld [vmem:[%s7806_s1 + $0x4ec] ss:$16 sps:$4 sm:$0xff]  }
 0x118   :  { %4016 = vmatpush1.bf16.msra.mxu1 %v5420_v5  ;;  %3976 = vmatprep.subr.bf16.mxu0 %v5425_v7  ;;  %v5483_v5 = vld [vmem:[%s7806_s1 + $0x2e8] ss:$16 sps:$4 sm:$0xff]  }
 0x119   :  { %4017 = vmatprep.subr.bf16.mxu1 %v5428_v8  ;;  %v5486_v7 = vld [vmem:[%s7806_s1 + $0x4e8] ss:$16 sps:$4 sm:$0xff]   ;;  %v6991_v8 = vrot.slane %v6761_v11, %v6024_v49 }
 0x11a   :  { %v5492_v11 = vld [vmem:[%s7806_s1 + $0x4c8] ss:$16 sps:$4 sm:$0xff]  }
 0x11b   :  { %3977 = vmatpush1.bf16.msra.mxu0 %v5423_v9  ;;  %v5491_v9 = vld [vmem:[%s7806_s1 + $0x2cc] ss:$16 sps:$4 sm:$0xff]  }
 0x11c   :  { %4018 = vmatpush1.bf16.msra.mxu1 %v5426_v12  ;;  %3978 = vmatprep.subr.bf16.mxu0 %v5431_v14  ;;  %v5494_v12 = vld [vmem:[%s7806_s1 + $0x4cc] ss:$16 sps:$4 sm:$0xff]   ;;  %v5489_v14 = vld [vmem:[%s7806_s1 + $0x2c8] ss:$16 sps:$4 sm:$0xff]  }
 0x11d   :  { %4019 = vmatprep.subr.bf16.mxu1 %v5434_v39 }
 0x11f   :  { %3979 = vmatpush1.bf16.msra.mxu0 %v5429_v15 }
 0x120   :  { %4020 = vmatpush1.bf16.msra.mxu1 %v5432_v16  ;;  %3980 = vmatprep.subr.bf16.mxu0 %v5437_v19 }
 0x121   :  { %4021 = vmatprep.subr.bf16.mxu1 %v5440_v21 }
 0x123   :  { %3981 = vmatpush2.bf16.msra.mxu0 %v5435_v22  ;;  %v5497_v22 = vld [vmem:[%s7806_s1 + $0x2ac] ss:$16 sps:$4 sm:$0xff]  }
 0x124   :  { %4022 = vmatpush2.bf16.msra.mxu1 %v5438_v24  ;;  %3982 = vmatprep.subr.bf16.mxu0 %v5443_v25  ;;  %v5500_v24 = vld [vmem:[%s7806_s1 + $0x4ac] ss:$16 sps:$4 sm:$0xff]  }
 0x125   :  { %4023 = vmatprep.subr.bf16.mxu1 %v5446_v27  ;;  %v5498_v27 = vld [vmem:[%s7806_s1 + $0x4a8] ss:$16 sps:$4 sm:$0xff]  }
 0x127   :  { %3983 = vmatpush2.bf16.msra.mxu0 %v5441_v28 }
 0x128   :  { %4024 = vmatpush2.bf16.msra.mxu1 %v5444_v29  ;;  %3984 = vmatprep.subr.bf16.mxu0 %v5449_v31 }
 0x129   :  { %4025 = vmatprep.subr.bf16.mxu1 %v5452_v33 }
 0x12b   :  { %3985 = vmatpush2.bf16.msra.mxu0 %v5447_v34  ;;  %v5503_v34 = vld [vmem:[%s7806_s1 + $0x28c] ss:$16 sps:$4 sm:$0xff]  }
 0x12c   :  { %4026 = vmatpush2.bf16.msra.mxu1 %v5450_v36  ;;  %3986 = vmatprep.subr.bf16.mxu0 %v5455_v37  ;;  %v5504_v36 = vld [vmem:[%s7806_s1 + $0x488] ss:$16 sps:$4 sm:$0xff]   ;;  %v5509_v37 = vld [vmem:[%s7806_s1 + $0x26c] ss:$16 sps:$4 sm:$0xff]  }
 0x12d   :  { %4027 = vmatprep.subr.bf16.mxu1 %v5458_v38  ;;  %v5512_v38 = vld [vmem:[%s7806_s1 + $0x46c] ss:$16 sps:$4 sm:$0xff]  }
 0x12f   :  { %3987 = vmatpush2.bf16.msra.mxu0 %v5453_v32  ;;  %v5507_v32 = vld [vmem:[%s7806_s1 + $0x268] ss:$16 sps:$4 sm:$0xff]  }
 0x130   :  { %4028 = vmatpush2.bf16.msra.mxu1 %v5456_v40  ;;  %3988 = vmatprep.subr.bf16.mxu0 %v5461_v45  ;;  %v5510_v40 = vld [vmem:[%s7806_s1 + $0x468] ss:$16 sps:$4 sm:$0xff]   ;;  %v5515_v45 = vld [vmem:[%s7806_s1 + $0x24c] ss:$16 sps:$4 sm:$0xff]  }
 0x131   :  { %4029 = vmatprep.subr.bf16.mxu1 %v5464_v46  ;;  %v5518_v46 = vld [vmem:[%s7806_s1 + $0x44c] ss:$16 sps:$4 sm:$0xff]  }
 0x133   :  { %3989 = vmatpush2.bf16.msra.mxu0 %v5459_v47  ;;  %v5513_v47 = vld [vmem:[%s7806_s1 + $0x248] ss:$16 sps:$4 sm:$0xff]  }
 0x134   :  { %4030 = vmatpush2.bf16.msra.mxu1 %v5462_v48  ;;  %3990 = vmatprep.subr.bf16.mxu0 %v5467_v51  ;;  %v5516_v48 = vld [vmem:[%s7806_s1 + $0x448] ss:$16 sps:$4 sm:$0xff]   ;;  %v5521_v51 = vld [vmem:[%s7806_s1 + $0x22c] ss:$16 sps:$4 sm:$0xff]  }
 0x135   :  { %4031 = vmatprep.subr.bf16.mxu1 %v5470_v53  ;;  %v5524_v53 = vld [vmem:[%s7806_s1 + $0x42c] ss:$16 sps:$4 sm:$0xff]  }
 0x137   :  { %3991 = vmatpush2.bf16.msra.mxu0 %v5465_v55  ;;  %v5519_v55 = vld [vmem:[%s7806_s1 + $0x228] ss:$16 sps:$4 sm:$0xff]  }
 0x138   :  { %4032 = vmatpush2.bf16.msra.mxu1 %v5468_v56  ;;  %3992 = vmatprep.subr.bf16.mxu0 %v5473_v57  ;;  %v5522_v56 = vld [vmem:[%s7806_s1 + $0x428] ss:$16 sps:$4 sm:$0xff]   ;;  %v5527_v57 = vld [vmem:[%s7806_s1 + $0x20c] ss:$16 sps:$4 sm:$0xff]  }
 0x139   :  { %4033 = vmatprep.subr.bf16.mxu1 %v5476_v60  ;;  %v5530_v60 = vld [vmem:[%s7806_s1 + $0x40c] ss:$16 sps:$4 sm:$0xff]  }
 0x13b   :  { %3993 = vmatpush2.bf16.msra.mxu0 %v5471_v58  ;;  %v5525_v58 = vld [vmem:[%s7806_s1 + $0x208] ss:$16 sps:$4 sm:$0xff]  }
 0x13c   :  { %4034 = vmatpush2.bf16.msra.mxu1 %v5474_v61  ;;  %3994 = vmatprep.subr.bf16.mxu0 %v5479_v62  ;;  %v5528_v61 = vld [vmem:[%s7806_s1 + $0x408] ss:$16 sps:$4 sm:$0xff]   ;;  %v5533_v62 = vld [vmem:[%s7806_s1 + $0x3ec] ss:$16 sps:$4 sm:$0xff]  }
 0x13d   :  { %4035 = vmatprep.subr.bf16.mxu1 %v5482_v63  ;;  %v5536_v63 = vld [vmem:[%s7806_s1 + $0x5ec] ss:$16 sps:$4 sm:$0xff]  }
 0x13f   :  { %3995 = vmatpush2.bf16.msra.mxu0 %v5477_v1  ;;  %v5531_v1 = vld [vmem:[%s7806_s1 + $0x3e8] ss:$16 sps:$4 sm:$0xff]  }
 0x140   :  { %4036 = vmatpush2.bf16.msra.mxu1 %v5480_v2  ;;  %4046 = vmatprep.subr.bf16.mxu0 %v5485_v3  ;;  %v5534_v2 = vld [vmem:[%s7806_s1 + $0x5e8] ss:$16 sps:$4 sm:$0xff]   ;;  %v5539_v3 = vld [vmem:[%s7806_s1 + $0x3cc] ss:$16 sps:$4 sm:$0xff]  }
 0x141   :  { %4087 = vmatprep.subr.bf16.mxu1 %v5488_v4  ;;  %v5542_v4 = vld [vmem:[%s7806_s1 + $0x5cc] ss:$16 sps:$4 sm:$0xff]  }
 0x142   :  { %v3752_v39 = vpop.f32.mrf.mxu0  ;;  %3997 = vmatmul.mubr.bf16.vlgmr.msra.gmra.mxu0 %v6991_v8 }
 0x143   :  { %v3793_v15 = vpop.f32.mrf.mxu1  ;;  %4038 = vmatmul.mubr.bf16.vlgmr.msra.gmra.mxu1 %v6102_v13  ;;  %v3753_v16 = vadd.f32 %v3752_v39, %v6809_v44  ;;  %4047 = vmatpush1.bf16.msra.mxu0 %v5483_v5  ;;  %v5495_v44 = vld [vmem:[%s7806_s1 + $0x2a8] ss:$16 sps:$4 sm:$0xff]   ;;  %v5551_v39 = vld [vmem:[%s7806_s1 + $0x38c] ss:$16 sps:$4 sm:$0xff]  }
 0x144   :  { %4088 = vmatpush1.bf16.msra.mxu1 %v5486_v7  ;;  %v3754_v19 = vpop.f32.mrf.mxu0  ;;  %4048 = vmatprep.subr.bf16.mxu0 %v5491_v9  ;;  %v5537_v5 = vld [vmem:[%s7806_s1 + $0x3c8] ss:$16 sps:$4 sm:$0xff]   ;;  %v5545_v9 = vld [vmem:[%s7806_s1 + $0x3ac] ss:$16 sps:$4 sm:$0xff]  }
 0x145   :  { %v3795_v21 = vpop.f32.mrf.mxu1  ;;  %4089 = vmatprep.subr.bf16.mxu1 %v5494_v12  ;;  %v7014_v25 = vadd.f32 %v3793_v15, %v3753_v16  ;;  %v3755_v13 = vadd.f32 %v3754_v19, %v6819_v52  ;;  %4078 = vmatprep.mubr.bf16.mxu0 %v6065_v0  ;;  %v5506_v0 = vld [vmem:[%s7806_s1 + $0x48c] ss:$16 sps:$4 sm:$0xff]   ;;  %v5540_v7 = vld [vmem:[%s7806_s1 + $0x5c8] ss:$16 sps:$4 sm:$0xff]  }
 0x146   :  { %4119 = vmatprep.mubr.bf16.mxu1 %v6114_v17  ;;  %v3756_v28 = vpop.f32.mrf.mxu0  ;;  %v5501_v17 = vld [vmem:[%s7806_s1 + $0x288] ss:$16 sps:$4 sm:$0xff]   ;;  %v5548_v12 = vld [vmem:[%s7806_s1 + $0x5ac] ss:$16 sps:$4 sm:$0xff]  }
 0x147   :  { %v3797_v29 = vpop.f32.mrf.mxu1  ;;  %v7025_v31 = vadd.f32 %v3795_v21, %v3755_v13  ;;  %4049 = vmatpush1.bf16.msra.mxu0 %v5489_v14  ;;  %v5543_v14 = vld [vmem:[%s7806_s1 + $0x3a8] ss:$16 sps:$4 sm:$0xff]   ;;  %v5554_v15 = vld [vmem:[%s7806_s1 + $0x58c] ss:$16 sps:$4 sm:$0xff]  }
 0x148   :  { %4090 = vmatpush1.bf16.msra.mxu1 %v5492_v11  ;;  %v3757_v33 = vpop.f32.mrf.mxu0  ;;  %4050 = vmatprep.subr.bf16.mxu0 %v5497_v22  ;;  %v5546_v11 = vld [vmem:[%s7806_s1 + $0x5a8] ss:$16 sps:$4 sm:$0xff]   ;;  %v5557_v21 = vld [vmem:[%s7806_s1 + $0x36c] ss:$16 sps:$4 sm:$0xff]  }
 0x149   :  { %v3798_v52 = vpop.f32.mrf.mxu1  ;;  %4091 = vmatprep.subr.bf16.mxu1 %v5500_v24  ;;  %v5549_v16 = vld [vmem:[%s7806_s1 + $0x388] ss:$16 sps:$4 sm:$0xff]   ;;  %v5560_v22 = vld [vmem:[%s7806_s1 + $0x56c] ss:$16 sps:$4 sm:$0xff]  }
 0x14a   :  { %v5552_v19 = vld [vmem:[%s7806_s1 + $0x588] ss:$16 sps:$4 sm:$0xff]   ;;  %v5569_v33 = vld [vmem:[%s7806_s1 + $0x32c] ss:$16 sps:$4 sm:$0xff]  }
 0x14b   :  { %4051 = vmatpush1.bf16.msra.mxu0 %v5495_v44  ;;  %v5555_v24 = vld [vmem:[%s7806_s1 + $0x368] ss:$16 sps:$4 sm:$0xff]   ;;  %v5563_v44 = vld [vmem:[%s7806_s1 + $0x34c] ss:$16 sps:$4 sm:$0xff]  }
 0x14c   :  { %4092 = vmatpush1.bf16.msra.mxu1 %v5498_v27  ;;  %4052 = vmatprep.subr.bf16.mxu0 %v5503_v34  ;;  %v5558_v13 = vld [vmem:[%s7806_s1 + $0x568] ss:$16 sps:$4 sm:$0xff]   ;;  %v5566_v27 = vld [vmem:[%s7806_s1 + $0x54c] ss:$16 sps:$4 sm:$0xff]  }
 0x14d   :  { %4093 = vmatprep.subr.bf16.mxu1 %v5506_v0  ;;  %v5561_v28 = vld [vmem:[%s7806_s1 + $0x348] ss:$16 sps:$4 sm:$0xff]   ;;  %v5572_v52 = vld [vmem:[%s7806_s1 + $0x52c] ss:$16 sps:$4 sm:$0xff]  }
 0x14e   :  { %v5564_v29 = vld [vmem:[%s7806_s1 + $0x548] ss:$16 sps:$4 sm:$0xff]  }
 0x14f   :  { %4053 = vmatpush1.bf16.msra.mxu0 %v5501_v17  ;;  %v5567_v34 = vld [vmem:[%s7806_s1 + $0x328] ss:$16 sps:$4 sm:$0xff]   ;;  %v5575_v17 = vld [vmem:[%s7806_s1 + $0x30c] ss:$16 sps:$4 sm:$0xff]  }
 0x150   :  { %4094 = vmatpush1.bf16.msra.mxu1 %v5504_v36  ;;  %4054 = vmatprep.subr.bf16.mxu0 %v5509_v37  ;;  %v5570_v0 = vld [vmem:[%s7806_s1 + $0x528] ss:$16 sps:$4 sm:$0xff]   ;;  %v5578_v36 = vld [vmem:[%s7806_s1 + $0x50c] ss:$16 sps:$4 sm:$0xff]  }
 0x151   :  { %4095 = vmatprep.subr.bf16.mxu1 %v5512_v38  ;;  %v5573_v37 = vld [vmem:[%s7806_s1 + $0x308] ss:$16 sps:$4 sm:$0xff]  }
 0x152   :  { %v5576_v38 = vld [vmem:[%s7806_s1 + $0x508] ss:$16 sps:$4 sm:$0xff]  }
 0x153   :  { %4055 = vmatpush1.bf16.msra.mxu0 %v5507_v32  ;;  %v5581_v32 = vld [vmem:[%s7806_s1 + $0x6ec] ss:$16 sps:$4 sm:$0xff]  }
 0x154   :  { %4096 = vmatpush1.bf16.msra.mxu1 %v5510_v40  ;;  %4056 = vmatprep.subr.bf16.mxu0 %v5515_v45  ;;  %v5584_v40 = vld [vmem:[%s7806_s1 + $0x8ec] ss:$16 sps:$4 sm:$0xff]   ;;  %v5579_v45 = vld [vmem:[%s7806_s1 + $0x6e8] ss:$16 sps:$4 sm:$0xff]  }
 0x155   :  { %4097 = vmatprep.subr.bf16.mxu1 %v5518_v46  ;;  %v5582_v46 = vld [vmem:[%s7806_s1 + $0x8e8] ss:$16 sps:$4 sm:$0xff]  }
 0x157   :  { %4057 = vmatpush1.bf16.msra.mxu0 %v5513_v47  ;;  %v5587_v47 = vld [vmem:[%s7806_s1 + $0x6cc] ss:$16 sps:$4 sm:$0xff]  }
 0x158   :  { %4098 = vmatpush1.bf16.msra.mxu1 %v5516_v48  ;;  %4058 = vmatprep.subr.bf16.mxu0 %v5521_v51  ;;  %v5590_v48 = vld [vmem:[%s7806_s1 + $0x8cc] ss:$16 sps:$4 sm:$0xff]  }
 0x159   :  { %4099 = vmatprep.subr.bf16.mxu1 %v5524_v53 }
 0x15b   :  { %4059 = vmatpush1.bf16.msra.mxu0 %v5519_v55 }
 0x15c   :  { %4100 = vmatpush1.bf16.msra.mxu1 %v5522_v56  ;;  %4060 = vmatprep.subr.bf16.mxu0 %v5527_v57  ;;  %v5585_v56 = vld [vmem:[%s7806_s1 + $0x6c8] ss:$16 sps:$4 sm:$0xff]  }
 0x15d   :  { %4101 = vmatprep.subr.bf16.mxu1 %v5530_v60  ;;  %v5588_v57 = vld [vmem:[%s7806_s1 + $0x8c8] ss:$16 sps:$4 sm:$0xff]  }
 0x15f   :  { %4061 = vmatpush1.bf16.msra.mxu0 %v5525_v58 }
 0x160   :  { %4102 = vmatpush1.bf16.msra.mxu1 %v5528_v61  ;;  %4062 = vmatprep.subr.bf16.mxu0 %v5533_v62 }
 0x161   :  { %4103 = vmatprep.subr.bf16.mxu1 %v5536_v63 }
 0x163   :  { %4063 = vmatpush2.bf16.msra.mxu0 %v5531_v1 }
 0x164   :  { %4104 = vmatpush2.bf16.msra.mxu1 %v5534_v2  ;;  %4064 = vmatprep.subr.bf16.mxu0 %v5539_v3  ;;  %v5591_v2 = vld [vmem:[%s7806_s1 + $0x6a8] ss:$16 sps:$4 sm:$0xff]  }
 0x165   :  { %4105 = vmatprep.subr.bf16.mxu1 %v5542_v4  ;;  %v5594_v3 = vld [vmem:[%s7806_s1 + $0x8a8] ss:$16 sps:$4 sm:$0xff]  }
 0x167   :  { %4065 = vmatpush2.bf16.msra.mxu0 %v5537_v5  ;;  %v5597_v5 = vld [vmem:[%s7806_s1 + $0x688] ss:$16 sps:$4 sm:$0xff]  }
 0x168   :  { %4106 = vmatpush2.bf16.msra.mxu1 %v5540_v7  ;;  %4066 = vmatprep.subr.bf16.mxu0 %v5545_v9  ;;  %v5600_v7 = vld [vmem:[%s7806_s1 + $0x888] ss:$16 sps:$4 sm:$0xff]   ;;  %v5605_v9 = vld [vmem:[%s7806_s1 + $0x66c] ss:$16 sps:$4 sm:$0xff]  }
 0x169   :  { %4107 = vmatprep.subr.bf16.mxu1 %v5548_v12  ;;  %v5608_v12 = vld [vmem:[%s7806_s1 + $0x86c] ss:$16 sps:$4 sm:$0xff]  }
 0x16b   :  { %4067 = vmatpush2.bf16.msra.mxu0 %v5543_v14  ;;  %v5603_v14 = vld [vmem:[%s7806_s1 + $0x668] ss:$16 sps:$4 sm:$0xff]  }
 0x16c   :  { %4108 = vmatpush2.bf16.msra.mxu1 %v5546_v11  ;;  %4068 = vmatprep.subr.bf16.mxu0 %v5551_v39  ;;  %v5606_v11 = vld [vmem:[%s7806_s1 + $0x868] ss:$16 sps:$4 sm:$0xff]   ;;  %v5611_v39 = vld [vmem:[%s7806_s1 + $0x64c] ss:$16 sps:$4 sm:$0xff]  }
 0x16d   :  { %4109 = vmatprep.subr.bf16.mxu1 %v5554_v15  ;;  %v5614_v15 = vld [vmem:[%s7806_s1 + $0x84c] ss:$16 sps:$4 sm:$0xff]  }
 0x16f   :  { %4069 = vmatpush2.bf16.msra.mxu0 %v5549_v16  ;;  %v5609_v16 = vld [vmem:[%s7806_s1 + $0x648] ss:$16 sps:$4 sm:$0xff]  }
 0x170   :  { %4110 = vmatpush2.bf16.msra.mxu1 %v5552_v19  ;;  %4070 = vmatprep.subr.bf16.mxu0 %v5557_v21  ;;  %v5612_v19 = vld [vmem:[%s7806_s1 + $0x848] ss:$16 sps:$4 sm:$0xff]   ;;  %v5617_v21 = vld [vmem:[%s7806_s1 + $0x62c] ss:$16 sps:$4 sm:$0xff]  }
 0x171   :  { %4111 = vmatprep.subr.bf16.mxu1 %v5560_v22  ;;  %v5620_v22 = vld [vmem:[%s7806_s1 + $0x82c] ss:$16 sps:$4 sm:$0xff]  }
 0x173   :  { %4071 = vmatpush2.bf16.msra.mxu0 %v5555_v24  ;;  %v5615_v24 = vld [vmem:[%s7806_s1 + $0x628] ss:$16 sps:$4 sm:$0xff]  }
 0x174   :  { %4112 = vmatpush2.bf16.msra.mxu1 %v5558_v13  ;;  %4072 = vmatprep.subr.bf16.mxu0 %v5563_v44  ;;  %v5618_v13 = vld [vmem:[%s7806_s1 + $0x828] ss:$16 sps:$4 sm:$0xff]   ;;  %v5623_v44 = vld [vmem:[%s7806_s1 + $0x60c] ss:$16 sps:$4 sm:$0xff]  }
 0x175   :  { %4113 = vmatprep.subr.bf16.mxu1 %v5566_v27  ;;  %v5626_v27 = vld [vmem:[%s7806_s1 + $0x80c] ss:$16 sps:$4 sm:$0xff]  }
 0x177   :  { %4073 = vmatpush2.bf16.msra.mxu0 %v5561_v28  ;;  %v5621_v28 = vld [vmem:[%s7806_s1 + $0x608] ss:$16 sps:$4 sm:$0xff]  }
 0x178   :  { %4114 = vmatpush2.bf16.msra.mxu1 %v5564_v29  ;;  %4074 = vmatprep.subr.bf16.mxu0 %v5569_v33  ;;  %v5624_v29 = vld [vmem:[%s7806_s1 + $0x808] ss:$16 sps:$4 sm:$0xff]   ;;  %v5629_v33 = vld [vmem:[%s7806_s1 + $0x7ec] ss:$16 sps:$4 sm:$0xff]  }
 0x179   :  { %4115 = vmatprep.subr.bf16.mxu1 %v5572_v52  ;;  %v5632_v52 = vld [vmem:[%s7806_s1 + $0x9ec] ss:$16 sps:$4 sm:$0xff]  }
 0x17b   :  { %4075 = vmatpush2.bf16.msra.mxu0 %v5567_v34  ;;  %v5627_v34 = vld [vmem:[%s7806_s1 + $0x7e8] ss:$16 sps:$4 sm:$0xff]  }
 0x17c   :  { %4116 = vmatpush2.bf16.msra.mxu1 %v5570_v0  ;;  %4076 = vmatprep.subr.bf16.mxu0 %v5575_v17  ;;  %v5630_v0 = vld [vmem:[%s7806_s1 + $0x9e8] ss:$16 sps:$4 sm:$0xff]   ;;  %v5635_v17 = vld [vmem:[%s7806_s1 + $0x7cc] ss:$16 sps:$4 sm:$0xff]  }
 0x17d   :  { %4117 = vmatprep.subr.bf16.mxu1 %v5578_v36  ;;  %v5638_v36 = vld [vmem:[%s7806_s1 + $0x9cc] ss:$16 sps:$4 sm:$0xff]  }
 0x17f   :  { %4077 = vmatpush2.bf16.msra.mxu0 %v5573_v37  ;;  %v5633_v37 = vld [vmem:[%s7806_s1 + $0x7c8] ss:$16 sps:$4 sm:$0xff]  }
 0x180   :  { %4118 = vmatpush2.bf16.msra.mxu1 %v5576_v38  ;;  %4128 = vmatprep.subr.bf16.mxu0 %v5581_v32  ;;  %v5636_v38 = vld [vmem:[%s7806_s1 + $0x9c8] ss:$16 sps:$4 sm:$0xff]   ;;  %v5641_v32 = vld [vmem:[%s7806_s1 + $0x7ac] ss:$16 sps:$4 sm:$0xff]  }
 0x181   :  { %4169 = vmatprep.subr.bf16.mxu1 %v5584_v40  ;;  %v5644_v40 = vld [vmem:[%s7806_s1 + $0x9ac] ss:$16 sps:$4 sm:$0xff]  }
 0x182   :  { %v3834_v51 = vpop.f32.mrf.mxu0  ;;  %4079 = vmatmul.mubr.bf16.vlgmr.msra.gmra.mxu0 %v6118_v18  ;;  %v5593_v18 = vld [vmem:[%s7806_s1 + $0x6ac] ss:$16 sps:$4 sm:$0xff]  }
 0x183   :  { %v3875_v53 = vpop.f32.mrf.mxu1  ;;  %4120 = vmatmul.mubr.bf16.vlgmr.msra.gmra.mxu1 %v6313_v26  ;;  %v3835_v55 = vadd.f32 %v3834_v51, %v7014_v25  ;;  %4129 = vmatpush1.bf16.msra.mxu0 %v5579_v45  ;;  %v5596_v26 = vld [vmem:[%s7806_s1 + $0x8ac] ss:$16 sps:$4 sm:$0xff]   ;;  %v5639_v45 = vld [vmem:[%s7806_s1 + $0x7a8] ss:$16 sps:$4 sm:$0xff]  }
 0x184   :  { %4170 = vmatpush1.bf16.msra.mxu1 %v5582_v46  ;;  %v3836_v60 = vpop.f32.mrf.mxu0  ;;  %4130 = vmatprep.subr.bf16.mxu0 %v5587_v47  ;;  %v5642_v46 = vld [vmem:[%s7806_s1 + $0x9a8] ss:$16 sps:$4 sm:$0xff]   ;;  %v5647_v47 = vld [vmem:[%s7806_s1 + $0x78c] ss:$16 sps:$4 sm:$0xff]  }
 0x185   :  { %v3877_v58 = vpop.f32.mrf.mxu1  ;;  %4171 = vmatprep.subr.bf16.mxu1 %v5590_v48  ;;  %v7216_v25 = vadd.f32 %v3875_v53, %v3835_v55  ;;  %v3837_v61 = vadd.f32 %v3836_v60, %v7025_v31  ;;  %4160 = vmatprep.mubr.bf16.mxu0 %v6134_v23  ;;  %v5599_v23 = vld [vmem:[%s7806_s1 + $0x68c] ss:$16 sps:$4 sm:$0xff]   ;;  %v5645_v51 = vld [vmem:[%s7806_s1 + $0x788] ss:$16 sps:$4 sm:$0xff]  }
 0x186   :  { %4201 = vmatprep.mubr.bf16.mxu1 %v6366_v41  ;;  %v3838_v62 = vpop.f32.mrf.mxu0  ;;  %v5602_v41 = vld [vmem:[%s7806_s1 + $0x88c] ss:$16 sps:$4 sm:$0xff]   ;;  %v5648_v53 = vld [vmem:[%s7806_s1 + $0x988] ss:$16 sps:$4 sm:$0xff]  }
 0x187   :  { %v3879_v63 = vpop.f32.mrf.mxu1  ;;  %v7221_v1 = vadd.f32 %v3877_v58, %v3837_v61  ;;  %4131 = vmatpush1.bf16.msra.mxu0 %v5585_v56  ;;  %v5650_v48 = vld [vmem:[%s7806_s1 + $0x98c] ss:$16 sps:$4 sm:$0xff]   ;;  %v5654_v60 = vld [vmem:[%s7806_s1 + $0x968] ss:$16 sps:$4 sm:$0xff]  }
 0x188   :  { %4172 = vmatpush1.bf16.msra.mxu1 %v5588_v57  ;;  %v3839_v4 = vpop.f32.mrf.mxu0  ;;  %4132 = vmatprep.subr.bf16.mxu0 %v5593_v18  ;;  %v5653_v55 = vld [vmem:[%s7806_s1 + $0x76c] ss:$16 sps:$4 sm:$0xff]   ;;  %v5651_v57 = vld [vmem:[%s7806_s1 + $0x768] ss:$16 sps:$4 sm:$0xff]  }
 0x189   :  { %v3880_v31 = vpop.f32.mrf.mxu1  ;;  %4173 = vmatprep.subr.bf16.mxu1 %v5596_v26  ;;  %v5656_v56 = vld [vmem:[%s7806_s1 + $0x96c] ss:$16 sps:$4 sm:$0xff]   ;;  %v5657_v26 = vld [vmem:[%s7806_s1 + $0x748] ss:$16 sps:$4 sm:$0xff]  }
 0x18a   :  { %v5659_v58 = vld [vmem:[%s7806_s1 + $0x74c] ss:$16 sps:$4 sm:$0xff]   ;;  %v5660_v61 = vld [vmem:[%s7806_s1 + $0x948] ss:$16 sps:$4 sm:$0xff]  }
 0x18b   :  { %4133 = vmatpush1.bf16.msra.mxu0 %v5591_v2  ;;  %v5662_v18 = vld [vmem:[%s7806_s1 + $0x94c] ss:$16 sps:$4 sm:$0xff]   ;;  %v5663_v2 = vld [vmem:[%s7806_s1 + $0x728] ss:$16 sps:$4 sm:$0xff]  }
 0x18c   :  { %4174 = vmatpush1.bf16.msra.mxu1 %v5594_v3  ;;  %4134 = vmatprep.subr.bf16.mxu0 %v5599_v23  ;;  %v5665_v62 = vld [vmem:[%s7806_s1 + $0x72c] ss:$16 sps:$4 sm:$0xff]   ;;  %v5666_v3 = vld [vmem:[%s7806_s1 + $0x928] ss:$16 sps:$4 sm:$0xff]  }
 0x18d   :  { %4175 = vmatprep.subr.bf16.mxu1 %v5602_v41  ;;  %v5668_v63 = vld [vmem:[%s7806_s1 + $0x92c] ss:$16 sps:$4 sm:$0xff]   ;;  %v5669_v23 = vld [vmem:[%s7806_s1 + $0x708] ss:$16 sps:$4 sm:$0xff]  }
 0x18e   :  { %v5671_v4 = vld [vmem:[%s7806_s1 + $0x70c] ss:$16 sps:$4 sm:$0xff]   ;;  %v5672_v41 = vld [vmem:[%s7806_s1 + $0x908] ss:$16 sps:$4 sm:$0xff]  }
 0x18f   :  { %4135 = vmatpush1.bf16.msra.mxu0 %v5597_v5  ;;  %v5674_v31 = vld [vmem:[%s7806_s1 + $0x90c] ss:$16 sps:$4 sm:$0xff]  }
 0x190   :  { %4176 = vmatpush1.bf16.msra.mxu1 %v5600_v7  ;;  %4136 = vmatprep.subr.bf16.mxu0 %v5605_v9  ;;  %v5677_v5 = vld [vmem:[%s7806_s1 + $0xaec] ss:$16 sps:$4 sm:$0xff]   ;;  %v5675_v9 = vld [vmem:[%s7806_s1 + $0xae8] ss:$16 sps:$4 sm:$0xff]  }
 0x191   :  { %4177 = vmatprep.subr.bf16.mxu1 %v5608_v12  ;;  %v5680_v7 = vld [vmem:[%s7806_s1 + $0xcec] ss:$16 sps:$4 sm:$0xff]   ;;  %v5678_v12 = vld [vmem:[%s7806_s1 + $0xce8] ss:$16 sps:$4 sm:$0xff]  }
 0x193   :  { %4137 = vmatpush1.bf16.msra.mxu0 %v5603_v14  ;;  %v5683_v14 = vld [vmem:[%s7806_s1 + $0xacc] ss:$16 sps:$4 sm:$0xff]  }
 0x194   :  { %4178 = vmatpush1.bf16.msra.mxu1 %v5606_v11  ;;  %4138 = vmatprep.subr.bf16.mxu0 %v5611_v39  ;;  %v5686_v11 = vld [vmem:[%s7806_s1 + $0xccc] ss:$16 sps:$4 sm:$0xff]  }
 0x195   :  { %4179 = vmatprep.subr.bf16.mxu1 %v5614_v15 }
 0x197   :  { %4139 = vmatpush1.bf16.msra.mxu0 %v5609_v16 }
 0x198   :  { %4180 = vmatpush1.bf16.msra.mxu1 %v5612_v19  ;;  %4140 = vmatprep.subr.bf16.mxu0 %v5617_v21  ;;  %v5681_v19 = vld [vmem:[%s7806_s1 + $0xac8] ss:$16 sps:$4 sm:$0xff]  }
 0x199   :  { %4181 = vmatprep.subr.bf16.mxu1 %v5620_v22  ;;  %v5684_v21 = vld [vmem:[%s7806_s1 + $0xcc8] ss:$16 sps:$4 sm:$0xff]  }
 0x19b   :  { %4141 = vmatpush1.bf16.msra.mxu0 %v5615_v24 }
 0x19c   :  { %4182 = vmatpush1.bf16.msra.mxu1 %v5618_v13  ;;  %4142 = vmatprep.subr.bf16.mxu0 %v5623_v44 }
 0x19d   :  { %4183 = vmatprep.subr.bf16.mxu1 %v5626_v27 }
 0x19f   :  { %4143 = vmatpush1.bf16.msra.mxu0 %v5621_v28 }
 0x1a0   :  { %4184 = vmatpush1.bf16.msra.mxu1 %v5624_v29  ;;  %4144 = vmatprep.subr.bf16.mxu0 %v5629_v33  ;;  %v5687_v29 = vld [vmem:[%s7806_s1 + $0xaa8] ss:$16 sps:$4 sm:$0xff]  }
 0x1a1   :  { %4185 = vmatprep.subr.bf16.mxu1 %v5632_v52  ;;  %v5690_v33 = vld [vmem:[%s7806_s1 + $0xca8] ss:$16 sps:$4 sm:$0xff]  }
 0x1a3   :  { %4145 = vmatpush2.bf16.msra.mxu0 %v5627_v34  ;;  %v5693_v34 = vld [vmem:[%s7806_s1 + $0xa88] ss:$16 sps:$4 sm:$0xff]  }
 0x1a4   :  { %4186 = vmatpush2.bf16.msra.mxu1 %v5630_v0  ;;  %4146 = vmatprep.subr.bf16.mxu0 %v5635_v17  ;;  %v5696_v0 = vld [vmem:[%s7806_s1 + $0xc88] ss:$16 sps:$4 sm:$0xff]   ;;  %v5701_v17 = vld [vmem:[%s7806_s1 + $0xa6c] ss:$16 sps:$4 sm:$0xff]  }
 0x1a5   :  { %4187 = vmatprep.subr.bf16.mxu1 %v5638_v36  ;;  %v5704_v36 = vld [vmem:[%s7806_s1 + $0xc6c] ss:$16 sps:$4 sm:$0xff]  }
 0x1a7   :  { %4147 = vmatpush2.bf16.msra.mxu0 %v5633_v37  ;;  %v5699_v37 = vld [vmem:[%s7806_s1 + $0xa68] ss:$16 sps:$4 sm:$0xff]  }
 0x1a8   :  { %4188 = vmatpush2.bf16.msra.mxu1 %v5636_v38  ;;  %4148 = vmatprep.subr.bf16.mxu0 %v5641_v32  ;;  %v5702_v38 = vld [vmem:[%s7806_s1 + $0xc68] ss:$16 sps:$4 sm:$0xff]   ;;  %v5707_v32 = vld [vmem:[%s7806_s1 + $0xa4c] ss:$16 sps:$4 sm:$0xff]  }
 0x1a9   :  { %4189 = vmatprep.subr.bf16.mxu1 %v5644_v40  ;;  %v5710_v40 = vld [vmem:[%s7806_s1 + $0xc4c] ss:$16 sps:$4 sm:$0xff]  }
 0x1ab   :  { %4149 = vmatpush2.bf16.msra.mxu0 %v5639_v45  ;;  %v5705_v45 = vld [vmem:[%s7806_s1 + $0xa48] ss:$16 sps:$4 sm:$0xff]  }
 0x1ac   :  { %4190 = vmatpush2.bf16.msra.mxu1 %v5642_v46  ;;  %4150 = vmatprep.subr.bf16.mxu0 %v5647_v47  ;;  %v5708_v46 = vld [vmem:[%s7806_s1 + $0xc48] ss:$16 sps:$4 sm:$0xff]   ;;  %v5713_v47 = vld [vmem:[%s7806_s1 + $0xa2c] ss:$16 sps:$4 sm:$0xff]  }
 0x1ad   :  { %4191 = vmatprep.subr.bf16.mxu1 %v5650_v48  ;;  %v5716_v48 = vld [vmem:[%s7806_s1 + $0xc2c] ss:$16 sps:$4 sm:$0xff]  }
 0x1af   :  { %4151 = vmatpush2.bf16.msra.mxu0 %v5645_v51  ;;  %v5711_v51 = vld [vmem:[%s7806_s1 + $0xa28] ss:$16 sps:$4 sm:$0xff]  }
 0x1b0   :  { %4192 = vmatpush2.bf16.msra.mxu1 %v5648_v53  ;;  %4152 = vmatprep.subr.bf16.mxu0 %v5653_v55  ;;  %v5714_v53 = vld [vmem:[%s7806_s1 + $0xc28] ss:$16 sps:$4 sm:$0xff]   ;;  %v5719_v55 = vld [vmem:[%s7806_s1 + $0xa0c] ss:$16 sps:$4 sm:$0xff]  }
 0x1b1   :  { %4193 = vmatprep.subr.bf16.mxu1 %v5656_v56  ;;  %v5722_v56 = vld [vmem:[%s7806_s1 + $0xc0c] ss:$16 sps:$4 sm:$0xff]  }
 0x1b3   :  { %4153 = vmatpush2.bf16.msra.mxu0 %v5651_v57  ;;  %v5717_v57 = vld [vmem:[%s7806_s1 + $0xa08] ss:$16 sps:$4 sm:$0xff]  }
 0x1b4   :  { %4194 = vmatpush2.bf16.msra.mxu1 %v5654_v60  ;;  %4154 = vmatprep.subr.bf16.mxu0 %v5659_v58  ;;  %v5720_v60 = vld [vmem:[%s7806_s1 + $0xc08] ss:$16 sps:$4 sm:$0xff]   ;;  %v5725_v58 = vld [vmem:[%s7806_s1 + $0xbec] ss:$16 sps:$4 sm:$0xff]  }
 0x1b5   :  { %4195 = vmatprep.subr.bf16.mxu1 %v5662_v18  ;;  %v5728_v18 = vld [vmem:[%s7806_s1 + $0xdec] ss:$16 sps:$4 sm:$0xff]  }
 0x1b7   :  { %4155 = vmatpush2.bf16.msra.mxu0 %v5657_v26  ;;  %v5723_v26 = vld [vmem:[%s7806_s1 + $0xbe8] ss:$16 sps:$4 sm:$0xff]  }
 0x1b8   :  { %4196 = vmatpush2.bf16.msra.mxu1 %v5660_v61  ;;  %4156 = vmatprep.subr.bf16.mxu0 %v5665_v62  ;;  %v5726_v61 = vld [vmem:[%s7806_s1 + $0xde8] ss:$16 sps:$4 sm:$0xff]   ;;  %v5731_v62 = vld [vmem:[%s7806_s1 + $0xbcc] ss:$16 sps:$4 sm:$0xff]  }
 0x1b9   :  { %4197 = vmatprep.subr.bf16.mxu1 %v5668_v63  ;;  %v5734_v63 = vld [vmem:[%s7806_s1 + $0xdcc] ss:$16 sps:$4 sm:$0xff]  }
 0x1bb   :  { %4157 = vmatpush2.bf16.msra.mxu0 %v5663_v2  ;;  %v5729_v2 = vld [vmem:[%s7806_s1 + $0xbc8] ss:$16 sps:$4 sm:$0xff]  }
 0x1bc   :  { %4198 = vmatpush2.bf16.msra.mxu1 %v5666_v3  ;;  %4158 = vmatprep.subr.bf16.mxu0 %v5671_v4  ;;  %v5732_v3 = vld [vmem:[%s7806_s1 + $0xdc8] ss:$16 sps:$4 sm:$0xff]   ;;  %v5737_v4 = vld [vmem:[%s7806_s1 + $0xbac] ss:$16 sps:$4 sm:$0xff]  }
 0x1bd   :  { %4199 = vmatprep.subr.bf16.mxu1 %v5674_v31  ;;  %v5740_v31 = vld [vmem:[%s7806_s1 + $0xdac] ss:$16 sps:$4 sm:$0xff]  }
 0x1bf   :  { %4159 = vmatpush2.bf16.msra.mxu0 %v5669_v23  ;;  %v5735_v23 = vld [vmem:[%s7806_s1 + $0xba8] ss:$16 sps:$4 sm:$0xff]  }
 0x1c0   :  { %4200 = vmatpush2.bf16.msra.mxu1 %v5672_v41  ;;  %4210 = vmatprep.subr.bf16.mxu0 %v5677_v5  ;;  %v5738_v41 = vld [vmem:[%s7806_s1 + $0xda8] ss:$16 sps:$4 sm:$0xff]   ;;  %v5743_v5 = vld [vmem:[%s7806_s1 + $0xb8c] ss:$16 sps:$4 sm:$0xff]  }
 0x1c1   :  { %4251 = vmatprep.subr.bf16.mxu1 %v5680_v7  ;;  %v5746_v7 = vld [vmem:[%s7806_s1 + $0xd8c] ss:$16 sps:$4 sm:$0xff]  }
 0x1c2   :  { %v3916_v39 = vpop.f32.mrf.mxu0  ;;  %4161 = vmatmul.mubr.bf16.vlgmr.msra.gmra.mxu0 %v6326_v6  ;;  %v5689_v6 = vld [vmem:[%s7806_s1 + $0xaac] ss:$16 sps:$4 sm:$0xff]  }
 0x1c3   :  { %v3957_v15 = vpop.f32.mrf.mxu1  ;;  %4202 = vmatmul.mubr.bf16.vlgmr.msra.gmra.mxu1 %v6542_v50  ;;  %v3917_v16 = vadd.f32 %v3916_v39, %v7216_v25  ;;  %4211 = vmatpush1.bf16.msra.mxu0 %v5675_v9  ;;  %v5692_v50 = vld [vmem:[%s7806_s1 + $0xcac] ss:$16 sps:$4 sm:$0xff]   ;;  %v5741_v9 = vld [vmem:[%s7806_s1 + $0xb88] ss:$16 sps:$4 sm:$0xff]  }
 0x1c4   :  { %4252 = vmatpush1.bf16.msra.mxu1 %v5678_v12  ;;  %v3918_v22 = vpop.f32.mrf.mxu0  ;;  %4212 = vmatprep.subr.bf16.mxu0 %v5683_v14  ;;  %v5744_v12 = vld [vmem:[%s7806_s1 + $0xd88] ss:$16 sps:$4 sm:$0xff]   ;;  %v5749_v14 = vld [vmem:[%s7806_s1 + $0xb6c] ss:$16 sps:$4 sm:$0xff]  }
 0x1c5   :  { %v3959_v24 = vpop.f32.mrf.mxu1  ;;  %4253 = vmatprep.subr.bf16.mxu1 %v5686_v11  ;;  %v7418_v25 = vadd.f32 %v3957_v15, %v3917_v16  ;;  %v3919_v13 = vadd.f32 %v3918_v22, %v7221_v1  ;;  %4242 = vmatprep.mubr.bf16.mxu0 %v6371_v43  ;;  %v5695_v43 = vld [vmem:[%s7806_s1 + $0xa8c] ss:$16 sps:$4 sm:$0xff]   ;;  %v5747_v39 = vld [vmem:[%s7806_s1 + $0xb68] ss:$16 sps:$4 sm:$0xff]  }
 0x1c6   :  { %4283 = vmatprep.mubr.bf16.mxu1 %v6554_v54  ;;  %v3920_v44 = vpop.f32.mrf.mxu0  ;;  %v5698_v54 = vld [vmem:[%s7806_s1 + $0xc8c] ss:$16 sps:$4 sm:$0xff]   ;;  %v5750_v15 = vld [vmem:[%s7806_s1 + $0xd68] ss:$16 sps:$4 sm:$0xff]  }
 0x1c7   :  { %v3961_v27 = vpop.f32.mrf.mxu1  ;;  %v7423_v28 = vadd.f32 %v3959_v24, %v3919_v13  ;;  %4213 = vmatpush1.bf16.msra.mxu0 %v5681_v19  ;;  %v5752_v11 = vld [vmem:[%s7806_s1 + $0xd6c] ss:$16 sps:$4 sm:$0xff]   ;;  %v5756_v22 = vld [vmem:[%s7806_s1 + $0xd48] ss:$16 sps:$4 sm:$0xff]  }
 0x1c8   :  { %4254 = vmatpush1.bf16.msra.mxu1 %v5684_v21  ;;  %v3921_v52 = vpop.f32.mrf.mxu0  ;;  %4214 = vmatprep.subr.bf16.mxu0 %v5689_v6  ;;  %v5755_v16 = vld [vmem:[%s7806_s1 + $0xb4c] ss:$16 sps:$4 sm:$0xff]   ;;  %v5753_v21 = vld [vmem:[%s7806_s1 + $0xb48] ss:$16 sps:$4 sm:$0xff]  }
 0x1c9   :  { %v3962_v1 = vpop.f32.mrf.mxu1  ;;  %4255 = vmatprep.subr.bf16.mxu1 %v5692_v50  ;;  %v5758_v19 = vld [vmem:[%s7806_s1 + $0xd4c] ss:$16 sps:$4 sm:$0xff]   ;;  %v5759_v50 = vld [vmem:[%s7806_s1 + $0xb28] ss:$16 sps:$4 sm:$0xff]  }
 0x1ca   :  { %v5761_v24 = vld [vmem:[%s7806_s1 + $0xb2c] ss:$16 sps:$4 sm:$0xff]   ;;  %v5762_v13 = vld [vmem:[%s7806_s1 + $0xd28] ss:$16 sps:$4 sm:$0xff]  }
 0x1cb   :  { %4215 = vmatpush1.bf16.msra.mxu0 %v5687_v29  ;;  %v5764_v6 = vld [vmem:[%s7806_s1 + $0xd2c] ss:$16 sps:$4 sm:$0xff]   ;;  %v5765_v29 = vld [vmem:[%s7806_s1 + $0xb08] ss:$16 sps:$4 sm:$0xff]  }
 0x1cc   :  { %4256 = vmatpush1.bf16.msra.mxu1 %v5690_v33  ;;  %4216 = vmatprep.subr.bf16.mxu0 %v5695_v43  ;;  %v5767_v44 = vld [vmem:[%s7806_s1 + $0xb0c] ss:$16 sps:$4 sm:$0xff]   ;;  %v5768_v33 = vld [vmem:[%s7806_s1 + $0xd08] ss:$16 sps:$4 sm:$0xff]  }
 0x1cd   :  { %4257 = vmatprep.subr.bf16.mxu1 %v5698_v54  ;;  %v5770_v27 = vld [vmem:[%s7806_s1 + $0xd0c] ss:$16 sps:$4 sm:$0xff]   ;;  %v5771_v43 = vld [vmem:[%s7806_s1 + $0xee8] ss:$16 sps:$4 sm:$0xff]  }
 0x1ce   :  { %v5773_v52 = vld [vmem:[%s7806_s1 + $0xeec] ss:$16 sps:$4 sm:$0xff]   ;;  %v5774_v54 = vld [vmem:[%s7806_s1 + $0x10e8] ss:$16 sps:$4 sm:$0xff]  }
 0x1cf   :  { %4217 = vmatpush1.bf16.msra.mxu0 %v5693_v34  ;;  %v5776_v1 = vld [vmem:[%s7806_s1 + $0x10ec] ss:$16 sps:$4 sm:$0xff]  }
 0x1d0   :  { %4258 = vmatpush1.bf16.msra.mxu1 %v5696_v0  ;;  %4218 = vmatprep.subr.bf16.mxu0 %v5701_v17  ;;  %v5779_v34 = vld [vmem:[%s7806_s1 + $0xecc] ss:$16 sps:$4 sm:$0xff]  }
 0x1d1   :  { %4259 = vmatprep.subr.bf16.mxu1 %v5704_v36  ;;  %v5782_v0 = vld [vmem:[%s7806_s1 + $0x10cc] ss:$16 sps:$4 sm:$0xff]  }
 0x1d3   :  { %4219 = vmatpush1.bf16.msra.mxu0 %v5699_v37 }
 0x1d4   :  { %4260 = vmatpush1.bf16.msra.mxu1 %v5702_v38  ;;  %4220 = vmatprep.subr.bf16.mxu0 %v5707_v32  ;;  %v5777_v38 = vld [vmem:[%s7806_s1 + $0xec8] ss:$16 sps:$4 sm:$0xff]  }
 0x1d5   :  { %4261 = vmatprep.subr.bf16.mxu1 %v5710_v40  ;;  %v5780_v32 = vld [vmem:[%s7806_s1 + $0x10c8] ss:$16 sps:$4 sm:$0xff]  }
 0x1d7   :  { %4221 = vmatpush1.bf16.msra.mxu0 %v5705_v45 }
 0x1d8   :  { %4262 = vmatpush1.bf16.msra.mxu1 %v5708_v46  ;;  %4222 = vmatprep.subr.bf16.mxu0 %v5713_v47 }
 0x1d9   :  { %4263 = vmatprep.subr.bf16.mxu1 %v5716_v48 }
 0x1db   :  { %4223 = vmatpush1.bf16.msra.mxu0 %v5711_v51 }
 0x1dc   :  { %4264 = vmatpush1.bf16.msra.mxu1 %v5714_v53  ;;  %4224 = vmatprep.subr.bf16.mxu0 %v5719_v55  ;;  %v5783_v53 = vld [vmem:[%s7806_s1 + $0xea8] ss:$16 sps:$4 sm:$0xff]  }
 0x1dd   :  { %4265 = vmatprep.subr.bf16.mxu1 %v5722_v56  ;;  %v5786_v55 = vld [vmem:[%s7806_s1 + $0x10a8] ss:$16 sps:$4 sm:$0xff]  }
 0x1df   :  { %4225 = vmatpush1.bf16.msra.mxu0 %v5717_v57 }
 0x1e0   :  { %4266 = vmatpush1.bf16.msra.mxu1 %v5720_v60  ;;  %4226 = vmatprep.subr.bf16.mxu0 %v5725_v58 }
 0x1e1   :  { %4267 = vmatprep.subr.bf16.mxu1 %v5728_v18  ;;  %v5789_v18 = vld [vmem:[%s7806_s1 + $0xe88] ss:$16 sps:$4 sm:$0xff]  }
 0x1e3   :  { %4227 = vmatpush2.bf16.msra.mxu0 %v5723_v26  ;;  %v5792_v26 = vld [vmem:[%s7806_s1 + $0x1088] ss:$16 sps:$4 sm:$0xff]  }
 0x1e4   :  { %4268 = vmatpush2.bf16.msra.mxu1 %v5726_v61  ;;  %4228 = vmatprep.subr.bf16.mxu0 %v5731_v62  ;;  %v5797_v61 = vld [vmem:[%s7806_s1 + $0xe6c] ss:$16 sps:$4 sm:$0xff]  }
 0x1e5   :  { %4269 = vmatprep.subr.bf16.mxu1 %v5734_v63  ;;  %v5800_v62 = vld [vmem:[%s7806_s1 + $0x106c] ss:$16 sps:$4 sm:$0xff]   ;;  %v5795_v63 = vld [vmem:[%s7806_s1 + $0xe68] ss:$16 sps:$4 sm:$0xff]  }
 0x1e7   :  { %4229 = vmatpush2.bf16.msra.mxu0 %v5729_v2  ;;  %v5798_v2 = vld [vmem:[%s7806_s1 + $0x1068] ss:$16 sps:$4 sm:$0xff]  }
 0x1e8   :  { %4270 = vmatpush2.bf16.msra.mxu1 %v5732_v3  ;;  %4230 = vmatprep.subr.bf16.mxu0 %v5737_v4  ;;  %v5803_v3 = vld [vmem:[%s7806_s1 + $0xe4c] ss:$16 sps:$4 sm:$0xff]  }
 0x1e9   :  { %4271 = vmatprep.subr.bf16.mxu1 %v5740_v31  ;;  %v5806_v4 = vld [vmem:[%s7806_s1 + $0x104c] ss:$16 sps:$4 sm:$0xff]   ;;  %v5801_v31 = vld [vmem:[%s7806_s1 + $0xe48] ss:$16 sps:$4 sm:$0xff]  }
 0x1eb   :  { %4231 = vmatpush2.bf16.msra.mxu0 %v5735_v23  ;;  %v5804_v23 = vld [vmem:[%s7806_s1 + $0x1048] ss:$16 sps:$4 sm:$0xff]  }
 0x1ec   :  { %4272 = vmatpush2.bf16.msra.mxu1 %v5738_v41  ;;  %4232 = vmatprep.subr.bf16.mxu0 %v5743_v5  ;;  %v5809_v41 = vld [vmem:[%s7806_s1 + $0xe2c] ss:$16 sps:$4 sm:$0xff]  }
 0x1ed   :  { %4273 = vmatprep.subr.bf16.mxu1 %v5746_v7  ;;  %v5812_v5 = vld [vmem:[%s7806_s1 + $0x102c] ss:$16 sps:$4 sm:$0xff]   ;;  %v5807_v7 = vld [vmem:[%s7806_s1 + $0xe28] ss:$16 sps:$4 sm:$0xff]  }
 0x1ef   :  { %4233 = vmatpush2.bf16.msra.mxu0 %v5741_v9  ;;  %v5810_v9 = vld [vmem:[%s7806_s1 + $0x1028] ss:$16 sps:$4 sm:$0xff]  }
 0x1f0   :  { %4274 = vmatpush2.bf16.msra.mxu1 %v5744_v12  ;;  %4234 = vmatprep.subr.bf16.mxu0 %v5749_v14  ;;  %v5815_v12 = vld [vmem:[%s7806_s1 + $0xe0c] ss:$16 sps:$4 sm:$0xff]  }
 0x1f1   :  { %4275 = vmatprep.subr.bf16.mxu1 %v5752_v11  ;;  %v5818_v14 = vld [vmem:[%s7806_s1 + $0x100c] ss:$16 sps:$4 sm:$0xff]   ;;  %v5813_v11 = vld [vmem:[%s7806_s1 + $0xe08] ss:$16 sps:$4 sm:$0xff]  }
 0x1f3   :  { %4235 = vmatpush2.bf16.msra.mxu0 %v5747_v39  ;;  %v5816_v39 = vld [vmem:[%s7806_s1 + $0x1008] ss:$16 sps:$4 sm:$0xff]  }
 0x1f4   :  { %4276 = vmatpush2.bf16.msra.mxu1 %v5750_v15  ;;  %4236 = vmatprep.subr.bf16.mxu0 %v5755_v16  ;;  %v5821_v15 = vld [vmem:[%s7806_s1 + $0xfec] ss:$16 sps:$4 sm:$0xff]  }
 0x1f5   :  { %4277 = vmatprep.subr.bf16.mxu1 %v5758_v19  ;;  %v5824_v16 = vld [vmem:[%s7806_s1 + $0x11ec] ss:$16 sps:$4 sm:$0xff]   ;;  %v5819_v19 = vld [vmem:[%s7806_s1 + $0xfe8] ss:$16 sps:$4 sm:$0xff]  }
 0x1f7   :  { %4237 = vmatpush2.bf16.msra.mxu0 %v5753_v21  ;;  %v5822_v21 = vld [vmem:[%s7806_s1 + $0x11e8] ss:$16 sps:$4 sm:$0xff]  }
 0x1f8   :  { %4278 = vmatpush2.bf16.msra.mxu1 %v5756_v22  ;;  %4238 = vmatprep.subr.bf16.mxu0 %v5761_v24  ;;  %v5827_v22 = vld [vmem:[%s7806_s1 + $0xfcc] ss:$16 sps:$4 sm:$0xff]  }
 0x1f9   :  { %4279 = vmatprep.subr.bf16.mxu1 %v5764_v6  ;;  %v5830_v24 = vld [vmem:[%s7806_s1 + $0x11cc] ss:$16 sps:$4 sm:$0xff]   ;;  %v5825_v6 = vld [vmem:[%s7806_s1 + $0xfc8] ss:$16 sps:$4 sm:$0xff]  }
 0x1fb   :  { %4239 = vmatpush2.bf16.msra.mxu0 %v5759_v50  ;;  %v5828_v50 = vld [vmem:[%s7806_s1 + $0x11c8] ss:$16 sps:$4 sm:$0xff]  }
 0x1fc   :  { %4280 = vmatpush2.bf16.msra.mxu1 %v5762_v13  ;;  %4240 = vmatprep.subr.bf16.mxu0 %v5767_v44  ;;  %v5833_v13 = vld [vmem:[%s7806_s1 + $0xfac] ss:$16 sps:$4 sm:$0xff]  }
 0x1fd   :  { %4281 = vmatprep.subr.bf16.mxu1 %v5770_v27  ;;  %v5836_v44 = vld [vmem:[%s7806_s1 + $0x11ac] ss:$16 sps:$4 sm:$0xff]   ;;  %v5831_v27 = vld [vmem:[%s7806_s1 + $0xfa8] ss:$16 sps:$4 sm:$0xff]  }
 0x1ff   :  { %4241 = vmatpush2.bf16.msra.mxu0 %v5765_v29  ;;  %v5834_v29 = vld [vmem:[%s7806_s1 + $0x11a8] ss:$16 sps:$4 sm:$0xff]  }
 0x200   :  { %4282 = vmatpush2.bf16.msra.mxu1 %v5768_v33  ;;  %4292 = vmatprep.subr.bf16.mxu0 %v5773_v52  ;;  %v5839_v33 = vld [vmem:[%s7806_s1 + $0xf8c] ss:$16 sps:$4 sm:$0xff]  }
 0x201   :  { %4333 = vmatprep.subr.bf16.mxu1 %v5776_v1  ;;  %v5842_v52 = vld [vmem:[%s7806_s1 + $0x118c] ss:$16 sps:$4 sm:$0xff]   ;;  %v5837_v1 = vld [vmem:[%s7806_s1 + $0xf88] ss:$16 sps:$4 sm:$0xff]  }
 0x202   :  { %v3998_v17 = vpop.f32.mrf.mxu0  ;;  %4243 = vmatmul.mubr.bf16.vlgmr.msra.gmra.mxu0 %v6558_v35  ;;  %v5785_v35 = vld [vmem:[%s7806_s1 + $0xeac] ss:$16 sps:$4 sm:$0xff]  }
 0x203   :  { %v7605_v36 = vpop.f32.mrf.mxu1  ;;  %4284 = vmatmul.mubr.bf16.vlgmr.msra.gmra.mxu1 %v6756_v10  ;;  %v3999_v37 = vadd.f32 %v3998_v17, %v7418_v25  ;;  %4293 = vmatpush1.bf16.msra.mxu0 %v5771_v43  ;;  %v5788_v10 = vld [vmem:[%s7806_s1 + $0x10ac] ss:$16 sps:$4 sm:$0xff]   ;;  %v5840_v43 = vld [vmem:[%s7806_s1 + $0x1188] ss:$16 sps:$4 sm:$0xff]  }
 0x204   :  { %4334 = vmatpush1.bf16.msra.mxu1 %v5774_v54  ;;  %v4000_v40 = vpop.f32.mrf.mxu0  ;;  %4294 = vmatprep.subr.bf16.mxu0 %v5779_v34  ;;  %v5845_v54 = vld [vmem:[%s7806_s1 + $0xf6c] ss:$16 sps:$4 sm:$0xff]   ;;  %v5846_v17 = vld [vmem:[%s7806_s1 + $0x1168] ss:$16 sps:$4 sm:$0xff]  }
 0x205   :  { %v7616_v45 = vpop.f32.mrf.mxu1  ;;  %4335 = vmatprep.subr.bf16.mxu1 %v5782_v0  ;;  %v4374_v25 = vmul.f32 0.2, %v3999_v37  ;;  %v4001_v46 = vadd.f32 %v4000_v40, %v7423_v28  ;;  %4324 = vmatprep.mubr.bf16.mxu0 %v6574_v59  ;;  %v5791_v59 = vld [vmem:[%s7806_s1 + $0xe8c] ss:$16 sps:$4 sm:$0xff]   ;;  %v5843_v0 = vld [vmem:[%s7806_s1 + $0xf68] ss:$16 sps:$4 sm:$0xff]  }
 0x206   :  { %4365 = vmatprep.mubr.bf16.mxu1 %v6796_v30  ;;  %v4002_v47 = vpop.f32.mrf.mxu0  ;;  %v5794_v30 = vld [vmem:[%s7806_s1 + $0x108c] ss:$16 sps:$4 sm:$0xff]   ;;  %v5852_v40 = vld [vmem:[%s7806_s1 + $0x1148] ss:$16 sps:$4 sm:$0xff]  }
 0x207   :  { %v4043_v48 = vpop.f32.mrf.mxu1  ;;  %v4375_v51 = vmul.f32 0.2, %v4001_v46  ;;  %4295 = vmatpush1.bf16.msra.mxu0 %v5777_v38  ;;  %v4378_v28 = vmax.f32 %v3999_v37, %v4374_v25  ;;  %v5848_v34 = vld [vmem:[%s7806_s1 + $0x116c] ss:$16 sps:$4 sm:$0xff]   ;;  %v5855_v25 = vld [vmem:[%s7806_s1 + $0xf28] ss:$16 sps:$4 sm:$0xff]  }
 0x208   :  { %4336 = vmatpush1.bf16.msra.mxu1 %v5780_v32  ;;  %v4003_v56 = vpop.f32.mrf.mxu0  ;;  %4296 = vmatprep.subr.bf16.mxu0 %v5785_v35  ;;  %v5851_v37 = vld [vmem:[%s7806_s1 + $0xf4c] ss:$16 sps:$4 sm:$0xff]   ;;  %v5849_v32 = vld [vmem:[%s7806_s1 + $0xf48] ss:$16 sps:$4 sm:$0xff]  }
 0x209   :  { %v4044_v57 = vpop.f32.mrf.mxu1  ;;  %4337 = vmatprep.subr.bf16.mxu1 %v5788_v10  ;;  %v4379_v60 = vmax.f32 %v4001_v46, %v4375_v51  ;;  %v5854_v38 = vld [vmem:[%s7806_s1 + $0x114c] ss:$16 sps:$4 sm:$0xff]   ;;  %v5858_v46 = vld [vmem:[%s7806_s1 + $0x1128] ss:$16 sps:$4 sm:$0xff]   ;;  %v605_v51 = vsub.s32 2, %v6006_v42 }
 0x20a   :  { %v5857_v35 = vld [vmem:[%s7806_s1 + $0xf2c] ss:$16 sps:$4 sm:$0xff]   ;;  %v5864_v56 = vld [vmem:[%s7806_s1 + $0x1108] ss:$16 sps:$4 sm:$0xff]   ;;  %v5867_v57 = vld [vmem:[%s7808_s2] sm:$0xf] }
 0x20b   :  { %v7639_v58 = vpack.c.bf16 %v4379_v60, %v4378_v28  ;;  %4297 = vmatpush1.bf16.msra.mxu0 %v5783_v53  ;;  %v5860_v10 = vld [vmem:[%s7806_s1 + $0x112c] ss:$16 sps:$4 sm:$0xff]   ;;  %v609_v53 = vsub.s32 3, %v6006_v42 }
 0x20c   :  { %4338 = vmatpush1.bf16.msra.mxu1 %v5786_v55  ;;  %4298 = vmatprep.subr.bf16.mxu0 %v5791_v59  ;;  %v5863_v47 = vld [vmem:[%s7806_s1 + $0xf0c] ss:$16 sps:$4 sm:$0xff]   ;;  %v5861_v55 = vld [vmem:[%s7806_s1 + $0xf08] ss:$16 sps:$4 sm:$0xff]   ;;  %v606_v59 = vrot.slane %v5867_v57, %v605_v51 }
 0x20d   :  { %4339 = vmatprep.subr.bf16.mxu1 %v5794_v30  ;;  %v5866_v48 = vld [vmem:[%s7806_s1 + $0x110c] ss:$16 sps:$4 sm:$0xff]   ;;  %v610_v30 = vrot.slane %v5867_v57, %v609_v53  ;;  %v4398_v51 = vrot.slane %v7639_v58, %v6024_v49 }
 0x20e   :  { %v4040_v42 = vadd.f32 %v7605_v36, %v606_v59 }
 0x20f   :  { %4299 = vmatpush1.bf16.msra.mxu0 %v5789_v18  ;;  %v4042_v18 = vadd.f32 %v7616_v45, %v610_v30 }
 0x210   :  { %4340 = vmatpush1.bf16.msra.mxu1 %v5792_v26  ;;  %4300 = vmatprep.subr.bf16.mxu0 %v5797_v61 }
 0x211   :  { %4341 = vmatprep.subr.bf16.mxu1 %v5800_v62 }
 0x213   :  { %4301 = vmatpush1.bf16.msra.mxu0 %v5795_v63 }
 0x214   :  { %4342 = vmatpush1.bf16.msra.mxu1 %v5798_v2  ;;  %4302 = vmatprep.subr.bf16.mxu0 %v5803_v3 }
 0x215   :  { %4343 = vmatprep.subr.bf16.mxu1 %v5806_v4 }
 0x217   :  { %4303 = vmatpush1.bf16.msra.mxu0 %v5801_v31 }
 0x218   :  { %4344 = vmatpush1.bf16.msra.mxu1 %v5804_v23  ;;  %4304 = vmatprep.subr.bf16.mxu0 %v5809_v41 }
 0x219   :  { %4345 = vmatprep.subr.bf16.mxu1 %v5812_v5 }
 0x21b   :  { %4305 = vmatpush1.bf16.msra.mxu0 %v5807_v7 }
 0x21c   :  { %4346 = vmatpush1.bf16.msra.mxu1 %v5810_v9  ;;  %4306 = vmatprep.subr.bf16.mxu0 %v5815_v12 }
 0x21d   :  { %4347 = vmatprep.subr.bf16.mxu1 %v5818_v14 }
 0x21f   :  { %4307 = vmatpush1.bf16.msra.mxu0 %v5813_v11 }
 0x220   :  { %4348 = vmatpush1.bf16.msra.mxu1 %v5816_v39  ;;  %4308 = vmatprep.subr.bf16.mxu0 %v5821_v15 }
 0x221   :  { %4349 = vmatprep.subr.bf16.mxu1 %v5824_v16 }
 0x223   :  { %4309 = vmatpush2.bf16.msra.mxu0 %v5819_v19 }
 0x224   :  { %4350 = vmatpush2.bf16.msra.mxu1 %v5822_v21  ;;  %4310 = vmatprep.subr.bf16.mxu0 %v5827_v22 }
 0x225   :  { %4351 = vmatprep.subr.bf16.mxu1 %v5830_v24 }
 0x227   :  { %4311 = vmatpush2.bf16.msra.mxu0 %v5825_v6 }
 0x228   :  { %4352 = vmatpush2.bf16.msra.mxu1 %v5828_v50  ;;  %4312 = vmatprep.subr.bf16.mxu0 %v5833_v13 }
 0x229   :  { %4353 = vmatprep.subr.bf16.mxu1 %v5836_v44 }
 0x22b   :  { %4313 = vmatpush2.bf16.msra.mxu0 %v5831_v27 }
 0x22c   :  { %4354 = vmatpush2.bf16.msra.mxu1 %v5834_v29  ;;  %4314 = vmatprep.subr.bf16.mxu0 %v5839_v33 }
 0x22d   :  { %4355 = vmatprep.subr.bf16.mxu1 %v5842_v52 }
 0x22f   :  { %4315 = vmatpush2.bf16.msra.mxu0 %v5837_v1 }
 0x230   :  { %4356 = vmatpush2.bf16.msra.mxu1 %v5840_v43  ;;  %4316 = vmatprep.subr.bf16.mxu0 %v5845_v54 }
 0x231   :  { %4357 = vmatprep.subr.bf16.mxu1 %v5848_v34 }
 0x233   :  { %4317 = vmatpush2.bf16.msra.mxu0 %v5843_v0 }
 0x234   :  { %4358 = vmatpush2.bf16.msra.mxu1 %v5846_v17  ;;  %4318 = vmatprep.subr.bf16.mxu0 %v5851_v37 }
 0x235   :  { %4359 = vmatprep.subr.bf16.mxu1 %v5854_v38 }
 0x237   :  { %4319 = vmatpush2.bf16.msra.mxu0 %v5849_v32 }
 0x238   :  { %4360 = vmatpush2.bf16.msra.mxu1 %v5852_v40  ;;  %4320 = vmatprep.subr.bf16.mxu0 %v5857_v35 }
 0x239   :  { %4361 = vmatprep.subr.bf16.mxu1 %v5860_v10 }
 0x23b   :  { %4321 = vmatpush2.bf16.msra.mxu0 %v5855_v25 }
 0x23c   :  { %4362 = vmatpush2.bf16.msra.mxu1 %v5858_v46  ;;  %4322 = vmatprep.subr.bf16.mxu0 %v5863_v47 }
 0x23d   :  { %4363 = vmatprep.subr.bf16.mxu1 %v5866_v48 }
 0x23f   :  { %4323 = vmatpush2.bf16.msra.mxu0 %v5861_v55 }
 0x240   :  { %4364 = vmatpush2.bf16.msra.mxu1 %v5864_v56 }
 0x242   :  { %v4080_v28 = vpop.f32.mrf.mxu0  ;;  %4325 = vmatmul.mubr.bf16.vlgmr.msra.gmra.mxu0 %v6778_v20 }
 0x243   :  { %v4121_v60 = vpop.f32.mrf.mxu1  ;;  %4366 = vmatmul.mubr.bf16.vlgmr.msra.gmra.mxu1 %v6991_v8  ;;  %v4081_v26 = vadd.f32 %v4080_v28, %v4040_v42 }
 0x244   :  { %v4082_v61 = vpop.f32.mrf.mxu0 }
 0x245   :  { %v4123_v62 = vpop.f32.mrf.mxu1  ;;  %v4122_v63 = vadd.f32 %v4121_v60, %v4081_v26  ;;  %v4083_v2 = vadd.f32 %v4082_v61, %v4042_v18 }
 0x246   :  { %v4084_v3 = vpop.f32.mrf.mxu0 }
 0x247   :  { %v4125_v4 = vpop.f32.mrf.mxu1  ;;  %v4124_v31 = vadd.f32 %v4123_v62, %v4083_v2 }
 0x248   :  { %v4085_v23 = vpop.f32.mrf.mxu0 }
 0x249   :  { %v4126_v41 = vpop.f32.mrf.mxu1 }
 0x282   :  { %v4162_v5 = vpop.f32.mrf.mxu0 }
 0x283   :  { %v4203_v36 = vpop.f32.mrf.mxu1  ;;  %v4163_v7 = vadd.f32 %v4162_v5, %v4122_v63 }
 0x284   :  { %v4164_v9 = vpop.f32.mrf.mxu0 }
 0x285   :  { %v4205_v12 = vpop.f32.mrf.mxu1  ;;  %v4204_v20 = vadd.f32 %v4203_v36, %v4163_v7  ;;  %v4165_v14 = vadd.f32 %v4164_v9, %v4124_v31 }
 0x286   :  { %v4166_v8 = vpop.f32.mrf.mxu0 }
 0x287   :  { %v4207_v11 = vpop.f32.mrf.mxu1  ;;  %v4206_v45 = vadd.f32 %v4205_v12, %v4165_v14 }
 0x288   :  { %v4167_v39 = vpop.f32.mrf.mxu0 }
 0x289   :  { %v4208_v15 = vpop.f32.mrf.mxu1 }
 0x2c2   :  { %v4244_v16 = vpop.f32.mrf.mxu0 }
 0x2c3   :  { %v4285_v19 = vpop.f32.mrf.mxu1  ;;  %v4245_v21 = vadd.f32 %v4244_v16, %v4204_v20 }
 0x2c4   :  { %v4246_v22 = vpop.f32.mrf.mxu0 }
 0x2c5   :  { %v4287_v24 = vpop.f32.mrf.mxu1  ;;  %v4286_v6 = vadd.f32 %v4285_v19, %v4245_v21  ;;  %v4247_v29 = vadd.f32 %v4246_v22, %v4206_v45 }
 0x2c6   :  { %v4248_v50 = vpop.f32.mrf.mxu0 }
 0x2c7   :  { %v4289_v13 = vpop.f32.mrf.mxu1  ;;  %v4288_v1 = vadd.f32 %v4287_v24, %v4247_v29 }
 0x2c8   :  { %v4249_v44 = vpop.f32.mrf.mxu0 }
 0x2c9   :  { %v4290_v27 = vpop.f32.mrf.mxu1 }
 0x302   :  { %v4326_v33 = vpop.f32.mrf.mxu0 }
 0x303   :  { %v4367_v52 = vpop.f32.mrf.mxu1  ;;  %v4327_v43 = vadd.f32 %v4326_v33, %v4286_v6 }
 0x304   :  { %v4328_v54 = vpop.f32.mrf.mxu0 }
 0x305   :  { %v4369_v34 = vpop.f32.mrf.mxu1  ;;  %v4368_v0 = vadd.f32 %v4367_v52, %v4327_v43  ;;  %v4329_v17 = vadd.f32 %v4328_v54, %v4288_v1 }
 0x306   :  { %v4330_v37 = vpop.f32.mrf.mxu0 }
 0x307   :  { %v4371_v38 = vpop.f32.mrf.mxu1  ;;  %v4376_v32 = vmul.f32 0.2, %v4368_v0  ;;  %v4370_v40 = vadd.f32 %v4369_v34, %v4329_v17 }
 0x308   :  { %v4331_v35 = vpop.f32.mrf.mxu0 }
 0x309   :  { %v4372_v10 = vpop.f32.mrf.mxu1  ;;  %v4377_v25 = vmul.f32 0.2, %v4370_v40  ;;  %v4380_v46 = vmax.f32 %v4368_v0, %v4376_v32 }
 0x30b   :  { %v4381_v47 = vmax.f32 %v4370_v40, %v4377_v25 }
 0x30d   :  { %v4998_v48 = vpack.c.bf16 %v4381_v47, %v4380_v46 }
 0x30f   :  { %v4405_v53 = vrot.slane %v4998_v48, %v6024_v49 }
 0x311   :  { %v4406_v55 = vcombine.low %v4398_v51, %v4405_v53 }
 0x313   :  { %4999 = vst.sshfl [vmem:[%s7809_s3] sm:$0x55 pattern:$0x73625140] %v4406_v55 }

</bundles_post_ra>
